<compile_context>
chip_gen: v7x
topology: tpu7x:2x2x1
jax: 0.10.0
libtpu: 0.0.40
codegen_flags: <defaults>
</compile_context>

<pallas_src>
import functools

import jax
import jax.numpy as jnp
from jax import lax
from jax.experimental import pallas as pl
from jax.experimental.pallas import tpu as pltpu

IMG_C = 3        # RGB
HIDDEN = 8       # hidden feature channels
NUM_STEPS = 3    # recurrent refinement steps (shared weights)


# --------------------------------------------------------------------------
# Fused generator kernel: all steps, both convs, activations and blend.
# --------------------------------------------------------------------------
def _generator_kernel(img_ref, aux_ref, w1_ref, b1_ref, w2_ref, b2_ref,
                      out_ref, res_ref,
                      pad1_ref, pad2_ref,
                      *, Wp, alpha, num_steps):
    """Runs `num_steps` of conv3x3+ReLU -> conv3x3+tanh -> masked blend.

    Layout: every activation is (channels, L) with L = round_up(H*Wp, 128),
    Wp = W+2.  Real pixel (y, x) lives at flat column y*Wp + x + 1; all other
    columns are zero "halo" columns (kept zero by the `valid` multiply).
    Vertical halo comes from the zeroed head/tail of the VMEM scratch buffers,
    so the 3x3 tap (dy, dx) is the static slab pad[:, dy*Wp+dx : dy*Wp+dx+L].
    """
    C = img_ref.shape[1]
    L = img_ref.shape[2]
    OFF = Wp + 1                        # scratch interior offset
    cin1 = pad1_ref.shape[0]            # C + 2 (image, mask, constant_mask)
    hidden = pad2_ref.shape[0]
    P1 = pad1_ref.shape[1]
    P2 = pad2_ref.shape[1]

    images = img_ref[0]                 # (C, L)  f32
    aux = aux_ref[0]                    # (3, L)  f32: [mask, const_mask, valid]
    m = aux[0:1]                        # 1 = known pixel
    valid = aux[2:3]                    # 1 = real pixel column
    one_minus_m = 1.0 - m
    w1 = w1_ref[...]                    # (9, F, C+2)  bf16
    b1 = b1_ref[...]                    # (F, 1)       f32
    w2 = w2_ref[...]                    # (9, C, F)    bf16
    b2 = b2_ref[...]                    # (C, 1)       f32

    # Zero ONLY the vertical-halo head/tail of the scratch buffers (tiny:
    # 2*(Wp+1) columns each).  Interior columns are overwritten every step and
    # their halo columns stay zero via the `valid` multiply.
    pad1_ref[:, 0:OFF] = jnp.zeros((cin1, OFF), pad1_ref.dtype)
    pad1_ref[:, OFF + L:P1] = jnp.zeros((cin1, P1 - OFF - L), pad1_ref.dtype)
    pad2_ref[:, 0:OFF] = jnp.zeros((hidden, OFF), pad2_ref.dtype)
    pad2_ref[:, OFF + L:P2] = jnp.zeros((hidden, P2 - OFF - L), pad2_ref.dtype)

    # Mask channels of the conv1 input never change inside the step loop.
    pad1_ref[C:C + 2, OFF:OFF + L] = aux[0:2]

    def conv3x3(pad_ref, w, b, cast_slab):
        """MXU 3x3 conv: 9 tap-shifted bf16 (cout,cin)@(cin,L) dots, f32 acc."""
        acc = None
        for t in range(9):
            dy, dx = divmod(t, 3)
            s = dy * Wp + dx
            slab = pad_ref[:, s:s + L]                       # (cin, L)
            if cast_slab:
                slab = slab.astype(jnp.bfloat16)
            d = jnp.dot(w[t], slab, preferred_element_type=jnp.float32)
            acc = d if acc is None else acc + d
        return acc + b

    x = images * m                      # initial estimate: known pixels only
    for step in range(num_steps):
        # conv1 + ReLU   (input channels: [x, mask, constant_mask])
        pad1_ref[0:C, OFF:OFF + L] = x
        h = jnp.maximum(conv3x3(pad1_ref, w1, b1, cast_slab=True), 0.0) * valid

        # conv2 + tanh -> residual image (pad2 held in bf16, full-row store)
        pad2_ref[:, OFF:OFF + L] = h.astype(jnp.bfloat16)
        r = jnp.tanh(conv3x3(pad2_ref, w2, b2, cast_slab=False))   # (C, L) f32
        res_ref[0, step] = r.astype(res_ref.dtype)                 # bf16 writeback

        # teacher-forcing mix + masked blend (alpha == 0 path specialized)
        if alpha > 0.0:
            fill = (1.0 - alpha) * r + alpha * images
        else:
            fill = r
        x = (x * m + fill * one_minus_m) * valid
    out_ref[0] = x


# --------------------------------------------------------------------------
# Wrapper: layout plumbing + pallas_call
# --------------------------------------------------------------------------
def _round_up(x, mult):
    return (x + mult - 1) // mult * mult


def _layout(H, W):
    Wp = W + 2                              # 1-column horizontal halo each side
    L = _round_up(H * Wp, 128)              # lane-dense trailing dim
    return Wp, L


def _to_flat(a, Wp, L):
    n, c, H, W = a.shape
    a = jnp.pad(a, ((0, 0), (0, 0), (0, 0), (1, Wp - 1 - W)))
    a = a.reshape(n, c, H * Wp)
    if L > H * Wp:
        a = jnp.pad(a, ((0, 0), (0, 0), (0, L - H * Wp)))
    return a


def _from_flat(a, H, W, Wp):
    n, c, _ = a.shape
    a = a[:, :, :H * Wp].reshape(n, c, H, Wp)[:, :, :, 1:1 + W]
    return a.astype(jnp.float32)


@functools.partial(jax.jit, static_argnames=("alpha",))
def inpainting_generator(params, images, masks, constant_mask, alpha=0.0):
    """images: (N,3,H,W); masks/constant_mask: (N,1,H,W); mask==1 means known.

    Returns (outputs, residuals, res_masks) like the torch generator.
    """
    N, C, H, W = images.shape
    Wp, L = _layout(H, W)
    pad_len = L + 2 * (Wp + 1)

    img_f = _to_flat(images, Wp, L)
    m_f = _to_flat(masks, Wp, L)
    cm_f = _to_flat(constant_mask, Wp, L)
    # "valid" = 1 on real pixel columns, 0 on halo / tail-padding columns.
    cols = jnp.arange(L, dtype=jnp.int32)
    xpos = cols % Wp
    valid_row = ((cols < H * Wp) & (xpos >= 1) & (xpos <= W)).astype(jnp.float32)
    valid_f = jnp.broadcast_to(valid_row.reshape(1, 1, L), (N, 1, L))
    # Pack mask / constant_mask / valid into one 3-row aux tile.
    aux_f = jnp.concatenate([m_f, cm_f, valid_f], axis=1)          # (N, 3, L)

    w1 = params["w1"]                                   # (3,3,C+2,F)
    cin1, hidden = w1.shape[2], w1.shape[3]
    w1_k = jnp.transpose(w1.reshape(9, cin1, hidden),
                         (0, 2, 1)).astype(jnp.bfloat16)           # (9,F,C+2)
    b1_k = params["b1"].reshape(hidden, 1).astype(jnp.float32)
    w2 = params["w2"]                                   # (3,3,F,C)
    w2_k = jnp.transpose(w2.reshape(9, hidden, C),
                         (0, 2, 1)).astype(jnp.bfloat16)           # (9,C,F)
    b2_k = params["b2"].reshape(C, 1).astype(jnp.float32)

    kernel = functools.partial(_generator_kernel, Wp=Wp,
                               alpha=float(alpha), num_steps=NUM_STEPS)

    out_f, res_f = pl.pallas_call(
        kernel,
        out_shape=(
            jax.ShapeDtypeStruct((N, C, L), jnp.float32),
            jax.ShapeDtypeStruct((N, NUM_STEPS, C, L), jnp.bfloat16),
        ),
        grid=(N,),
        in_specs=[
            pl.BlockSpec((1, C, L), lambda n: (n, 0, 0)),
            pl.BlockSpec((1, 3, L), lambda n: (n, 0, 0)),
            pl.BlockSpec((9, hidden, cin1), lambda n: (0, 0, 0)),
            pl.BlockSpec((hidden, 1), lambda n: (0, 0)),
            pl.BlockSpec((9, C, hidden), lambda n: (0, 0, 0)),
            pl.BlockSpec((C, 1), lambda n: (0, 0)),
        ],
        out_specs=(
            pl.BlockSpec((1, C, L), lambda n: (n, 0, 0)),
            pl.BlockSpec((1, NUM_STEPS, C, L), lambda n: (n, 0, 0, 0)),
        ),
        scratch_shapes=[
            pltpu.VMEM((cin1, pad_len), jnp.float32),    # conv1 padded input
            pltpu.VMEM((hidden, pad_len), jnp.bfloat16), # conv2 padded input
        ],
        compiler_params=pltpu.CompilerParams(
            dimension_semantics=("parallel",),
            vmem_limit_bytes=48 * 1024 * 1024),
    )(img_f, aux_f, w1_k, b1_k, w2_k, b2_k)

    outputs = _from_flat(out_f, H, W, Wp)
    residuals = [_from_flat(res_f[:, s], H, W, Wp) for s in range(NUM_STEPS)]
    res_masks = [1.0 - masks for _ in range(NUM_STEPS)]
    return outputs, residuals, res_masks


# --------------------------------------------------------------------------
# Pure-JAX reference of the same generator (for a tolerance check).
# --------------------------------------------------------------------------
def _reference_generator(params, images, masks, constant_mask, alpha=0.0):
    def conv(x_in, w, b):
        y = lax.conv_general_dilated(
            x_in, w, window_strides=(1, 1), padding="SAME",
            dimension_numbers=("NCHW", "HWIO", "NCHW"))
        return y + b.reshape(1, -1, 1, 1)

    m = masks
    x = images * m
    residuals = []
    for _ in range(NUM_STEPS):
        inp = jnp.concatenate([x, masks, constant_mask], axis=1)
        h = jnp.maximum(conv(inp, params["w1"], params["b1"]), 0.0)
        r = jnp.tanh(conv(h, params["w2"], params["b2"]))
        residuals.append(r)
        fill = r if alpha == 0.0 else (1.0 - alpha) * r + alpha * images
        x = x * m + fill * (1.0 - m)
    return x, residuals


# --------------------------------------------------------------------------
# Parameters and model wrapper
# --------------------------------------------------------------------------
def init_params(key):
    k1, k2, k3, k4 = jax.random.split(key, 4)
    cin1 = IMG_C + 2            # [image, mask, constant_mask] concat
    w1 = 0.1 * jax.random.normal(k1, (3, 3, cin1, HIDDEN), jnp.float32)
    b1 = 0.01 * jax.random.normal(k2, (HIDDEN,), jnp.float32)
    w2 = 0.1 * jax.random.normal(k3, (3, 3, HIDDEN, IMG_C), jnp.float32)
    b2 = 0.01 * jax.random.normal(k4, (IMG_C,), jnp.float32)
    return {"w1": w1, "b1": b1, "w2": w2, "b2": b2}


class InpaintingModelPallas:
    """Mirrors InpaintingModel.forward: choose alpha, call the generator."""

    def __init__(self, config, key):
        self.alpha = config["training"]["alpha"]
        self.beta = config["training"]["beta"]
        self.params = init_params(key)

    def forward(self, images, masks, constant_mask):
        # torch: alpha = random_alpha(self.alpha, self.beta) if self.alpha > 0 else 0
        alpha = float(self.alpha) if self.alpha > 0 else 0.0
        return inpainting_generator(self.params, images, masks, constant_mask,
                                    alpha=alpha)


# --------------------------------------------------------------------------
# Driver
# --------------------------------------------------------------------------
if __name__ == "__main__":
    config = {
        "path": {"experiment": "./"},
        "gpu": "",
        "training": {
            "discriminator": False,
            "rec_loss_weight": 1.0, "step_loss_weight": 1.0,
            "mse_loss_weight": 1.0, "style_loss_weight": 1.0,
            "per_loss_weight": 1.0, "learning_rate": 1e-4,
            "beta1": 0.9, "beta2": 0.999, "optimizer": "adam",
            "gan_loss": "nsgan", "adv_loss_weight": 0.1, "d2g_lr": 1.0,
            "beta": 1.0, "alpha": 0.0, "alpha_decay": 0.0,
            "alpha_decay_start_iter": 0,
        },
    }

    key = jax.random.PRNGKey(0)
    k_param, k_img, k_mask = jax.random.split(key, 3)

    N, C, H, W = 2, IMG_C, 16, 16
    images = jax.random.normal(k_img, (N, C, H, W), jnp.float32)
    masks = (jax.random.uniform(k_mask, (N, 1, H, W)) > 0.5).astype(jnp.float32)
    constant_mask = jnp.ones((N, 1, H, W), jnp.float32)

    model = InpaintingModelPallas(config, k_param)
    outputs, residuals, res_masks = model.forward(images, masks, constant_mask)

    jax.block_until_ready(outputs)
    jax.block_until_ready(residuals)
    jax.block_until_ready(res_masks)

    assert outputs.shape == (N, C, H, W)
    assert len(residuals) == NUM_STEPS and len(res_masks) == NUM_STEPS
    assert residuals[0].shape == (N, C, H, W)

    # Tolerance check vs. pure-JAX f32 reference (kernel uses bf16 MXU
    # operands / bf16 residual writeback, so allow a loose tolerance).
    ref_out, ref_res = _reference_generator(model.params, images, masks,
                                            constant_mask, alpha=0.0)
    assert jnp.allclose(outputs, ref_out, atol=1e-1), \
        float(jnp.abs(outputs - ref_out).max())
    for r_k, r_ref in zip(residuals, ref_res):
        assert jnp.allclose(r_k, r_ref, atol=1e-1), \
            float(jnp.abs(r_k - r_ref).max())

    print("KERNEL_OK")
</pallas_src>

<mosaic_0001>
module attributes {stable_mosaic.version = 11 : i64} {
  func.func @_generator_kernel(%arg0: i32, %arg1: memref<1x3x384xf32, #tpu.memory_space<vmem>>, %arg2: memref<1x3x384xf32, #tpu.memory_space<vmem>>, %arg3: memref<9x8x5xbf16, #tpu.memory_space<vmem>>, %arg4: memref<8x1xf32, #tpu.memory_space<vmem>>, %arg5: memref<9x3x8xbf16, #tpu.memory_space<vmem>>, %arg6: memref<3x1xf32, #tpu.memory_space<vmem>>, %arg7: memref<1x3x384xf32, #tpu.memory_space<vmem>>, %arg8: memref<1x3x3x384xbf16, #tpu.memory_space<vmem>>, %arg9: memref<5x422xf32, #tpu.memory_space<vmem>>, %arg10: memref<8x422xbf16, #tpu.memory_space<vmem>>) attributes {dimension_semantics = [#tpu.dimension_semantics<parallel>], iteration_bounds = array<i64: 2>, scalar_prefetch = 0 : i64, scratch_operands = 2 : i64, tpu.core_type = #tpu.core_type<tc>, window_params = [{transform_indices = @transform_0, window_bounds = array<i64: 1, 3, 384>}, {transform_indices = @transform_1, window_bounds = array<i64: 1, 3, 384>}, {pipeline_mode = #tpu.pipeline_mode<synchronous>, transform_indices = @transform_2, window_bounds = array<i64: 9, 8, 5>}, {pipeline_mode = #tpu.pipeline_mode<synchronous>, transform_indices = @transform_3, window_bounds = array<i64: 8, 1>}, {pipeline_mode = #tpu.pipeline_mode<synchronous>, transform_indices = @transform_4, window_bounds = array<i64: 9, 3, 8>}, {pipeline_mode = #tpu.pipeline_mode<synchronous>, transform_indices = @transform_5, window_bounds = array<i64: 3, 1>}, {transform_indices = @transform_6, window_bounds = array<i64: 1, 3, 384>}, {transform_indices = @transform_7, window_bounds = array<i64: 1, 3, 3, 384>}]} {
    %c0 = arith.constant 0 : index
    %c0_0 = arith.constant 0 : index
    %c0_1 = arith.constant 0 : index
    %0 = vector.load %arg1[%c0, %c0_0, %c0_1] : memref<1x3x384xf32, #tpu.memory_space<vmem>>, vector<1x3x384xf32>
    %1 = vector.shape_cast %0 : vector<1x3x384xf32> to vector<3x384xf32>
    %c0_2 = arith.constant 0 : index
    %c0_3 = arith.constant 0 : index
    %c0_4 = arith.constant 0 : index
    %2 = vector.load %arg2[%c0_2, %c0_3, %c0_4] : memref<1x3x384xf32, #tpu.memory_space<vmem>>, vector<1x3x384xf32>
    %3 = vector.shape_cast %2 : vector<1x3x384xf32> to vector<3x384xf32>
    %4 = vector.extract_strided_slice %3 {offsets = [0, 0], sizes = [1, 384], strides = [1, 1]} : vector<3x384xf32> to vector<1x384xf32>
    %5 = vector.extract_strided_slice %3 {offsets = [2, 0], sizes = [1, 384], strides = [1, 1]} : vector<3x384xf32> to vector<1x384xf32>
    %cst = arith.constant 1.000000e+00 : f32
    %6 = vector.broadcast %cst : f32 to vector<1x384xf32>
    %7 = arith.subf %6, %4 : vector<1x384xf32>
    %c0_5 = arith.constant 0 : index
    %c0_6 = arith.constant 0 : index
    %c0_7 = arith.constant 0 : index
    %8 = vector.load %arg3[%c0_5, %c0_6, %c0_7] : memref<9x8x5xbf16, #tpu.memory_space<vmem>>, vector<9x8x5xbf16>
    %c0_8 = arith.constant 0 : index
    %c0_9 = arith.constant 0 : index
    %9 = vector.load %arg4[%c0_8, %c0_9] : memref<8x1xf32, #tpu.memory_space<vmem>>, vector<8x1xf32>
    %c0_10 = arith.constant 0 : index
    %c0_11 = arith.constant 0 : index
    %c0_12 = arith.constant 0 : index
    %10 = vector.load %arg5[%c0_10, %c0_11, %c0_12] : memref<9x3x8xbf16, #tpu.memory_space<vmem>>, vector<9x3x8xbf16>
    %c0_13 = arith.constant 0 : index
    %c0_14 = arith.constant 0 : index
    %11 = vector.load %arg6[%c0_13, %c0_14] : memref<3x1xf32, #tpu.memory_space<vmem>>, vector<3x1xf32>
    %cst_15 = arith.constant 0.000000e+00 : f32
    %12 = vector.broadcast %cst_15 : f32 to vector<5x19xf32>
    %c0_16 = arith.constant 0 : index
    %c0_17 = arith.constant 0 : index
    %13 = vector.load %arg9[%c0_16, %c0_17] : memref<5x422xf32, #tpu.memory_space<vmem>>, vector<5x19xf32>
    tpu.vector_store %arg9[%c0_16, %c0_17], %12 {strides = array<i32>} : memref<5x422xf32, #tpu.memory_space<vmem>>, vector<5x19xf32>,
    %cst_18 = arith.constant 0.000000e+00 : f32
    %14 = vector.broadcast %cst_18 : f32 to vector<5x19xf32>
    %c0_19 = arith.constant 0 : index
    %c403 = arith.constant 403 : index
    %15 = vector.load %arg9[%c0_19, %c403] : memref<5x422xf32, #tpu.memory_space<vmem>>, vector<5x19xf32>
    tpu.vector_store %arg9[%c0_19, %c403], %14 {strides = array<i32>} : memref<5x422xf32, #tpu.memory_space<vmem>>, vector<5x19xf32>,
    %cst_20 = arith.constant 0.000000e+00 : bf16
    %16 = vector.broadcast %cst_20 : bf16 to vector<8x19xbf16>
    %c0_21 = arith.constant 0 : index
    %c0_22 = arith.constant 0 : index
    %17 = vector.load %arg10[%c0_21, %c0_22] : memref<8x422xbf16, #tpu.memory_space<vmem>>, vector<8x19xbf16>
    tpu.vector_store %arg10[%c0_21, %c0_22], %16 {strides = array<i32>} : memref<8x422xbf16, #tpu.memory_space<vmem>>, vector<8x19xbf16>,
    %cst_23 = arith.constant 0.000000e+00 : bf16
    %18 = vector.broadcast %cst_23 : bf16 to vector<8x19xbf16>
    %c0_24 = arith.constant 0 : index
    %c403_25 = arith.constant 403 : index
    %19 = vector.load %arg10[%c0_24, %c403_25] : memref<8x422xbf16, #tpu.memory_space<vmem>>, vector<8x19xbf16>
    tpu.vector_store %arg10[%c0_24, %c403_25], %18 {strides = array<i32>} : memref<8x422xbf16, #tpu.memory_space<vmem>>, vector<8x19xbf16>,
    %20 = vector.extract_strided_slice %3 {offsets = [0, 0], sizes = [2, 384], strides = [1, 1]} : vector<3x384xf32> to vector<2x384xf32>
    %c3 = arith.constant 3 : index
    %c19 = arith.constant 19 : index
    %21 = vector.load %arg9[%c3, %c19] : memref<5x422xf32, #tpu.memory_space<vmem>>, vector<2x384xf32>
    tpu.vector_store %arg9[%c3, %c19], %20 {strides = array<i32>} : memref<5x422xf32, #tpu.memory_space<vmem>>, vector<2x384xf32>,
    %22 = vector.broadcast %4 : vector<1x384xf32> to vector<3x384xf32>
    %23 = arith.mulf %1, %22 : vector<3x384xf32>
    %c0_26 = arith.constant 0 : index
    %c19_27 = arith.constant 19 : index
    %24 = vector.load %arg9[%c0_26, %c19_27] : memref<5x422xf32, #tpu.memory_space<vmem>>, vector<3x384xf32>
    tpu.vector_store %arg9[%c0_26, %c19_27], %23 {strides = array<i32>} : memref<5x422xf32, #tpu.memory_space<vmem>>, vector<3x384xf32>,
    %c0_28 = arith.constant 0 : index
    %c0_29 = arith.constant 0 : index
    %25 = vector.load %arg9[%c0_28, %c0_29] : memref<5x422xf32, #tpu.memory_space<vmem>>, vector<5x384xf32>
    %26 = arith.truncf %25 : vector<5x384xf32> to vector<5x384xbf16>
    %27 = vector.extract_strided_slice %8 {offsets = [0, 0, 0], sizes = [1, 8, 5], strides = [1, 1, 1]} : vector<9x8x5xbf16> to vector<1x8x5xbf16>
    %28 = vector.shape_cast %27 : vector<1x8x5xbf16> to vector<8x5xbf16>
    %cst_30 = arith.constant dense<0.000000e+00> : vector<8x384xf32>
    %29 = tpu.matmul %28, %26, %cst_30 {dimension_numbers = #tpu.dot_dimension_numbers<[1], [0], [0], [1], [0, 0, 1, 1], [], []>} : vector<8x5xbf16>, vector<5x384xbf16>, vector<8x384xf32> -> vector<8x384xf32>
    %c0_31 = arith.constant 0 : index
    %c1 = arith.constant 1 : index
    %30 = vector.load %arg9[%c0_31, %c1] : memref<5x422xf32, #tpu.memory_space<vmem>>, vector<5x384xf32>
    %31 = arith.truncf %30 : vector<5x384xf32> to vector<5x384xbf16>
    %32 = vector.extract_strided_slice %8 {offsets = [1, 0, 0], sizes = [1, 8, 5], strides = [1, 1, 1]} : vector<9x8x5xbf16> to vector<1x8x5xbf16>
    %33 = vector.shape_cast %32 : vector<1x8x5xbf16> to vector<8x5xbf16>
    %cst_32 = arith.constant dense<0.000000e+00> : vector<8x384xf32>
    %34 = tpu.matmul %33, %31, %cst_32 {dimension_numbers = #tpu.dot_dimension_numbers<[1], [0], [0], [1], [0, 0, 1, 1], [], []>} : vector<8x5xbf16>, vector<5x384xbf16>, vector<8x384xf32> -> vector<8x384xf32>
    %35 = arith.addf %29, %34 : vector<8x384xf32>
    %c0_33 = arith.constant 0 : index
    %c2 = arith.constant 2 : index
    %36 = vector.load %arg9[%c0_33, %c2] : memref<5x422xf32, #tpu.memory_space<vmem>>, vector<5x384xf32>
    %37 = arith.truncf %36 : vector<5x384xf32> to vector<5x384xbf16>
    %38 = vector.extract_strided_slice %8 {offsets = [2, 0, 0], sizes = [1, 8, 5], strides = [1, 1, 1]} : vector<9x8x5xbf16> to vector<1x8x5xbf16>
    %39 = vector.shape_cast %38 : vector<1x8x5xbf16> to vector<8x5xbf16>
    %cst_34 = arith.constant dense<0.000000e+00> : vector<8x384xf32>
    %40 = tpu.matmul %39, %37, %cst_34 {dimension_numbers = #tpu.dot_dimension_numbers<[1], [0], [0], [1], [0, 0, 1, 1], [], []>} : vector<8x5xbf16>, vector<5x384xbf16>, vector<8x384xf32> -> vector<8x384xf32>
    %41 = arith.addf %35, %40 : vector<8x384xf32>
    %c0_35 = arith.constant 0 : index
    %c18 = arith.constant 18 : index
    %42 = vector.load %arg9[%c0_35, %c18] : memref<5x422xf32, #tpu.memory_space<vmem>>, vector<5x384xf32>
    %43 = arith.truncf %42 : vector<5x384xf32> to vector<5x384xbf16>
    %44 = vector.extract_strided_slice %8 {offsets = [3, 0, 0], sizes = [1, 8, 5], strides = [1, 1, 1]} : vector<9x8x5xbf16> to vector<1x8x5xbf16>
    %45 = vector.shape_cast %44 : vector<1x8x5xbf16> to vector<8x5xbf16>
    %cst_36 = arith.constant dense<0.000000e+00> : vector<8x384xf32>
    %46 = tpu.matmul %45, %43, %cst_36 {dimension_numbers = #tpu.dot_dimension_numbers<[1], [0], [0], [1], [0, 0, 1, 1], [], []>} : vector<8x5xbf16>, vector<5x384xbf16>, vector<8x384xf32> -> vector<8x384xf32>
    %47 = arith.addf %41, %46 : vector<8x384xf32>
    %c0_37 = arith.constant 0 : index
    %c19_38 = arith.constant 19 : index
    %48 = vector.load %arg9[%c0_37, %c19_38] : memref<5x422xf32, #tpu.memory_space<vmem>>, vector<5x384xf32>
    %49 = arith.truncf %48 : vector<5x384xf32> to vector<5x384xbf16>
    %50 = vector.extract_strided_slice %8 {offsets = [4, 0, 0], sizes = [1, 8, 5], strides = [1, 1, 1]} : vector<9x8x5xbf16> to vector<1x8x5xbf16>
    %51 = vector.shape_cast %50 : vector<1x8x5xbf16> to vector<8x5xbf16>
    %cst_39 = arith.constant dense<0.000000e+00> : vector<8x384xf32>
    %52 = tpu.matmul %51, %49, %cst_39 {dimension_numbers = #tpu.dot_dimension_numbers<[1], [0], [0], [1], [0, 0, 1, 1], [], []>} : vector<8x5xbf16>, vector<5x384xbf16>, vector<8x384xf32> -> vector<8x384xf32>
    %53 = arith.addf %47, %52 : vector<8x384xf32>
    %c0_40 = arith.constant 0 : index
    %c20 = arith.constant 20 : index
    %54 = vector.load %arg9[%c0_40, %c20] : memref<5x422xf32, #tpu.memory_space<vmem>>, vector<5x384xf32>
    %55 = arith.truncf %54 : vector<5x384xf32> to vector<5x384xbf16>
    %56 = vector.extract_strided_slice %8 {offsets = [5, 0, 0], sizes = [1, 8, 5], strides = [1, 1, 1]} : vector<9x8x5xbf16> to vector<1x8x5xbf16>
    %57 = vector.shape_cast %56 : vector<1x8x5xbf16> to vector<8x5xbf16>
    %cst_41 = arith.constant dense<0.000000e+00> : vector<8x384xf32>
    %58 = tpu.matmul %57, %55, %cst_41 {dimension_numbers = #tpu.dot_dimension_numbers<[1], [0], [0], [1], [0, 0, 1, 1], [], []>} : vector<8x5xbf16>, vector<5x384xbf16>, vector<8x384xf32> -> vector<8x384xf32>
    %59 = arith.addf %53, %58 : vector<8x384xf32>
    %c0_42 = arith.constant 0 : index
    %c36 = arith.constant 36 : index
    %60 = vector.load %arg9[%c0_42, %c36] : memref<5x422xf32, #tpu.memory_space<vmem>>, vector<5x384xf32>
    %61 = arith.truncf %60 : vector<5x384xf32> to vector<5x384xbf16>
    %62 = vector.extract_strided_slice %8 {offsets = [6, 0, 0], sizes = [1, 8, 5], strides = [1, 1, 1]} : vector<9x8x5xbf16> to vector<1x8x5xbf16>
    %63 = vector.shape_cast %62 : vector<1x8x5xbf16> to vector<8x5xbf16>
    %cst_43 = arith.constant dense<0.000000e+00> : vector<8x384xf32>
    %64 = tpu.matmul %63, %61, %cst_43 {dimension_numbers = #tpu.dot_dimension_numbers<[1], [0], [0], [1], [0, 0, 1, 1], [], []>} : vector<8x5xbf16>, vector<5x384xbf16>, vector<8x384xf32> -> vector<8x384xf32>
    %65 = arith.addf %59, %64 : vector<8x384xf32>
    %c0_44 = arith.constant 0 : index
    %c37 = arith.constant 37 : index
    %66 = vector.load %arg9[%c0_44, %c37] : memref<5x422xf32, #tpu.memory_space<vmem>>, vector<5x384xf32>
    %67 = arith.truncf %66 : vector<5x384xf32> to vector<5x384xbf16>
    %68 = vector.extract_strided_slice %8 {offsets = [7, 0, 0], sizes = [1, 8, 5], strides = [1, 1, 1]} : vector<9x8x5xbf16> to vector<1x8x5xbf16>
    %69 = vector.shape_cast %68 : vector<1x8x5xbf16> to vector<8x5xbf16>
    %cst_45 = arith.constant dense<0.000000e+00> : vector<8x384xf32>
    %70 = tpu.matmul %69, %67, %cst_45 {dimension_numbers = #tpu.dot_dimension_numbers<[1], [0], [0], [1], [0, 0, 1, 1], [], []>} : vector<8x5xbf16>, vector<5x384xbf16>, vector<8x384xf32> -> vector<8x384xf32>
    %71 = arith.addf %65, %70 : vector<8x384xf32>
    %c0_46 = arith.constant 0 : index
    %c38 = arith.constant 38 : index
    %72 = vector.load %arg9[%c0_46, %c38] : memref<5x422xf32, #tpu.memory_space<vmem>>, vector<5x384xf32>
    %73 = arith.truncf %72 : vector<5x384xf32> to vector<5x384xbf16>
    %74 = vector.extract_strided_slice %8 {offsets = [8, 0, 0], sizes = [1, 8, 5], strides = [1, 1, 1]} : vector<9x8x5xbf16> to vector<1x8x5xbf16>
    %75 = vector.shape_cast %74 : vector<1x8x5xbf16> to vector<8x5xbf16>
    %cst_47 = arith.constant dense<0.000000e+00> : vector<8x384xf32>
    %76 = tpu.matmul %75, %73, %cst_47 {dimension_numbers = #tpu.dot_dimension_numbers<[1], [0], [0], [1], [0, 0, 1, 1], [], []>} : vector<8x5xbf16>, vector<5x384xbf16>, vector<8x384xf32> -> vector<8x384xf32>
    %77 = arith.addf %71, %76 : vector<8x384xf32>
    %78 = vector.broadcast %9 : vector<8x1xf32> to vector<8x384xf32>
    %79 = arith.addf %77, %78 : vector<8x384xf32>
    %cst_48 = arith.constant 0.000000e+00 : f32
    %80 = vector.broadcast %cst_48 : f32 to vector<8x384xf32>
    %81 = arith.maximumf %79, %80 : vector<8x384xf32>
    %82 = vector.broadcast %5 : vector<1x384xf32> to vector<8x384xf32>
    %83 = arith.mulf %81, %82 : vector<8x384xf32>
    %84 = arith.truncf %83 : vector<8x384xf32> to vector<8x384xbf16>
    %c0_49 = arith.constant 0 : index
    %c19_50 = arith.constant 19 : index
    %85 = vector.load %arg10[%c0_49, %c19_50] : memref<8x422xbf16, #tpu.memory_space<vmem>>, vector<8x384xbf16>
    tpu.vector_store %arg10[%c0_49, %c19_50], %84 {strides = array<i32>} : memref<8x422xbf16, #tpu.memory_space<vmem>>, vector<8x384xbf16>,
    %c0_51 = arith.constant 0 : index
    %c0_52 = arith.constant 0 : index
    %86 = vector.load %arg10[%c0_51, %c0_52] : memref<8x422xbf16, #tpu.memory_space<vmem>>, vector<8x384xbf16>
    %87 = vector.extract_strided_slice %10 {offsets = [0, 0, 0], sizes = [1, 3, 8], strides = [1, 1, 1]} : vector<9x3x8xbf16> to vector<1x3x8xbf16>
    %88 = vector.shape_cast %87 : vector<1x3x8xbf16> to vector<3x8xbf16>
    %cst_53 = arith.constant dense<0.000000e+00> : vector<3x384xf32>
    %89 = tpu.matmul %88, %86, %cst_53 {dimension_numbers = #tpu.dot_dimension_numbers<[1], [0], [0], [1], [0, 0, 1, 1], [], []>} : vector<3x8xbf16>, vector<8x384xbf16>, vector<3x384xf32> -> vector<3x384xf32>
    %c0_54 = arith.constant 0 : index
    %c1_55 = arith.constant 1 : index
    %90 = vector.load %arg10[%c0_54, %c1_55] : memref<8x422xbf16, #tpu.memory_space<vmem>>, vector<8x384xbf16>
    %91 = vector.extract_strided_slice %10 {offsets = [1, 0, 0], sizes = [1, 3, 8], strides = [1, 1, 1]} : vector<9x3x8xbf16> to vector<1x3x8xbf16>
    %92 = vector.shape_cast %91 : vector<1x3x8xbf16> to vector<3x8xbf16>
    %cst_56 = arith.constant dense<0.000000e+00> : vector<3x384xf32>
    %93 = tpu.matmul %92, %90, %cst_56 {dimension_numbers = #tpu.dot_dimension_numbers<[1], [0], [0], [1], [0, 0, 1, 1], [], []>} : vector<3x8xbf16>, vector<8x384xbf16>, vector<3x384xf32> -> vector<3x384xf32>
    %94 = arith.addf %89, %93 : vector<3x384xf32>
    %c0_57 = arith.constant 0 : index
    %c2_58 = arith.constant 2 : index
    %95 = vector.load %arg10[%c0_57, %c2_58] : memref<8x422xbf16, #tpu.memory_space<vmem>>, vector<8x384xbf16>
    %96 = vector.extract_strided_slice %10 {offsets = [2, 0, 0], sizes = [1, 3, 8], strides = [1, 1, 1]} : vector<9x3x8xbf16> to vector<1x3x8xbf16>
    %97 = vector.shape_cast %96 : vector<1x3x8xbf16> to vector<3x8xbf16>
    %cst_59 = arith.constant dense<0.000000e+00> : vector<3x384xf32>
    %98 = tpu.matmul %97, %95, %cst_59 {dimension_numbers = #tpu.dot_dimension_numbers<[1], [0], [0], [1], [0, 0, 1, 1], [], []>} : vector<3x8xbf16>, vector<8x384xbf16>, vector<3x384xf32> -> vector<3x384xf32>
    %99 = arith.addf %94, %98 : vector<3x384xf32>
    %c0_60 = arith.constant 0 : index
    %c18_61 = arith.constant 18 : index
    %100 = vector.load %arg10[%c0_60, %c18_61] : memref<8x422xbf16, #tpu.memory_space<vmem>>, vector<8x384xbf16>
    %101 = vector.extract_strided_slice %10 {offsets = [3, 0, 0], sizes = [1, 3, 8], strides = [1, 1, 1]} : vector<9x3x8xbf16> to vector<1x3x8xbf16>
    %102 = vector.shape_cast %101 : vector<1x3x8xbf16> to vector<3x8xbf16>
    %cst_62 = arith.constant dense<0.000000e+00> : vector<3x384xf32>
    %103 = tpu.matmul %102, %100, %cst_62 {dimension_numbers = #tpu.dot_dimension_numbers<[1], [0], [0], [1], [0, 0, 1, 1], [], []>} : vector<3x8xbf16>, vector<8x384xbf16>, vector<3x384xf32> -> vector<3x384xf32>
    %104 = arith.addf %99, %103 : vector<3x384xf32>
    %c0_63 = arith.constant 0 : index
    %c19_64 = arith.constant 19 : index
    %105 = vector.load %arg10[%c0_63, %c19_64] : memref<8x422xbf16, #tpu.memory_space<vmem>>, vector<8x384xbf16>
    %106 = vector.extract_strided_slice %10 {offsets = [4, 0, 0], sizes = [1, 3, 8], strides = [1, 1, 1]} : vector<9x3x8xbf16> to vector<1x3x8xbf16>
    %107 = vector.shape_cast %106 : vector<1x3x8xbf16> to vector<3x8xbf16>
    %cst_65 = arith.constant dense<0.000000e+00> : vector<3x384xf32>
    %108 = tpu.matmul %107, %105, %cst_65 {dimension_numbers = #tpu.dot_dimension_numbers<[1], [0], [0], [1], [0, 0, 1, 1], [], []>} : vector<3x8xbf16>, vector<8x384xbf16>, vector<3x384xf32> -> vector<3x384xf32>
    %109 = arith.addf %104, %108 : vector<3x384xf32>
    %c0_66 = arith.constant 0 : index
    %c20_67 = arith.constant 20 : index
    %110 = vector.load %arg10[%c0_66, %c20_67] : memref<8x422xbf16, #tpu.memory_space<vmem>>, vector<8x384xbf16>
    %111 = vector.extract_strided_slice %10 {offsets = [5, 0, 0], sizes = [1, 3, 8], strides = [1, 1, 1]} : vector<9x3x8xbf16> to vector<1x3x8xbf16>
    %112 = vector.shape_cast %111 : vector<1x3x8xbf16> to vector<3x8xbf16>
    %cst_68 = arith.constant dense<0.000000e+00> : vector<3x384xf32>
    %113 = tpu.matmul %112, %110, %cst_68 {dimension_numbers = #tpu.dot_dimension_numbers<[1], [0], [0], [1], [0, 0, 1, 1], [], []>} : vector<3x8xbf16>, vector<8x384xbf16>, vector<3x384xf32> -> vector<3x384xf32>
    %114 = arith.addf %109, %113 : vector<3x384xf32>
    %c0_69 = arith.constant 0 : index
    %c36_70 = arith.constant 36 : index
    %115 = vector.load %arg10[%c0_69, %c36_70] : memref<8x422xbf16, #tpu.memory_space<vmem>>, vector<8x384xbf16>
    %116 = vector.extract_strided_slice %10 {offsets = [6, 0, 0], sizes = [1, 3, 8], strides = [1, 1, 1]} : vector<9x3x8xbf16> to vector<1x3x8xbf16>
    %117 = vector.shape_cast %116 : vector<1x3x8xbf16> to vector<3x8xbf16>
    %cst_71 = arith.constant dense<0.000000e+00> : vector<3x384xf32>
    %118 = tpu.matmul %117, %115, %cst_71 {dimension_numbers = #tpu.dot_dimension_numbers<[1], [0], [0], [1], [0, 0, 1, 1], [], []>} : vector<3x8xbf16>, vector<8x384xbf16>, vector<3x384xf32> -> vector<3x384xf32>
    %119 = arith.addf %114, %118 : vector<3x384xf32>
    %c0_72 = arith.constant 0 : index
    %c37_73 = arith.constant 37 : index
    %120 = vector.load %arg10[%c0_72, %c37_73] : memref<8x422xbf16, #tpu.memory_space<vmem>>, vector<8x384xbf16>
    %121 = vector.extract_strided_slice %10 {offsets = [7, 0, 0], sizes = [1, 3, 8], strides = [1, 1, 1]} : vector<9x3x8xbf16> to vector<1x3x8xbf16>
    %122 = vector.shape_cast %121 : vector<1x3x8xbf16> to vector<3x8xbf16>
    %cst_74 = arith.constant dense<0.000000e+00> : vector<3x384xf32>
    %123 = tpu.matmul %122, %120, %cst_74 {dimension_numbers = #tpu.dot_dimension_numbers<[1], [0], [0], [1], [0, 0, 1, 1], [], []>} : vector<3x8xbf16>, vector<8x384xbf16>, vector<3x384xf32> -> vector<3x384xf32>
    %124 = arith.addf %119, %123 : vector<3x384xf32>
    %c0_75 = arith.constant 0 : index
    %c38_76 = arith.constant 38 : index
    %125 = vector.load %arg10[%c0_75, %c38_76] : memref<8x422xbf16, #tpu.memory_space<vmem>>, vector<8x384xbf16>
    %126 = vector.extract_strided_slice %10 {offsets = [8, 0, 0], sizes = [1, 3, 8], strides = [1, 1, 1]} : vector<9x3x8xbf16> to vector<1x3x8xbf16>
    %127 = vector.shape_cast %126 : vector<1x3x8xbf16> to vector<3x8xbf16>
    %cst_77 = arith.constant dense<0.000000e+00> : vector<3x384xf32>
    %128 = tpu.matmul %127, %125, %cst_77 {dimension_numbers = #tpu.dot_dimension_numbers<[1], [0], [0], [1], [0, 0, 1, 1], [], []>} : vector<3x8xbf16>, vector<8x384xbf16>, vector<3x384xf32> -> vector<3x384xf32>
    %129 = arith.addf %124, %128 : vector<3x384xf32>
    %130 = vector.broadcast %11 : vector<3x1xf32> to vector<3x384xf32>
    %131 = arith.addf %129, %130 : vector<3x384xf32>
    %132 = math.tanh %131 : vector<3x384xf32>
    %133 = arith.truncf %132 : vector<3x384xf32> to vector<3x384xbf16>
    %c0_78 = arith.constant 0 : index
    %c0_79 = arith.constant 0 : index
    %c0_80 = arith.constant 0 : index
    %c0_81 = arith.constant 0 : index
    %134 = vector.load %arg8[%c0_78, %c0_79, %c0_80, %c0_81] : memref<1x3x3x384xbf16, #tpu.memory_space<vmem>>, vector<1x1x3x384xbf16>
    %135 = vector.shape_cast %134 : vector<1x1x3x384xbf16> to vector<3x384xbf16>
    %136 = vector.shape_cast %133 : vector<3x384xbf16> to vector<1x1x3x384xbf16>
    tpu.vector_store %arg8[%c0_78, %c0_79, %c0_80, %c0_81], %136 {strides = array<i32>} : memref<1x3x3x384xbf16, #tpu.memory_space<vmem>>, vector<1x1x3x384xbf16>,
    %137 = vector.broadcast %4 : vector<1x384xf32> to vector<3x384xf32>
    %138 = arith.mulf %23, %137 : vector<3x384xf32>
    %139 = vector.broadcast %7 : vector<1x384xf32> to vector<3x384xf32>
    %140 = arith.mulf %132, %139 : vector<3x384xf32>
    %141 = arith.addf %138, %140 : vector<3x384xf32>
    %142 = vector.broadcast %5 : vector<1x384xf32> to vector<3x384xf32>
    %143 = arith.mulf %141, %142 : vector<3x384xf32>
    %c0_82 = arith.constant 0 : index
    %c19_83 = arith.constant 19 : index
    %144 = vector.load %arg9[%c0_82, %c19_83] : memref<5x422xf32, #tpu.memory_space<vmem>>, vector<3x384xf32>
    tpu.vector_store %arg9[%c0_82, %c19_83], %143 {strides = array<i32>} : memref<5x422xf32, #tpu.memory_space<vmem>>, vector<3x384xf32>,
    %c0_84 = arith.constant 0 : index
    %c0_85 = arith.constant 0 : index
    %145 = vector.load %arg9[%c0_84, %c0_85] : memref<5x422xf32, #tpu.memory_space<vmem>>, vector<5x384xf32>
    %146 = arith.truncf %145 : vector<5x384xf32> to vector<5x384xbf16>
    %147 = vector.extract_strided_slice %8 {offsets = [0, 0, 0], sizes = [1, 8, 5], strides = [1, 1, 1]} : vector<9x8x5xbf16> to vector<1x8x5xbf16>
    %148 = vector.shape_cast %147 : vector<1x8x5xbf16> to vector<8x5xbf16>
    %cst_86 = arith.constant dense<0.000000e+00> : vector<8x384xf32>
    %149 = tpu.matmul %148, %146, %cst_86 {dimension_numbers = #tpu.dot_dimension_numbers<[1], [0], [0], [1], [0, 0, 1, 1], [], []>} : vector<8x5xbf16>, vector<5x384xbf16>, vector<8x384xf32> -> vector<8x384xf32>
    %c0_87 = arith.constant 0 : index
    %c1_88 = arith.constant 1 : index
    %150 = vector.load %arg9[%c0_87, %c1_88] : memref<5x422xf32, #tpu.memory_space<vmem>>, vector<5x384xf32>
    %151 = arith.truncf %150 : vector<5x384xf32> to vector<5x384xbf16>
    %152 = vector.extract_strided_slice %8 {offsets = [1, 0, 0], sizes = [1, 8, 5], strides = [1, 1, 1]} : vector<9x8x5xbf16> to vector<1x8x5xbf16>
    %153 = vector.shape_cast %152 : vector<1x8x5xbf16> to vector<8x5xbf16>
    %cst_89 = arith.constant dense<0.000000e+00> : vector<8x384xf32>
    %154 = tpu.matmul %153, %151, %cst_89 {dimension_numbers = #tpu.dot_dimension_numbers<[1], [0], [0], [1], [0, 0, 1, 1], [], []>} : vector<8x5xbf16>, vector<5x384xbf16>, vector<8x384xf32> -> vector<8x384xf32>
    %155 = arith.addf %149, %154 : vector<8x384xf32>
    %c0_90 = arith.constant 0 : index
    %c2_91 = arith.constant 2 : index
    %156 = vector.load %arg9[%c0_90, %c2_91] : memref<5x422xf32, #tpu.memory_space<vmem>>, vector<5x384xf32>
    %157 = arith.truncf %156 : vector<5x384xf32> to vector<5x384xbf16>
    %158 = vector.extract_strided_slice %8 {offsets = [2, 0, 0], sizes = [1, 8, 5], strides = [1, 1, 1]} : vector<9x8x5xbf16> to vector<1x8x5xbf16>
    %159 = vector.shape_cast %158 : vector<1x8x5xbf16> to vector<8x5xbf16>
    %cst_92 = arith.constant dense<0.000000e+00> : vector<8x384xf32>
    %160 = tpu.matmul %159, %157, %cst_92 {dimension_numbers = #tpu.dot_dimension_numbers<[1], [0], [0], [1], [0, 0, 1, 1], [], []>} : vector<8x5xbf16>, vector<5x384xbf16>, vector<8x384xf32> -> vector<8x384xf32>
    %161 = arith.addf %155, %160 : vector<8x384xf32>
    %c0_93 = arith.constant 0 : index
    %c18_94 = arith.constant 18 : index
    %162 = vector.load %arg9[%c0_93, %c18_94] : memref<5x422xf32, #tpu.memory_space<vmem>>, vector<5x384xf32>
    %163 = arith.truncf %162 : vector<5x384xf32> to vector<5x384xbf16>
    %164 = vector.extract_strided_slice %8 {offsets = [3, 0, 0], sizes = [1, 8, 5], strides = [1, 1, 1]} : vector<9x8x5xbf16> to vector<1x8x5xbf16>
    %165 = vector.shape_cast %164 : vector<1x8x5xbf16> to vector<8x5xbf16>
    %cst_95 = arith.constant dense<0.000000e+00> : vector<8x384xf32>
    %166 = tpu.matmul %165, %163, %cst_95 {dimension_numbers = #tpu.dot_dimension_numbers<[1], [0], [0], [1], [0, 0, 1, 1], [], []>} : vector<8x5xbf16>, vector<5x384xbf16>, vector<8x384xf32> -> vector<8x384xf32>
    %167 = arith.addf %161, %166 : vector<8x384xf32>
    %c0_96 = arith.constant 0 : index
    %c19_97 = arith.constant 19 : index
    %168 = vector.load %arg9[%c0_96, %c19_97] : memref<5x422xf32, #tpu.memory_space<vmem>>, vector<5x384xf32>
    %169 = arith.truncf %168 : vector<5x384xf32> to vector<5x384xbf16>
    %170 = vector.extract_strided_slice %8 {offsets = [4, 0, 0], sizes = [1, 8, 5], strides = [1, 1, 1]} : vector<9x8x5xbf16> to vector<1x8x5xbf16>
    %171 = vector.shape_cast %170 : vector<1x8x5xbf16> to vector<8x5xbf16>
    %cst_98 = arith.constant dense<0.000000e+00> : vector<8x384xf32>
    %172 = tpu.matmul %171, %169, %cst_98 {dimension_numbers = #tpu.dot_dimension_numbers<[1], [0], [0], [1], [0, 0, 1, 1], [], []>} : vector<8x5xbf16>, vector<5x384xbf16>, vector<8x384xf32> -> vector<8x384xf32>
    %173 = arith.addf %167, %172 : vector<8x384xf32>
    %c0_99 = arith.constant 0 : index
    %c20_100 = arith.constant 20 : index
    %174 = vector.load %arg9[%c0_99, %c20_100] : memref<5x422xf32, #tpu.memory_space<vmem>>, vector<5x384xf32>
    %175 = arith.truncf %174 : vector<5x384xf32> to vector<5x384xbf16>
    %176 = vector.extract_strided_slice %8 {offsets = [5, 0, 0], sizes = [1, 8, 5], strides = [1, 1, 1]} : vector<9x8x5xbf16> to vector<1x8x5xbf16>
    %177 = vector.shape_cast %176 : vector<1x8x5xbf16> to vector<8x5xbf16>
    %cst_101 = arith.constant dense<0.000000e+00> : vector<8x384xf32>
    %178 = tpu.matmul %177, %175, %cst_101 {dimension_numbers = #tpu.dot_dimension_numbers<[1], [0], [0], [1], [0, 0, 1, 1], [], []>} : vector<8x5xbf16>, vector<5x384xbf16>, vector<8x384xf32> -> vector<8x384xf32>
    %179 = arith.addf %173, %178 : vector<8x384xf32>
    %c0_102 = arith.constant 0 : index
    %c36_103 = arith.constant 36 : index
    %180 = vector.load %arg9[%c0_102, %c36_103] : memref<5x422xf32, #tpu.memory_space<vmem>>, vector<5x384xf32>
    %181 = arith.truncf %180 : vector<5x384xf32> to vector<5x384xbf16>
    %182 = vector.extract_strided_slice %8 {offsets = [6, 0, 0], sizes = [1, 8, 5], strides = [1, 1, 1]} : vector<9x8x5xbf16> to vector<1x8x5xbf16>
    %183 = vector.shape_cast %182 : vector<1x8x5xbf16> to vector<8x5xbf16>
    %cst_104 = arith.constant dense<0.000000e+00> : vector<8x384xf32>
    %184 = tpu.matmul %183, %181, %cst_104 {dimension_numbers = #tpu.dot_dimension_numbers<[1], [0], [0], [1], [0, 0, 1, 1], [], []>} : vector<8x5xbf16>, vector<5x384xbf16>, vector<8x384xf32> -> vector<8x384xf32>
    %185 = arith.addf %179, %184 : vector<8x384xf32>
    %c0_105 = arith.constant 0 : index
    %c37_106 = arith.constant 37 : index
    %186 = vector.load %arg9[%c0_105, %c37_106] : memref<5x422xf32, #tpu.memory_space<vmem>>, vector<5x384xf32>
    %187 = arith.truncf %186 : vector<5x384xf32> to vector<5x384xbf16>
    %188 = vector.extract_strided_slice %8 {offsets = [7, 0, 0], sizes = [1, 8, 5], strides = [1, 1, 1]} : vector<9x8x5xbf16> to vector<1x8x5xbf16>
    %189 = vector.shape_cast %188 : vector<1x8x5xbf16> to vector<8x5xbf16>
    %cst_107 = arith.constant dense<0.000000e+00> : vector<8x384xf32>
    %190 = tpu.matmul %189, %187, %cst_107 {dimension_numbers = #tpu.dot_dimension_numbers<[1], [0], [0], [1], [0, 0, 1, 1], [], []>} : vector<8x5xbf16>, vector<5x384xbf16>, vector<8x384xf32> -> vector<8x384xf32>
    %191 = arith.addf %185, %190 : vector<8x384xf32>
    %c0_108 = arith.constant 0 : index
    %c38_109 = arith.constant 38 : index
    %192 = vector.load %arg9[%c0_108, %c38_109] : memref<5x422xf32, #tpu.memory_space<vmem>>, vector<5x384xf32>
    %193 = arith.truncf %192 : vector<5x384xf32> to vector<5x384xbf16>
    %194 = vector.extract_strided_slice %8 {offsets = [8, 0, 0], sizes = [1, 8, 5], strides = [1, 1, 1]} : vector<9x8x5xbf16> to vector<1x8x5xbf16>
    %195 = vector.shape_cast %194 : vector<1x8x5xbf16> to vector<8x5xbf16>
    %cst_110 = arith.constant dense<0.000000e+00> : vector<8x384xf32>
    %196 = tpu.matmul %195, %193, %cst_110 {dimension_numbers = #tpu.dot_dimension_numbers<[1], [0], [0], [1], [0, 0, 1, 1], [], []>} : vector<8x5xbf16>, vector<5x384xbf16>, vector<8x384xf32> -> vector<8x384xf32>
    %197 = arith.addf %191, %196 : vector<8x384xf32>
    %198 = vector.broadcast %9 : vector<8x1xf32> to vector<8x384xf32>
    %199 = arith.addf %197, %198 : vector<8x384xf32>
    %cst_111 = arith.constant 0.000000e+00 : f32
    %200 = vector.broadcast %cst_111 : f32 to vector<8x384xf32>
    %201 = arith.maximumf %199, %200 : vector<8x384xf32>
    %202 = vector.broadcast %5 : vector<1x384xf32> to vector<8x384xf32>
    %203 = arith.mulf %201, %202 : vector<8x384xf32>
    %204 = arith.truncf %203 : vector<8x384xf32> to vector<8x384xbf16>
    %c0_112 = arith.constant 0 : index
    %c19_113 = arith.constant 19 : index
    %205 = vector.load %arg10[%c0_112, %c19_113] : memref<8x422xbf16, #tpu.memory_space<vmem>>, vector<8x384xbf16>
    tpu.vector_store %arg10[%c0_112, %c19_113], %204 {strides = array<i32>} : memref<8x422xbf16, #tpu.memory_space<vmem>>, vector<8x384xbf16>,
    %c0_114 = arith.constant 0 : index
    %c0_115 = arith.constant 0 : index
    %206 = vector.load %arg10[%c0_114, %c0_115] : memref<8x422xbf16, #tpu.memory_space<vmem>>, vector<8x384xbf16>
    %207 = vector.extract_strided_slice %10 {offsets = [0, 0, 0], sizes = [1, 3, 8], strides = [1, 1, 1]} : vector<9x3x8xbf16> to vector<1x3x8xbf16>
    %208 = vector.shape_cast %207 : vector<1x3x8xbf16> to vector<3x8xbf16>
    %cst_116 = arith.constant dense<0.000000e+00> : vector<3x384xf32>
    %209 = tpu.matmul %208, %206, %cst_116 {dimension_numbers = #tpu.dot_dimension_numbers<[1], [0], [0], [1], [0, 0, 1, 1], [], []>} : vector<3x8xbf16>, vector<8x384xbf16>, vector<3x384xf32> -> vector<3x384xf32>
    %c0_117 = arith.constant 0 : index
    %c1_118 = arith.constant 1 : index
    %210 = vector.load %arg10[%c0_117, %c1_118] : memref<8x422xbf16, #tpu.memory_space<vmem>>, vector<8x384xbf16>
    %211 = vector.extract_strided_slice %10 {offsets = [1, 0, 0], sizes = [1, 3, 8], strides = [1, 1, 1]} : vector<9x3x8xbf16> to vector<1x3x8xbf16>
    %212 = vector.shape_cast %211 : vector<1x3x8xbf16> to vector<3x8xbf16>
    %cst_119 = arith.constant dense<0.000000e+00> : vector<3x384xf32>
    %213 = tpu.matmul %212, %210, %cst_119 {dimension_numbers = #tpu.dot_dimension_numbers<[1], [0], [0], [1], [0, 0, 1, 1], [], []>} : vector<3x8xbf16>, vector<8x384xbf16>, vector<3x384xf32> -> vector<3x384xf32>
    %214 = arith.addf %209, %213 : vector<3x384xf32>
    %c0_120 = arith.constant 0 : index
    %c2_121 = arith.constant 2 : index
    %215 = vector.load %arg10[%c0_120, %c2_121] : memref<8x422xbf16, #tpu.memory_space<vmem>>, vector<8x384xbf16>
    %216 = vector.extract_strided_slice %10 {offsets = [2, 0, 0], sizes = [1, 3, 8], strides = [1, 1, 1]} : vector<9x3x8xbf16> to vector<1x3x8xbf16>
    %217 = vector.shape_cast %216 : vector<1x3x8xbf16> to vector<3x8xbf16>
    %cst_122 = arith.constant dense<0.000000e+00> : vector<3x384xf32>
    %218 = tpu.matmul %217, %215, %cst_122 {dimension_numbers = #tpu.dot_dimension_numbers<[1], [0], [0], [1], [0, 0, 1, 1], [], []>} : vector<3x8xbf16>, vector<8x384xbf16>, vector<3x384xf32> -> vector<3x384xf32>
    %219 = arith.addf %214, %218 : vector<3x384xf32>
    %c0_123 = arith.constant 0 : index
    %c18_124 = arith.constant 18 : index
    %220 = vector.load %arg10[%c0_123, %c18_124] : memref<8x422xbf16, #tpu.memory_space<vmem>>, vector<8x384xbf16>
    %221 = vector.extract_strided_slice %10 {offsets = [3, 0, 0], sizes = [1, 3, 8], strides = [1, 1, 1]} : vector<9x3x8xbf16> to vector<1x3x8xbf16>
    %222 = vector.shape_cast %221 : vector<1x3x8xbf16> to vector<3x8xbf16>
    %cst_125 = arith.constant dense<0.000000e+00> : vector<3x384xf32>
    %223 = tpu.matmul %222, %220, %cst_125 {dimension_numbers = #tpu.dot_dimension_numbers<[1], [0], [0], [1], [0, 0, 1, 1], [], []>} : vector<3x8xbf16>, vector<8x384xbf16>, vector<3x384xf32> -> vector<3x384xf32>
    %224 = arith.addf %219, %223 : vector<3x384xf32>
    %c0_126 = arith.constant 0 : index
    %c19_127 = arith.constant 19 : index
    %225 = vector.load %arg10[%c0_126, %c19_127] : memref<8x422xbf16, #tpu.memory_space<vmem>>, vector<8x384xbf16>
    %226 = vector.extract_strided_slice %10 {offsets = [4, 0, 0], sizes = [1, 3, 8], strides = [1, 1, 1]} : vector<9x3x8xbf16> to vector<1x3x8xbf16>
    %227 = vector.shape_cast %226 : vector<1x3x8xbf16> to vector<3x8xbf16>
    %cst_128 = arith.constant dense<0.000000e+00> : vector<3x384xf32>
    %228 = tpu.matmul %227, %225, %cst_128 {dimension_numbers = #tpu.dot_dimension_numbers<[1], [0], [0], [1], [0, 0, 1, 1], [], []>} : vector<3x8xbf16>, vector<8x384xbf16>, vector<3x384xf32> -> vector<3x384xf32>
    %229 = arith.addf %224, %228 : vector<3x384xf32>
    %c0_129 = arith.constant 0 : index
    %c20_130 = arith.constant 20 : index
    %230 = vector.load %arg10[%c0_129, %c20_130] : memref<8x422xbf16, #tpu.memory_space<vmem>>, vector<8x384xbf16>
    %231 = vector.extract_strided_slice %10 {offsets = [5, 0, 0], sizes = [1, 3, 8], strides = [1, 1, 1]} : vector<9x3x8xbf16> to vector<1x3x8xbf16>
    %232 = vector.shape_cast %231 : vector<1x3x8xbf16> to vector<3x8xbf16>
    %cst_131 = arith.constant dense<0.000000e+00> : vector<3x384xf32>
    %233 = tpu.matmul %232, %230, %cst_131 {dimension_numbers = #tpu.dot_dimension_numbers<[1], [0], [0], [1], [0, 0, 1, 1], [], []>} : vector<3x8xbf16>, vector<8x384xbf16>, vector<3x384xf32> -> vector<3x384xf32>
    %234 = arith.addf %229, %233 : vector<3x384xf32>
    %c0_132 = arith.constant 0 : index
    %c36_133 = arith.constant 36 : index
    %235 = vector.load %arg10[%c0_132, %c36_133] : memref<8x422xbf16, #tpu.memory_space<vmem>>, vector<8x384xbf16>
    %236 = vector.extract_strided_slice %10 {offsets = [6, 0, 0], sizes = [1, 3, 8], strides = [1, 1, 1]} : vector<9x3x8xbf16> to vector<1x3x8xbf16>
    %237 = vector.shape_cast %236 : vector<1x3x8xbf16> to vector<3x8xbf16>
    %cst_134 = arith.constant dense<0.000000e+00> : vector<3x384xf32>
    %238 = tpu.matmul %237, %235, %cst_134 {dimension_numbers = #tpu.dot_dimension_numbers<[1], [0], [0], [1], [0, 0, 1, 1], [], []>} : vector<3x8xbf16>, vector<8x384xbf16>, vector<3x384xf32> -> vector<3x384xf32>
    %239 = arith.addf %234, %238 : vector<3x384xf32>
    %c0_135 = arith.constant 0 : index
    %c37_136 = arith.constant 37 : index
    %240 = vector.load %arg10[%c0_135, %c37_136] : memref<8x422xbf16, #tpu.memory_space<vmem>>, vector<8x384xbf16>
    %241 = vector.extract_strided_slice %10 {offsets = [7, 0, 0], sizes = [1, 3, 8], strides = [1, 1, 1]} : vector<9x3x8xbf16> to vector<1x3x8xbf16>
    %242 = vector.shape_cast %241 : vector<1x3x8xbf16> to vector<3x8xbf16>
    %cst_137 = arith.constant dense<0.000000e+00> : vector<3x384xf32>
    %243 = tpu.matmul %242, %240, %cst_137 {dimension_numbers = #tpu.dot_dimension_numbers<[1], [0], [0], [1], [0, 0, 1, 1], [], []>} : vector<3x8xbf16>, vector<8x384xbf16>, vector<3x384xf32> -> vector<3x384xf32>
    %244 = arith.addf %239, %243 : vector<3x384xf32>
    %c0_138 = arith.constant 0 : index
    %c38_139 = arith.constant 38 : index
    %245 = vector.load %arg10[%c0_138, %c38_139] : memref<8x422xbf16, #tpu.memory_space<vmem>>, vector<8x384xbf16>
    %246 = vector.extract_strided_slice %10 {offsets = [8, 0, 0], sizes = [1, 3, 8], strides = [1, 1, 1]} : vector<9x3x8xbf16> to vector<1x3x8xbf16>
    %247 = vector.shape_cast %246 : vector<1x3x8xbf16> to vector<3x8xbf16>
    %cst_140 = arith.constant dense<0.000000e+00> : vector<3x384xf32>
    %248 = tpu.matmul %247, %245, %cst_140 {dimension_numbers = #tpu.dot_dimension_numbers<[1], [0], [0], [1], [0, 0, 1, 1], [], []>} : vector<3x8xbf16>, vector<8x384xbf16>, vector<3x384xf32> -> vector<3x384xf32>
    %249 = arith.addf %244, %248 : vector<3x384xf32>
    %250 = vector.broadcast %11 : vector<3x1xf32> to vector<3x384xf32>
    %251 = arith.addf %249, %250 : vector<3x384xf32>
    %252 = math.tanh %251 : vector<3x384xf32>
    %253 = arith.truncf %252 : vector<3x384xf32> to vector<3x384xbf16>
    %c0_141 = arith.constant 0 : index
    %c1_142 = arith.constant 1 : index
    %c0_143 = arith.constant 0 : index
    %c0_144 = arith.constant 0 : index
    %254 = vector.load %arg8[%c0_141, %c1_142, %c0_143, %c0_144] : memref<1x3x3x384xbf16, #tpu.memory_space<vmem>>, vector<1x1x3x384xbf16>
    %255 = vector.shape_cast %254 : vector<1x1x3x384xbf16> to vector<3x384xbf16>
    %256 = vector.shape_cast %253 : vector<3x384xbf16> to vector<1x1x3x384xbf16>
    tpu.vector_store %arg8[%c0_141, %c1_142, %c0_143, %c0_144], %256 {strides = array<i32>} : memref<1x3x3x384xbf16, #tpu.memory_space<vmem>>, vector<1x1x3x384xbf16>,
    %257 = vector.broadcast %4 : vector<1x384xf32> to vector<3x384xf32>
    %258 = arith.mulf %143, %257 : vector<3x384xf32>
    %259 = vector.broadcast %7 : vector<1x384xf32> to vector<3x384xf32>
    %260 = arith.mulf %252, %259 : vector<3x384xf32>
    %261 = arith.addf %258, %260 : vector<3x384xf32>
    %262 = vector.broadcast %5 : vector<1x384xf32> to vector<3x384xf32>
    %263 = arith.mulf %261, %262 : vector<3x384xf32>
    %c0_145 = arith.constant 0 : index
    %c19_146 = arith.constant 19 : index
    %264 = vector.load %arg9[%c0_145, %c19_146] : memref<5x422xf32, #tpu.memory_space<vmem>>, vector<3x384xf32>
    tpu.vector_store %arg9[%c0_145, %c19_146], %263 {strides = array<i32>} : memref<5x422xf32, #tpu.memory_space<vmem>>, vector<3x384xf32>,
    %c0_147 = arith.constant 0 : index
    %c0_148 = arith.constant 0 : index
    %265 = vector.load %arg9[%c0_147, %c0_148] : memref<5x422xf32, #tpu.memory_space<vmem>>, vector<5x384xf32>
    %266 = arith.truncf %265 : vector<5x384xf32> to vector<5x384xbf16>
    %267 = vector.extract_strided_slice %8 {offsets = [0, 0, 0], sizes = [1, 8, 5], strides = [1, 1, 1]} : vector<9x8x5xbf16> to vector<1x8x5xbf16>
    %268 = vector.shape_cast %267 : vector<1x8x5xbf16> to vector<8x5xbf16>
    %cst_149 = arith.constant dense<0.000000e+00> : vector<8x384xf32>
    %269 = tpu.matmul %268, %266, %cst_149 {dimension_numbers = #tpu.dot_dimension_numbers<[1], [0], [0], [1], [0, 0, 1, 1], [], []>} : vector<8x5xbf16>, vector<5x384xbf16>, vector<8x384xf32> -> vector<8x384xf32>
    %c0_150 = arith.constant 0 : index
    %c1_151 = arith.constant 1 : index
    %270 = vector.load %arg9[%c0_150, %c1_151] : memref<5x422xf32, #tpu.memory_space<vmem>>, vector<5x384xf32>
    %271 = arith.truncf %270 : vector<5x384xf32> to vector<5x384xbf16>
    %272 = vector.extract_strided_slice %8 {offsets = [1, 0, 0], sizes = [1, 8, 5], strides = [1, 1, 1]} : vector<9x8x5xbf16> to vector<1x8x5xbf16>
    %273 = vector.shape_cast %272 : vector<1x8x5xbf16> to vector<8x5xbf16>
    %cst_152 = arith.constant dense<0.000000e+00> : vector<8x384xf32>
    %274 = tpu.matmul %273, %271, %cst_152 {dimension_numbers = #tpu.dot_dimension_numbers<[1], [0], [0], [1], [0, 0, 1, 1], [], []>} : vector<8x5xbf16>, vector<5x384xbf16>, vector<8x384xf32> -> vector<8x384xf32>
    %275 = arith.addf %269, %274 : vector<8x384xf32>
    %c0_153 = arith.constant 0 : index
    %c2_154 = arith.constant 2 : index
    %276 = vector.load %arg9[%c0_153, %c2_154] : memref<5x422xf32, #tpu.memory_space<vmem>>, vector<5x384xf32>
    %277 = arith.truncf %276 : vector<5x384xf32> to vector<5x384xbf16>
    %278 = vector.extract_strided_slice %8 {offsets = [2, 0, 0], sizes = [1, 8, 5], strides = [1, 1, 1]} : vector<9x8x5xbf16> to vector<1x8x5xbf16>
    %279 = vector.shape_cast %278 : vector<1x8x5xbf16> to vector<8x5xbf16>
    %cst_155 = arith.constant dense<0.000000e+00> : vector<8x384xf32>
    %280 = tpu.matmul %279, %277, %cst_155 {dimension_numbers = #tpu.dot_dimension_numbers<[1], [0], [0], [1], [0, 0, 1, 1], [], []>} : vector<8x5xbf16>, vector<5x384xbf16>, vector<8x384xf32> -> vector<8x384xf32>
    %281 = arith.addf %275, %280 : vector<8x384xf32>
    %c0_156 = arith.constant 0 : index
    %c18_157 = arith.constant 18 : index
    %282 = vector.load %arg9[%c0_156, %c18_157] : memref<5x422xf32, #tpu.memory_space<vmem>>, vector<5x384xf32>
    %283 = arith.truncf %282 : vector<5x384xf32> to vector<5x384xbf16>
    %284 = vector.extract_strided_slice %8 {offsets = [3, 0, 0], sizes = [1, 8, 5], strides = [1, 1, 1]} : vector<9x8x5xbf16> to vector<1x8x5xbf16>
    %285 = vector.shape_cast %284 : vector<1x8x5xbf16> to vector<8x5xbf16>
    %cst_158 = arith.constant dense<0.000000e+00> : vector<8x384xf32>
    %286 = tpu.matmul %285, %283, %cst_158 {dimension_numbers = #tpu.dot_dimension_numbers<[1], [0], [0], [1], [0, 0, 1, 1], [], []>} : vector<8x5xbf16>, vector<5x384xbf16>, vector<8x384xf32> -> vector<8x384xf32>
    %287 = arith.addf %281, %286 : vector<8x384xf32>
    %c0_159 = arith.constant 0 : index
    %c19_160 = arith.constant 19 : index
    %288 = vector.load %arg9[%c0_159, %c19_160] : memref<5x422xf32, #tpu.memory_space<vmem>>, vector<5x384xf32>
    %289 = arith.truncf %288 : vector<5x384xf32> to vector<5x384xbf16>
    %290 = vector.extract_strided_slice %8 {offsets = [4, 0, 0], sizes = [1, 8, 5], strides = [1, 1, 1]} : vector<9x8x5xbf16> to vector<1x8x5xbf16>
    %291 = vector.shape_cast %290 : vector<1x8x5xbf16> to vector<8x5xbf16>
    %cst_161 = arith.constant dense<0.000000e+00> : vector<8x384xf32>
    %292 = tpu.matmul %291, %289, %cst_161 {dimension_numbers = #tpu.dot_dimension_numbers<[1], [0], [0], [1], [0, 0, 1, 1], [], []>} : vector<8x5xbf16>, vector<5x384xbf16>, vector<8x384xf32> -> vector<8x384xf32>
    %293 = arith.addf %287, %292 : vector<8x384xf32>
    %c0_162 = arith.constant 0 : index
    %c20_163 = arith.constant 20 : index
    %294 = vector.load %arg9[%c0_162, %c20_163] : memref<5x422xf32, #tpu.memory_space<vmem>>, vector<5x384xf32>
    %295 = arith.truncf %294 : vector<5x384xf32> to vector<5x384xbf16>
    %296 = vector.extract_strided_slice %8 {offsets = [5, 0, 0], sizes = [1, 8, 5], strides = [1, 1, 1]} : vector<9x8x5xbf16> to vector<1x8x5xbf16>
    %297 = vector.shape_cast %296 : vector<1x8x5xbf16> to vector<8x5xbf16>
    %cst_164 = arith.constant dense<0.000000e+00> : vector<8x384xf32>
    %298 = tpu.matmul %297, %295, %cst_164 {dimension_numbers = #tpu.dot_dimension_numbers<[1], [0], [0], [1], [0, 0, 1, 1], [], []>} : vector<8x5xbf16>, vector<5x384xbf16>, vector<8x384xf32> -> vector<8x384xf32>
    %299 = arith.addf %293, %298 : vector<8x384xf32>
    %c0_165 = arith.constant 0 : index
    %c36_166 = arith.constant 36 : index
    %300 = vector.load %arg9[%c0_165, %c36_166] : memref<5x422xf32, #tpu.memory_space<vmem>>, vector<5x384xf32>
    %301 = arith.truncf %300 : vector<5x384xf32> to vector<5x384xbf16>
    %302 = vector.extract_strided_slice %8 {offsets = [6, 0, 0], sizes = [1, 8, 5], strides = [1, 1, 1]} : vector<9x8x5xbf16> to vector<1x8x5xbf16>
    %303 = vector.shape_cast %302 : vector<1x8x5xbf16> to vector<8x5xbf16>
    %cst_167 = arith.constant dense<0.000000e+00> : vector<8x384xf32>
    %304 = tpu.matmul %303, %301, %cst_167 {dimension_numbers = #tpu.dot_dimension_numbers<[1], [0], [0], [1], [0, 0, 1, 1], [], []>} : vector<8x5xbf16>, vector<5x384xbf16>, vector<8x384xf32> -> vector<8x384xf32>
    %305 = arith.addf %299, %304 : vector<8x384xf32>
    %c0_168 = arith.constant 0 : index
    %c37_169 = arith.constant 37 : index
    %306 = vector.load %arg9[%c0_168, %c37_169] : memref<5x422xf32, #tpu.memory_space<vmem>>, vector<5x384xf32>
    %307 = arith.truncf %306 : vector<5x384xf32> to vector<5x384xbf16>
    %308 = vector.extract_strided_slice %8 {offsets = [7, 0, 0], sizes = [1, 8, 5], strides = [1, 1, 1]} : vector<9x8x5xbf16> to vector<1x8x5xbf16>
    %309 = vector.shape_cast %308 : vector<1x8x5xbf16> to vector<8x5xbf16>
    %cst_170 = arith.constant dense<0.000000e+00> : vector<8x384xf32>
    %310 = tpu.matmul %309, %307, %cst_170 {dimension_numbers = #tpu.dot_dimension_numbers<[1], [0], [0], [1], [0, 0, 1, 1], [], []>} : vector<8x5xbf16>, vector<5x384xbf16>, vector<8x384xf32> -> vector<8x384xf32>
    %311 = arith.addf %305, %310 : vector<8x384xf32>
    %c0_171 = arith.constant 0 : index
    %c38_172 = arith.constant 38 : index
    %312 = vector.load %arg9[%c0_171, %c38_172] : memref<5x422xf32, #tpu.memory_space<vmem>>, vector<5x384xf32>
    %313 = arith.truncf %312 : vector<5x384xf32> to vector<5x384xbf16>
    %314 = vector.extract_strided_slice %8 {offsets = [8, 0, 0], sizes = [1, 8, 5], strides = [1, 1, 1]} : vector<9x8x5xbf16> to vector<1x8x5xbf16>
    %315 = vector.shape_cast %314 : vector<1x8x5xbf16> to vector<8x5xbf16>
    %cst_173 = arith.constant dense<0.000000e+00> : vector<8x384xf32>
    %316 = tpu.matmul %315, %313, %cst_173 {dimension_numbers = #tpu.dot_dimension_numbers<[1], [0], [0], [1], [0, 0, 1, 1], [], []>} : vector<8x5xbf16>, vector<5x384xbf16>, vector<8x384xf32> -> vector<8x384xf32>
    %317 = arith.addf %311, %316 : vector<8x384xf32>
    %318 = vector.broadcast %9 : vector<8x1xf32> to vector<8x384xf32>
    %319 = arith.addf %317, %318 : vector<8x384xf32>
    %cst_174 = arith.constant 0.000000e+00 : f32
    %320 = vector.broadcast %cst_174 : f32 to vector<8x384xf32>
    %321 = arith.maximumf %319, %320 : vector<8x384xf32>
    %322 = vector.broadcast %5 : vector<1x384xf32> to vector<8x384xf32>
    %323 = arith.mulf %321, %322 : vector<8x384xf32>
    %324 = arith.truncf %323 : vector<8x384xf32> to vector<8x384xbf16>
    %c0_175 = arith.constant 0 : index
    %c19_176 = arith.constant 19 : index
    %325 = vector.load %arg10[%c0_175, %c19_176] : memref<8x422xbf16, #tpu.memory_space<vmem>>, vector<8x384xbf16>
    tpu.vector_store %arg10[%c0_175, %c19_176], %324 {strides = array<i32>} : memref<8x422xbf16, #tpu.memory_space<vmem>>, vector<8x384xbf16>,
    %c0_177 = arith.constant 0 : index
    %c0_178 = arith.constant 0 : index
    %326 = vector.load %arg10[%c0_177, %c0_178] : memref<8x422xbf16, #tpu.memory_space<vmem>>, vector<8x384xbf16>
    %327 = vector.extract_strided_slice %10 {offsets = [0, 0, 0], sizes = [1, 3, 8], strides = [1, 1, 1]} : vector<9x3x8xbf16> to vector<1x3x8xbf16>
    %328 = vector.shape_cast %327 : vector<1x3x8xbf16> to vector<3x8xbf16>
    %cst_179 = arith.constant dense<0.000000e+00> : vector<3x384xf32>
    %329 = tpu.matmul %328, %326, %cst_179 {dimension_numbers = #tpu.dot_dimension_numbers<[1], [0], [0], [1], [0, 0, 1, 1], [], []>} : vector<3x8xbf16>, vector<8x384xbf16>, vector<3x384xf32> -> vector<3x384xf32>
    %c0_180 = arith.constant 0 : index
    %c1_181 = arith.constant 1 : index
    %330 = vector.load %arg10[%c0_180, %c1_181] : memref<8x422xbf16, #tpu.memory_space<vmem>>, vector<8x384xbf16>
    %331 = vector.extract_strided_slice %10 {offsets = [1, 0, 0], sizes = [1, 3, 8], strides = [1, 1, 1]} : vector<9x3x8xbf16> to vector<1x3x8xbf16>
    %332 = vector.shape_cast %331 : vector<1x3x8xbf16> to vector<3x8xbf16>
    %cst_182 = arith.constant dense<0.000000e+00> : vector<3x384xf32>
    %333 = tpu.matmul %332, %330, %cst_182 {dimension_numbers = #tpu.dot_dimension_numbers<[1], [0], [0], [1], [0, 0, 1, 1], [], []>} : vector<3x8xbf16>, vector<8x384xbf16>, vector<3x384xf32> -> vector<3x384xf32>
    %334 = arith.addf %329, %333 : vector<3x384xf32>
    %c0_183 = arith.constant 0 : index
    %c2_184 = arith.constant 2 : index
    %335 = vector.load %arg10[%c0_183, %c2_184] : memref<8x422xbf16, #tpu.memory_space<vmem>>, vector<8x384xbf16>
    %336 = vector.extract_strided_slice %10 {offsets = [2, 0, 0], sizes = [1, 3, 8], strides = [1, 1, 1]} : vector<9x3x8xbf16> to vector<1x3x8xbf16>
    %337 = vector.shape_cast %336 : vector<1x3x8xbf16> to vector<3x8xbf16>
    %cst_185 = arith.constant dense<0.000000e+00> : vector<3x384xf32>
    %338 = tpu.matmul %337, %335, %cst_185 {dimension_numbers = #tpu.dot_dimension_numbers<[1], [0], [0], [1], [0, 0, 1, 1], [], []>} : vector<3x8xbf16>, vector<8x384xbf16>, vector<3x384xf32> -> vector<3x384xf32>
    %339 = arith.addf %334, %338 : vector<3x384xf32>
    %c0_186 = arith.constant 0 : index
    %c18_187 = arith.constant 18 : index
    %340 = vector.load %arg10[%c0_186, %c18_187] : memref<8x422xbf16, #tpu.memory_space<vmem>>, vector<8x384xbf16>
    %341 = vector.extract_strided_slice %10 {offsets = [3, 0, 0], sizes = [1, 3, 8], strides = [1, 1, 1]} : vector<9x3x8xbf16> to vector<1x3x8xbf16>
    %342 = vector.shape_cast %341 : vector<1x3x8xbf16> to vector<3x8xbf16>
    %cst_188 = arith.constant dense<0.000000e+00> : vector<3x384xf32>
    %343 = tpu.matmul %342, %340, %cst_188 {dimension_numbers = #tpu.dot_dimension_numbers<[1], [0], [0], [1], [0, 0, 1, 1], [], []>} : vector<3x8xbf16>, vector<8x384xbf16>, vector<3x384xf32> -> vector<3x384xf32>
    %344 = arith.addf %339, %343 : vector<3x384xf32>
    %c0_189 = arith.constant 0 : index
    %c19_190 = arith.constant 19 : index
    %345 = vector.load %arg10[%c0_189, %c19_190] : memref<8x422xbf16, #tpu.memory_space<vmem>>, vector<8x384xbf16>
    %346 = vector.extract_strided_slice %10 {offsets = [4, 0, 0], sizes = [1, 3, 8], strides = [1, 1, 1]} : vector<9x3x8xbf16> to vector<1x3x8xbf16>
    %347 = vector.shape_cast %346 : vector<1x3x8xbf16> to vector<3x8xbf16>
    %cst_191 = arith.constant dense<0.000000e+00> : vector<3x384xf32>
    %348 = tpu.matmul %347, %345, %cst_191 {dimension_numbers = #tpu.dot_dimension_numbers<[1], [0], [0], [1], [0, 0, 1, 1], [], []>} : vector<3x8xbf16>, vector<8x384xbf16>, vector<3x384xf32> -> vector<3x384xf32>
    %349 = arith.addf %344, %348 : vector<3x384xf32>
    %c0_192 = arith.constant 0 : index
    %c20_193 = arith.constant 20 : index
    %350 = vector.load %arg10[%c0_192, %c20_193] : memref<8x422xbf16, #tpu.memory_space<vmem>>, vector<8x384xbf16>
    %351 = vector.extract_strided_slice %10 {offsets = [5, 0, 0], sizes = [1, 3, 8], strides = [1, 1, 1]} : vector<9x3x8xbf16> to vector<1x3x8xbf16>
    %352 = vector.shape_cast %351 : vector<1x3x8xbf16> to vector<3x8xbf16>
    %cst_194 = arith.constant dense<0.000000e+00> : vector<3x384xf32>
    %353 = tpu.matmul %352, %350, %cst_194 {dimension_numbers = #tpu.dot_dimension_numbers<[1], [0], [0], [1], [0, 0, 1, 1], [], []>} : vector<3x8xbf16>, vector<8x384xbf16>, vector<3x384xf32> -> vector<3x384xf32>
    %354 = arith.addf %349, %353 : vector<3x384xf32>
    %c0_195 = arith.constant 0 : index
    %c36_196 = arith.constant 36 : index
    %355 = vector.load %arg10[%c0_195, %c36_196] : memref<8x422xbf16, #tpu.memory_space<vmem>>, vector<8x384xbf16>
    %356 = vector.extract_strided_slice %10 {offsets = [6, 0, 0], sizes = [1, 3, 8], strides = [1, 1, 1]} : vector<9x3x8xbf16> to vector<1x3x8xbf16>
    %357 = vector.shape_cast %356 : vector<1x3x8xbf16> to vector<3x8xbf16>
    %cst_197 = arith.constant dense<0.000000e+00> : vector<3x384xf32>
    %358 = tpu.matmul %357, %355, %cst_197 {dimension_numbers = #tpu.dot_dimension_numbers<[1], [0], [0], [1], [0, 0, 1, 1], [], []>} : vector<3x8xbf16>, vector<8x384xbf16>, vector<3x384xf32> -> vector<3x384xf32>
    %359 = arith.addf %354, %358 : vector<3x384xf32>
    %c0_198 = arith.constant 0 : index
    %c37_199 = arith.constant 37 : index
    %360 = vector.load %arg10[%c0_198, %c37_199] : memref<8x422xbf16, #tpu.memory_space<vmem>>, vector<8x384xbf16>
    %361 = vector.extract_strided_slice %10 {offsets = [7, 0, 0], sizes = [1, 3, 8], strides = [1, 1, 1]} : vector<9x3x8xbf16> to vector<1x3x8xbf16>
    %362 = vector.shape_cast %361 : vector<1x3x8xbf16> to vector<3x8xbf16>
    %cst_200 = arith.constant dense<0.000000e+00> : vector<3x384xf32>
    %363 = tpu.matmul %362, %360, %cst_200 {dimension_numbers = #tpu.dot_dimension_numbers<[1], [0], [0], [1], [0, 0, 1, 1], [], []>} : vector<3x8xbf16>, vector<8x384xbf16>, vector<3x384xf32> -> vector<3x384xf32>
    %364 = arith.addf %359, %363 : vector<3x384xf32>
    %c0_201 = arith.constant 0 : index
    %c38_202 = arith.constant 38 : index
    %365 = vector.load %arg10[%c0_201, %c38_202] : memref<8x422xbf16, #tpu.memory_space<vmem>>, vector<8x384xbf16>
    %366 = vector.extract_strided_slice %10 {offsets = [8, 0, 0], sizes = [1, 3, 8], strides = [1, 1, 1]} : vector<9x3x8xbf16> to vector<1x3x8xbf16>
    %367 = vector.shape_cast %366 : vector<1x3x8xbf16> to vector<3x8xbf16>
    %cst_203 = arith.constant dense<0.000000e+00> : vector<3x384xf32>
    %368 = tpu.matmul %367, %365, %cst_203 {dimension_numbers = #tpu.dot_dimension_numbers<[1], [0], [0], [1], [0, 0, 1, 1], [], []>} : vector<3x8xbf16>, vector<8x384xbf16>, vector<3x384xf32> -> vector<3x384xf32>
    %369 = arith.addf %364, %368 : vector<3x384xf32>
    %370 = vector.broadcast %11 : vector<3x1xf32> to vector<3x384xf32>
    %371 = arith.addf %369, %370 : vector<3x384xf32>
    %372 = math.tanh %371 : vector<3x384xf32>
    %373 = arith.truncf %372 : vector<3x384xf32> to vector<3x384xbf16>
    %c0_204 = arith.constant 0 : index
    %c2_205 = arith.constant 2 : index
    %c0_206 = arith.constant 0 : index
    %c0_207 = arith.constant 0 : index
    %374 = vector.load %arg8[%c0_204, %c2_205, %c0_206, %c0_207] : memref<1x3x3x384xbf16, #tpu.memory_space<vmem>>, vector<1x1x3x384xbf16>
    %375 = vector.shape_cast %374 : vector<1x1x3x384xbf16> to vector<3x384xbf16>
    %376 = vector.shape_cast %373 : vector<3x384xbf16> to vector<1x1x3x384xbf16>
    tpu.vector_store %arg8[%c0_204, %c2_205, %c0_206, %c0_207], %376 {strides = array<i32>} : memref<1x3x3x384xbf16, #tpu.memory_space<vmem>>, vector<1x1x3x384xbf16>,
    %377 = vector.broadcast %4 : vector<1x384xf32> to vector<3x384xf32>
    %378 = arith.mulf %263, %377 : vector<3x384xf32>
    %379 = vector.broadcast %7 : vector<1x384xf32> to vector<3x384xf32>
    %380 = arith.mulf %372, %379 : vector<3x384xf32>
    %381 = arith.addf %378, %380 : vector<3x384xf32>
    %382 = vector.broadcast %5 : vector<1x384xf32> to vector<3x384xf32>
    %383 = arith.mulf %381, %382 : vector<3x384xf32>
    %c0_208 = arith.constant 0 : index
    %c0_209 = arith.constant 0 : index
    %c0_210 = arith.constant 0 : index
    %384 = vector.load %arg7[%c0_208, %c0_209, %c0_210] : memref<1x3x384xf32, #tpu.memory_space<vmem>>, vector<1x3x384xf32>
    %385 = vector.shape_cast %384 : vector<1x3x384xf32> to vector<3x384xf32>
    %386 = vector.shape_cast %383 : vector<3x384xf32> to vector<1x3x384xf32>
    tpu.vector_store %arg7[%c0_208, %c0_209, %c0_210], %386 {strides = array<i32>} : memref<1x3x384xf32, #tpu.memory_space<vmem>>, vector<1x3x384xf32>,
    return
  }
  func.func @transform_0(%arg0: i32) -> (i32, i32, i32) {
    %c0_i32 = arith.constant 0 : i32
    %c0_i32_0 = arith.constant 0 : i32
    %c0_i32_1 = arith.constant 0 : i32
    return %arg0, %c0_i32, %c0_i32_0 : i32, i32, i32
  }
  func.func @transform_1(%arg0: i32) -> (i32, i32, i32) {
    %c0_i32 = arith.constant 0 : i32
    %c0_i32_0 = arith.constant 0 : i32
    %c0_i32_1 = arith.constant 0 : i32
    return %arg0, %c0_i32, %c0_i32_0 : i32, i32, i32
  }
  func.func @transform_2(%arg0: i32) -> (i32, i32, i32) {
    %c0_i32 = arith.constant 0 : i32
    %c0_i32_0 = arith.constant 0 : i32
    %c0_i32_1 = arith.constant 0 : i32
    %c0_i32_2 = arith.constant 0 : i32
    return %c0_i32, %c0_i32_0, %c0_i32_1 : i32, i32, i32
  }
  func.func @transform_3(%arg0: i32) -> (i32, i32) {
    %c0_i32 = arith.constant 0 : i32
    %c0_i32_0 = arith.constant 0 : i32
    %c0_i32_1 = arith.constant 0 : i32
    return %c0_i32, %c0_i32_0 : i32, i32
  }
  func.func @transform_4(%arg0: i32) -> (i32, i32, i32) {
    %c0_i32 = arith.constant 0 : i32
    %c0_i32_0 = arith.constant 0 : i32
    %c0_i32_1 = arith.constant 0 : i32
    %c0_i32_2 = arith.constant 0 : i32
    return %c0_i32, %c0_i32_0, %c0_i32_1 : i32, i32, i32
  }
  func.func @transform_5(%arg0: i32) -> (i32, i32) {
    %c0_i32 = arith.constant 0 : i32
    %c0_i32_0 = arith.constant 0 : i32
    %c0_i32_1 = arith.constant 0 : i32
    return %c0_i32, %c0_i32_0 : i32, i32
  }
  func.func @transform_6(%arg0: i32) -> (i32, i32, i32) {
    %c0_i32 = arith.constant 0 : i32
    %c0_i32_0 = arith.constant 0 : i32
    %c0_i32_1 = arith.constant 0 : i32
    return %arg0, %c0_i32, %c0_i32_0 : i32, i32, i32
  }
  func.func @transform_7(%arg0: i32) -> (i32, i32, i32, i32) {
    %c0_i32 = arith.constant 0 : i32
    %c0_i32_0 = arith.constant 0 : i32
    %c0_i32_1 = arith.constant 0 : i32
    %c0_i32_2 = arith.constant 0 : i32
    return %arg0, %c0_i32, %c0_i32_0, %c0_i32_1 : i32, i32, i32, i32
  }
}

</mosaic_0001>

<bundles_post_ra>
// kernel: inpainting_generator.1
= control target key start
LH: loop header
LB: loop body
LE: loop exit
PB: predicated region body
PF: predicated region fallthrough
CT: control target
= control target key end

     0   :  { %s7324_s24 = smov 0   ;;  %s8657_s0 = inlined_call_operand.vmem [shape: f32[2,3,384], index: 0, kind: input, shape index: {}]   ;;  %s8658_s1 = inlined_call_operand.vmem [shape: f32[2,3,384], index: 1, kind: input, shape index: {}]   ;;  %s8659_s2 = inlined_call_operand.vmem [shape: bf16[9,8,5], index: 2, kind: input, shape index: {}]   ;;  %s8660_s3 = inlined_call_operand.vmem [shape: f32[8,1], index: 3, kind: input, shape index: {}]   ;;  %s8661_s4 = inlined_call_operand.vmem [shape: bf16[9,3,8], index: 4, kind: input, shape index: {}]   ;;  %s8662_s5 = inlined_call_operand.vmem [shape: f32[3,1], index: 5, kind: input, shape index: {}]   ;;  %s8663_s6 = inlined_call_operand.vmem [shape: f32[2,3,384], index: 6, kind: output, shape index: {0}]   ;;  %s8664_s7 = inlined_call_operand.vmem [shape: bf16[2,3,3,384], index: 7, kind: output, shape index: {1}]  }
   0x1 LB: > { %s6557_s25 = sadd.s32 4294967295, %s7268_s24   ;;  %p6561_p0 = scmp.ge.s32.totalorder %s7268_s24, 1  ;;  %s7268_s24 = sphi %s7324_s24, %s18_s24  }
   0x2   : > { %p250_p1 = scmp.lt.s32.totalorder %s7268_s24, 3 }
   0x4   : > { %p251_p2 = pnand %p6561_p0, %p250_p1 }
   0x5   : > { %p292_p3 = scmp.lt.s32.totalorder (!%p251_p2), %s6557_s25, 1  ;;  %v372_v0 = vlaneseq (!%p251_p2)  ;;  %vm339_vm0 = vcmask (!%p251_p2), 151552   ;;  %v7270_v1 = vmov (!%p251_p2), 0.0   ;;  %vm341_vm1 = vcmask (!%p251_p2), 307352   ;;  %s7271_s10 = smov (!%p251_p2), 19   ;;  %v328_v42 = vld [vmem:[%s8660_s3] sm:$0xff] (!%p251_p2) }
   0x6   : > { %254 = sbr.rel (%p251_p2) target bundleno = 3308 (0xcec), region = 44  ;;  %340 = vst.msk [vmem:[#allocation2] sm:$0x1f] (!%p251_p2), %vm339_vm0, %v7270_v1  ;;  %6845 = vmatprep.subr.bf16.mxu1 (!%p251_p2), %v7270_v1  ;;  %vm366_vm2 = vcmask (!%p251_p2), 1044635   ;;  %vm370_vm3 = vcmask (!%p251_p2), 151555   ;;  %vm359_vm4 = vcmask (!%p251_p2), 154624  }
   0x7   : > { %v7336_v2 = vshrl.u32 (!%p251_p2), %v372_v0, 7  ;;  %342 = vst.msk [vmem:[#allocation2 + $0x18] sm:$0x1f] (!%p251_p2), %vm341_vm1, %v7270_v1  ;;  %vm8667_vm5 = vcmask (!%p251_p2), 1042584   ;;  %vm8666_vm6 = vcmask (!%p251_p2), 149504   ;;  %v7272_v33 = vmov (!%p251_p2), 0  }
   0x8   : > { %499 = vmatprep.mubr.bf16.mxu0 (!%p251_p2), %v7272_v33  ;;  %7193 = vset.pattern.permute.xlu0 (!%p251_p2), %v7272_v33  ;;  %vm7273_vm7 = vmmov (!%p251_p2), 0   ;;  %s7274_s11 = smov (!%p251_p2), 127   ;;  %s7275_s12 = smov (!%p251_p2), 126   ;;  %vm8668_vm8 = vcmask (!%p251_p2), 1041408   ;;  %vm446_vm9 = vcmask (!%p251_p2), 1039360   ;;  %vm455_vm10 = vcmask (!%p251_p2), 1042432  }
   0x9   : > { %v7343_v3 = vsub.s32 (!%p251_p2), 0, %v7336_v2  ;;  %v378_v4 = vsub.s32 (!%p251_p2), 4, %v7336_v2  ;;  %6847 = vmatprep.mubr.msk.bf16.mxu1 (!%p251_p2), %vm7273_vm7, %v7270_v1  ;;  %s7276_s13 = smov (!%p251_p2), 110   ;;  %s7277_s14 = smov (!%p251_p2), 109   ;;  %v7282_v44 = vmov (!%p251_p2), 65535   ;;  %vm649_vm11 = vcmask (!%p251_p2), 1031168  }
   0xa   : > { %s7278_s15 = smov (!%p251_p2), 108   ;;  %s7279_s16 = smov (!%p251_p2), 92   ;;  %v456_v45 = vsel (!%p251_p2), %vm8668_vm8, 4294967295, %v7282_v44  ;;  %v320_v58 = vld [vmem:[%s8659_s2 + $0x4] sm:$0xf] (!%p251_p2)  ;;  %vm8665_vm12 = vcmask (!%p251_p2), 39936  }
   0xb   : > { %s7280_s17 = smov (!%p251_p2), 91   ;;  %s7281_s18 = smov (!%p251_p2), 90   ;;  %v7473_v48 = vsel (!%p251_p2), %vm455_vm10, %v456_v45, 0  ;;  %vm757_vm13 = vcmask (!%p251_p2), 900096   ;;  %vm8675_vm14 = vcmask (!%p251_p2), 891904   ;;  %vm8674_vm15 = vcmask (!%p251_p2), 883712  }
   0xc   : > { %vm8673_vm0 = vcmask (!%p251_p2), 752640   ;;  %vm8672_vm1 = vcmask (!%p251_p2), 744448   ;;  %vm345_vm10 = vcmask (!%p251_p2), 306328  }
   0xd   : > { %s8846_s25 = smov (!%p292_p3, %s6557_s25), 1  ;;  %346 = vst.msk [vmem:[#allocation3 + $0xc] sm:$0xf] %vm345_vm10, %v7272_v33  ;;  %vm8670_vm10 = vcmask 1043456  }
   0xe   : > { %s7340_s26 = smul.u32 12, %s8846_s25 }
  0x10   : > { %s7350_s29 = scalar_lea.vmem %s8658_s1, %s7340_s26  ;;  %s296_s9 = scalar_lea.vmem %s8657_s0, %s7340_s26 }
  0x11   : > { %v7353_v5 = vld [vmem:[%s7350_s29] sm:$0x77]  ;;  %v7356_v6 = vld [vmem:[%s7350_s29 + $0x8] sm:$0x7] }
  0x12   : > { %v350_v7 = vrot.slane %v7353_v5, 5  ;;  %v352_v8 = vrot.slane %v7356_v6, 5  ;;  %v383_v9 = vrot.slane %v7356_v6, %v7343_v3  ;;  %v349_v10 = vcombine.high %v7353_v5, %v7353_v5  ;;  %v313_v16 = vld [vmem:[%s296_s9] sm:$0x77]  ;;  %v314_v19 = vld [vmem:[%s296_s9 + $0x8] sm:$0x7] }
  0x13   : > { %v375_v11 = vrot.slane %v7353_v5, %v7343_v3  ;;  %v379_v12 = vrot.slane %v7353_v5, %v378_v4 }
  0x14   : > { %353 = vrot.lane.b32.xlu0 %v350_v7, %s7271_s10  ;;  %357 = vrot.lane.b32.xlu1 %v352_v8, %s7271_s10  ;;  %v351_v13 = vrot.slane %v349_v10, 5  ;;  %v7378_v17 = vrot.slane %v383_v9, %v7343_v3  ;;  %v319_v10 = vld [vmem:[%s8659_s2] sm:$0xf] }
  0x15   : > { %v390_v14 = vrot.slane %v375_v11, %v7343_v3  ;;  %v394_v15 = vrot.slane %v379_v12, %v7343_v3 }
  0x16   : > { %v7391_v22 = vmul.f32 %v7378_v17, %v314_v19 }
  0x17   : > { %v7380_v18 = vcombine.low %v390_v14, %v394_v15 }
  0x18   : > { %355 = vrot.lane.b32.xlu0 %v351_v13, %s7271_s10 }
  0x19   : > { %v7384_v20 = vmul.f32 %v7380_v18, %v313_v16 }
  0x1b   : > { %408 = vrot.lane.b32.xlu1 %v7384_v20, %s7271_s10  ;;  %v407_v21 = vcombine.high %v7384_v20, %v7384_v20 }
  0x1d   : > { %410 = vrot.lane.b32.xlu0 %v407_v21, %s7271_s10 }
  0x1f   : > { %412 = vrot.lane.b32.xlu1 %v7391_v22, %s7271_s10 }
  0x86   : > { %v354_v23 = vpop.permute.xlu0 %353  ;;  %v358_v24 = vpop.permute.xlu1 %357 }
  0x87   : > { %367 = vst.msk [vmem:[#allocation2] sm:$0x18] %vm366_vm2, %v354_v23  ;;  %vm8671_vm2 = vcmask 736256  }
  0x88   : > { %371 = vst.msk [vmem:[#allocation2 + $0x18] sm:$0x18] %vm370_vm3, %v358_v24  ;;  %vm343_vm3 = vcmask 150528  }
  0x89   : > { %344 = vst.msk [vmem:[#allocation3] sm:$0xf] %vm343_vm3, %v7272_v33  ;;  %vm1462_vm3 = vcmask 1043608  }
  0x8a   : > { %v356_v25 = vpop.permute.xlu0 %355 }
  0x8b   : > { %v360_v26 = vsel %vm359_vm4, %v354_v23, %v356_v25  ;;  %v361_v27 = vsel %vm359_vm4, %v356_v25, %v358_v24  ;;  %v321_v25 = vld [vmem:[%s8659_s2 + $0x8] sm:$0xf] }
  0x8c   : > { %368 = vst [vmem:[#allocation2 + $0x8] sm:$0x18] %v360_v26  ;;  %369 = vst [vmem:[#allocation2 + $0x10] sm:$0x18] %v361_v27 }
  0x8d   : > { %v409_v28 = vpop.permute.xlu1 %408 }
  0x8e   : > { %421 = vst.msk [vmem:[#allocation2] sm:$0x7] %vm8667_vm5, %v409_v28  ;;  %vm1467_vm5 = vcmask 154628  }
  0x8f   : > { %v411_v29 = vpop.permute.xlu0 %410  ;;  %vm7640_vm8 = vmor %vm1467_vm5, %vm8670_vm10  ;;  %vm8669_vm5 = vcmask 64512  }
  0x90   : > { %v414_v30 = vsel %vm359_vm4, %v409_v28, %v411_v29 }
  0x91   : > { %422 = vst [vmem:[#allocation2 + $0x8] sm:$0x7] %v414_v30  ;;  %v413_v31 = vpop.permute.xlu1 %412 }
  0x92   : > { %v415_v32 = vsel %vm359_vm4, %v411_v29, %v413_v31  ;;  %425 = vst.msk [vmem:[#allocation2 + $0x18] sm:$0x7] %vm8666_vm6, %v413_v31 }
  0x93   : > { %423 = vst [vmem:[#allocation2 + $0x10] sm:$0x7] %v415_v32 }
  0x95   : > { %v426_v36 = vld [vmem:[#allocation2] sm:$0x1f] }
  0x96   : > { %v7412_v40 = vpack.c.bf16 %v426_v36, %v426_v36 }
  0x98   : > { %v427_v34 = vld [vmem:[#allocation2 + $0x8] sm:$0x1f]  ;;  %v552_v60 = vand.u32 %v7473_v48, %v7412_v40 }
  0x99   : > { %v7404_v35 = vpack.c.bf16 %v427_v34, %v427_v34  ;;  %v432_v39 = vld [vmem:[#allocation2 + $0x18] sm:$0x1f] }
  0x9a   : > { %v428_v37 = vld [vmem:[#allocation2 + $0x10] sm:$0x1f]  ;;  %v433_v41 = vpack.c.bf16 %v432_v39, %v432_v39 }
  0x9b   : > { %v7408_v38 = vpack.c.bf16 %v428_v37, %v428_v37  ;;  %440 = vrot.lane.b32.xlu0 %v7404_v35, %s7274_s11  ;;  %v555_v55 = vand.u32 %v7473_v48, %v7404_v35  ;;  %v322_v37 = vld [vmem:[%s8659_s2 + $0xc] sm:$0xf] }
  0x9d   : > { %442 = vrot.lane.b32.xlu1 %v7408_v38, %s7274_s11  ;;  %v558_v63 = vand.u32 %v7473_v48, %v7408_v38 }
  0x9f   : > { %438 = vrot.lane.b32.xlu0 %v7412_v40, %s7274_s11 }
  0xa1   : > { %444 = vrot.lane.b32.xlu1 %v433_v41, %s7274_s11 }
  0xa3   : > { %643 = vrot.lane.b32.xlu0 %v7404_v35, %s7275_s12 }
  0xa5   : > { %645 = vrot.lane.b32.xlu1 %v7408_v38, %s7275_s12 }
  0xa7   : > { %641 = vrot.lane.b32.xlu0 %v7412_v40, %s7275_s12 }
  0xa9   : > { %647 = vrot.lane.b32.xlu1 %v433_v41, %s7275_s12 }
  0xab   : > { %751 = vrot.lane.b32.xlu0 %v7404_v35, %s7276_s13 }
  0xad   : > { %753 = vrot.lane.b32.xlu1 %v7408_v38, %s7276_s13 }
  0xaf   : > { %749 = vrot.lane.b32.xlu0 %v7412_v40, %s7276_s13 }
  0xb1   : > { %755 = vrot.lane.b32.xlu1 %v433_v41, %s7276_s13 }
  0xb3   : > { %859 = vrot.lane.b32.xlu0 %v7404_v35, %s7277_s14 }
  0xb5   : > { %861 = vrot.lane.b32.xlu1 %v7408_v38, %s7277_s14 }
  0xb7   : > { %857 = vrot.lane.b32.xlu0 %v7412_v40, %s7277_s14 }
  0xb9   : > { %863 = vrot.lane.b32.xlu1 %v433_v41, %s7277_s14 }
  0xbb   : > { %967 = vrot.lane.b32.xlu0 %v7404_v35, %s7278_s15 }
  0xbd   : > { %969 = vrot.lane.b32.xlu1 %v7408_v38, %s7278_s15 }
  0xbf   : > { %965 = vrot.lane.b32.xlu0 %v7412_v40, %s7278_s15 }
  0xc1   : > { %971 = vrot.lane.b32.xlu1 %v433_v41, %s7278_s15 }
  0xc3   : > { %1075 = vrot.lane.b32.xlu0 %v7404_v35, %s7279_s16 }
  0xc5   : > { %1077 = vrot.lane.b32.xlu1 %v7408_v38, %s7279_s16 }
  0xc7   : > { %1073 = vrot.lane.b32.xlu0 %v7412_v40, %s7279_s16 }
  0xc9   : > { %1079 = vrot.lane.b32.xlu1 %v433_v41, %s7279_s16 }
  0xcb   : > { %1183 = vrot.lane.b32.xlu0 %v7404_v35, %s7280_s17 }
  0xcd   : > { %1185 = vrot.lane.b32.xlu1 %v7408_v38, %s7280_s17 }
  0xcf   : > { %1181 = vrot.lane.b32.xlu0 %v7412_v40, %s7280_s17 }
  0xd1   : > { %1187 = vrot.lane.b32.xlu1 %v433_v41, %s7280_s17 }
  0xd3   : > { %1291 = vrot.lane.b32.xlu0 %v7404_v35, %s7281_s18 }
  0xd5   : > { %1293 = vrot.lane.b32.xlu1 %v7408_v38, %s7281_s18 }
  0xd7   : > { %1289 = vrot.lane.b32.xlu0 %v7412_v40, %s7281_s18 }
  0xd9   : > { %1295 = vrot.lane.b32.xlu1 %v433_v41, %s7281_s18 }
  0xdb   : > { %1399 = vperm.xlu0 %7193, %v328_v42  }
 0x10d   : > { %v441_v43 = vpop.permute.xlu0 %440 }
 0x10f   : > { %v443_v46 = vpop.permute.xlu1 %442 }
 0x110   : > { %v448_v47 = vsel %vm446_vm9, %v441_v43, %v443_v46 }
 0x111   : > { %v439_v49 = vpop.permute.xlu0 %438  ;;  %v462_v50 = vand.u32 %v7473_v48, %v448_v47 }
 0x112   : > { %v447_v51 = vsel %vm446_vm9, %v439_v49, %v441_v43  ;;  %v323_v49 = vld [vmem:[%s8659_s2 + $0x10] sm:$0xf] }
 0x113   : > { %v445_v52 = vpop.permute.xlu1 %444  ;;  %467 = vmatprep.subr.bf16.mxu0 %v462_v50  ;;  %v459_v53 = vand.u32 %v7473_v48, %v447_v51 }
 0x114   : > { %v449_v54 = vsel %vm446_vm9, %v443_v46, %v445_v52 }
 0x115   : > { %468 = vmatpush1.bf16.msra.mxu0 %v459_v53  ;;  %v644_v56 = vpop.permute.xlu0 %643  ;;  %v465_v57 = vand.u32 %v7473_v48, %v449_v54 }
 0x116   : > { %560 = vmatprep.subr.bf16.mxu0 %v555_v55 }
 0x117   : > { %6846 = vmatpush3.bf16.msra.mxu1 %v465_v57  ;;  %v646_v59 = vpop.permute.xlu1 %645 }
 0x118   : > { %v651_v61 = vsel %vm649_vm11, %v644_v56, %v646_v59  ;;  %6566 = vmatmul.mubr.msk.bf16.vlgmr.msra.gmra.mrb[0].mxu0 %vm8665_vm12, %v320_v58  ;;  %6851 = vmatprep.subr.bf16.mxu1 %v7270_v1 }
 0x119   : > { %v642_v62 = vpop.permute.xlu0 %641  ;;  %561 = vmatpush1.bf16.msra.mxu0 %v552_v60  ;;  %v660_v0 = vand.u32 %v651_v61, %v7473_v48  ;;  %592 = vmatprep.mubr.bf16.mxu0 %v7272_v33  ;;  %v324_v60 = vld [vmem:[%s8659_s2 + $0x14] sm:$0xf] }
 0x11a   : > { %6848 = vmatmul.mubr.msk.bf16.vlgmr.msra.gmra.mrb[0].mxu1 %vm8665_vm12, %v320_v58  ;;  %v650_v8 = vsel %vm649_vm11, %v642_v62, %v644_v56 }
 0x11b   : > { %v648_v7 = vpop.permute.xlu1 %647  ;;  %6852 = vmatpush3.bf16.msra.mxu1 %v558_v63  ;;  %665 = vmatprep.subr.bf16.mxu0 %v660_v0  ;;  %v657_v12 = vand.u32 %v650_v8, %v7473_v48 }
 0x11c   : > { %6853 = vmatprep.mubr.msk.bf16.mxu1 %vm7273_vm7, %v7270_v1  ;;  %6857 = vmatprep.subr.bf16.mxu1 %v7270_v1  ;;  %v652_v11 = vsel %vm649_vm11, %v646_v59, %v648_v7 }
 0x11d   : > { %v752_v9 = vpop.permute.xlu0 %751  ;;  %v663_v15 = vand.u32 %v652_v11, %v7473_v48 }
 0x11f   : > { %v754_v13 = vpop.permute.xlu1 %753 }
 0x120   : > { %v759_v14 = vsel %vm757_vm13, %v752_v9, %v754_v13  ;;  %6568 = vmatmul.mubr.msk.bf16.vlgmr.msra.gmra.mrb[4].mxu0 %vm8665_vm12, %v319_v10 }
 0x121   : > { %666 = vmatpush1.bf16.msra.mxu0 %v657_v12  ;;  %v750_v16 = vpop.permute.xlu0 %749  ;;  %v768_v19 = vand.u32 %v759_v14, %v7473_v48  ;;  %697 = vmatprep.mubr.bf16.mxu0 %v7272_v33 }
 0x122   : > { %6854 = vmatmul.mubr.msk.bf16.vlgmr.msra.gmra.mrb[4].mxu1 %vm8665_vm12, %v319_v10  ;;  %v758_v23 = vsel %vm757_vm13, %v750_v16, %v752_v9 }
 0x123   : > { %6858 = vmatpush3.bf16.msra.mxu1 %v663_v15  ;;  %v756_v21 = vpop.permute.xlu1 %755  ;;  %773 = vmatprep.subr.bf16.mxu0 %v768_v19  ;;  %v765_v27 = vand.u32 %v758_v23, %v7473_v48 }
 0x124   : > { %6859 = vmatprep.mubr.msk.bf16.mxu1 %vm7273_vm7, %v7270_v1  ;;  %6863 = vmatprep.subr.bf16.mxu1 %v7270_v1  ;;  %v760_v26 = vsel %vm757_vm13, %v754_v13, %v756_v21  ;;  %v325_v13 = vld [vmem:[%s8659_s2 + $0x18] sm:$0xf] }
 0x125   : > { %v860_v24 = vpop.permute.xlu0 %859  ;;  %v771_v30 = vand.u32 %v760_v26, %v7473_v48 }
 0x127   : > { %v862_v28 = vpop.permute.xlu1 %861 }
 0x128   : > { %v867_v29 = vsel %vm8675_vm14, %v860_v24, %v862_v28  ;;  %6570 = vmatmul.mubr.msk.bf16.vlgmr.msra.gmra.mrb[8].mxu0 %vm8665_vm12, %v321_v25 }
 0x129   : > { %774 = vmatpush1.bf16.msra.mxu0 %v765_v27  ;;  %v858_v31 = vpop.permute.xlu0 %857  ;;  %v876_v32 = vand.u32 %v867_v29, %v7473_v48  ;;  %805 = vmatprep.mubr.bf16.mxu0 %v7272_v33  ;;  %v326_v27 = vld [vmem:[%s8659_s2 + $0x1c] sm:$0xf] }
 0x12a   : > { %6860 = vmatmul.mubr.msk.bf16.vlgmr.msra.gmra.mrb[8].mxu1 %vm8665_vm12, %v321_v25  ;;  %v866_v35 = vsel %vm8675_vm14, %v858_v31, %v860_v24  ;;  %v327_v31 = vld [vmem:[%s8659_s2 + $0x20] sm:$0xf] }
 0x12b   : > { %6864 = vmatpush3.bf16.msra.mxu1 %v771_v30  ;;  %v864_v34 = vpop.permute.xlu1 %863  ;;  %881 = vmatprep.subr.bf16.mxu0 %v876_v32  ;;  %v873_v39 = vand.u32 %v866_v35, %v7473_v48 }
 0x12c   : > { %6865 = vmatprep.mubr.msk.bf16.mxu1 %vm7273_vm7, %v7270_v1  ;;  %6869 = vmatprep.subr.bf16.mxu1 %v7270_v1  ;;  %v868_v38 = vsel %vm8675_vm14, %v862_v28, %v864_v34 }
 0x12d   : > { %v968_v36 = vpop.permute.xlu0 %967  ;;  %v879_v42 = vand.u32 %v868_v38, %v7473_v48 }
 0x12f   : > { %v970_v40 = vpop.permute.xlu1 %969 }
 0x130   : > { %v975_v41 = vsel %vm8674_vm15, %v968_v36, %v970_v40  ;;  %6572 = vmatmul.mubr.msk.bf16.vlgmr.msra.gmra.mrb[12].mxu0 %vm8665_vm12, %v322_v37 }
 0x131   : > { %882 = vmatpush1.bf16.msra.mxu0 %v873_v39  ;;  %v966_v43 = vpop.permute.xlu0 %965  ;;  %v984_v44 = vand.u32 %v975_v41, %v7473_v48  ;;  %913 = vmatprep.mubr.bf16.mxu0 %v7272_v33 }
 0x132   : > { %6866 = vmatmul.mubr.msk.bf16.vlgmr.msra.gmra.mrb[12].mxu1 %vm8665_vm12, %v322_v37  ;;  %v974_v46 = vsel %vm8674_vm15, %v966_v43, %v968_v36 }
 0x133   : > { %6870 = vmatpush3.bf16.msra.mxu1 %v879_v42  ;;  %v972_v45 = vpop.permute.xlu1 %971  ;;  %989 = vmatprep.subr.bf16.mxu0 %v984_v44  ;;  %v981_v51 = vand.u32 %v974_v46, %v7473_v48 }
 0x134   : > { %6871 = vmatprep.mubr.msk.bf16.mxu1 %vm7273_vm7, %v7270_v1  ;;  %6875 = vmatprep.subr.bf16.mxu1 %v7270_v1  ;;  %v976_v50 = vsel %vm8674_vm15, %v970_v40, %v972_v45 }
 0x135   : > { %v1076_v47 = vpop.permute.xlu0 %1075  ;;  %v987_v54 = vand.u32 %v976_v50, %v7473_v48 }
 0x137   : > { %v1078_v52 = vpop.permute.xlu1 %1077 }
 0x138   : > { %v1083_v53 = vsel %vm8673_vm0, %v1076_v47, %v1078_v52  ;;  %6574 = vmatmul.mubr.msk.bf16.vlgmr.msra.gmra.mrb[16].mxu0 %vm8665_vm12, %v323_v49 }
 0x139   : > { %990 = vmatpush1.bf16.msra.mxu0 %v981_v51  ;;  %v1074_v55 = vpop.permute.xlu0 %1073  ;;  %v1092_v56 = vand.u32 %v1083_v53, %v7473_v48  ;;  %1021 = vmatprep.mubr.bf16.mxu0 %v7272_v33 }
 0x13a   : > { %6872 = vmatmul.mubr.msk.bf16.vlgmr.msra.gmra.mrb[16].mxu1 %vm8665_vm12, %v323_v49  ;;  %v1082_v58 = vsel %vm8673_vm0, %v1074_v55, %v1076_v47 }
 0x13b   : > { %6876 = vmatpush3.bf16.msra.mxu1 %v987_v54  ;;  %v1080_v57 = vpop.permute.xlu1 %1079  ;;  %1097 = vmatprep.subr.bf16.mxu0 %v1092_v56  ;;  %v1089_v62 = vand.u32 %v1082_v58, %v7473_v48 }
 0x13c   : > { %6877 = vmatprep.mubr.msk.bf16.mxu1 %vm7273_vm7, %v7270_v1  ;;  %6881 = vmatprep.subr.bf16.mxu1 %v7270_v1  ;;  %v1084_v61 = vsel %vm8673_vm0, %v1078_v52, %v1080_v57 }
 0x13d   : > { %v1184_v59 = vpop.permute.xlu0 %1183  ;;  %v1095_v7 = vand.u32 %v1084_v61, %v7473_v48 }
 0x13f   : > { %v1186_v63 = vpop.permute.xlu1 %1185 }
 0x140   : > { %v1191_v0 = vsel %vm8672_vm1, %v1184_v59, %v1186_v63  ;;  %6576 = vmatmul.mubr.msk.bf16.vlgmr.msra.gmra.mrb[20].mxu0 %vm8665_vm12, %v324_v60 }
 0x141   : > { %1098 = vmatpush1.bf16.msra.mxu0 %v1089_v62  ;;  %v1182_v8 = vpop.permute.xlu0 %1181  ;;  %v1200_v9 = vand.u32 %v1191_v0, %v7473_v48  ;;  %1129 = vmatprep.mubr.bf16.mxu0 %v7272_v33 }
 0x142   : > { %6878 = vmatmul.mubr.msk.bf16.vlgmr.msra.gmra.mrb[20].mxu1 %vm8665_vm12, %v324_v60  ;;  %v1190_v11 = vsel %vm8672_vm1, %v1182_v8, %v1184_v59 }
 0x143   : > { %6882 = vmatpush3.bf16.msra.mxu1 %v1095_v7  ;;  %v1188_v10 = vpop.permute.xlu1 %1187  ;;  %1205 = vmatprep.subr.bf16.mxu0 %v1200_v9  ;;  %v1197_v15 = vand.u32 %v1190_v11, %v7473_v48 }
 0x144   : > { %6883 = vmatprep.mubr.msk.bf16.mxu1 %vm7273_vm7, %v7270_v1  ;;  %6887 = vmatprep.subr.bf16.mxu1 %v7270_v1  ;;  %v1192_v14 = vsel %vm8672_vm1, %v1186_v63, %v1188_v10 }
 0x145   : > { %v1292_v12 = vpop.permute.xlu0 %1291  ;;  %v1203_v21 = vand.u32 %v1192_v14, %v7473_v48 }
 0x147   : > { %v1294_v16 = vpop.permute.xlu1 %1293 }
 0x148   : > { %v1299_v19 = vsel %vm8671_vm2, %v1292_v12, %v1294_v16  ;;  %6578 = vmatmul.mubr.msk.bf16.vlgmr.msra.gmra.mrb[24].mxu0 %vm8665_vm12, %v325_v13 }
 0x149   : > { %1206 = vmatpush1.bf16.msra.mxu0 %v1197_v15  ;;  %v1290_v23 = vpop.permute.xlu0 %1289  ;;  %v1308_v24 = vand.u32 %v1299_v19, %v7473_v48  ;;  %1237 = vmatprep.mubr.bf16.mxu0 %v7272_v33 }
 0x14a   : > { %6884 = vmatmul.mubr.msk.bf16.vlgmr.msra.gmra.mrb[24].mxu1 %vm8665_vm12, %v325_v13  ;;  %v1298_v26 = vsel %vm8671_vm2, %v1290_v23, %v1292_v12 }
 0x14b   : > { %6888 = vmatpush3.bf16.msra.mxu1 %v1203_v21  ;;  %v1296_v25 = vpop.permute.xlu1 %1295  ;;  %1313 = vmatprep.subr.bf16.mxu0 %v1308_v24  ;;  %v1305_v29 = vand.u32 %v1298_v26, %v7473_v48 }
 0x14c   : > { %6889 = vmatprep.mubr.msk.bf16.mxu1 %vm7273_vm7, %v7270_v1  ;;  %6893 = vmatprep.subr.bf16.mxu1 %v7270_v1  ;;  %v1300_v28 = vsel %vm8671_vm2, %v1294_v16, %v1296_v25 }
 0x14d   : > { %v1311_v30 = vand.u32 %v1300_v28, %v7473_v48 }
 0x150   : > { %6580 = vmatmul.mubr.msk.bf16.vlgmr.msra.gmra.mrb[28].mxu0 %vm8665_vm12, %v326_v27 }
 0x151   : > { %1314 = vmatpush1.bf16.msra.mxu0 %v1305_v29  ;;  %1345 = vmatprep.mubr.bf16.mxu0 %v7272_v33 }
 0x152   : > { %6890 = vmatmul.mubr.msk.bf16.vlgmr.msra.gmra.mrb[28].mxu1 %vm8665_vm12, %v326_v27 }
 0x153   : > { %6894 = vmatpush3.bf16.msra.mxu1 %v1311_v30  ;;  %6895 = vmatprep.mubr.msk.bf16.mxu1 %vm7273_vm7, %v7270_v1 }
 0x154   : > { %6899 = vmatprep.subr.bf16.mxu1 %v7270_v1 }
 0x158   : > { %6582 = vmatmul.mubr.msk.bf16.vlgmr.msra.gmra.mrb[32].mxu0 %vm8665_vm12, %v327_v31 }
 0x159   : > { %1539 = vmatprep.mubr.bf16.mxu0 %v7272_v33 }
 0x15a   : > { %6896 = vmatmul.mubr.msk.bf16.vlgmr.msra.gmra.mrb[32].mxu1 %vm8665_vm12, %v327_v31  ;;  %vm1463_vm12 = vcmask 1047556  }
 0x15b   : > { %6901 = vmatprep.mubr.msk.bf16.mxu1 %vm7273_vm7, %v7270_v1  ;;  %vm7632_vm6 = vmor %vm1463_vm12, %vm1462_vm3  ;;  %vm2468_vm12 = vsmask.f32 1280  ;;  %vm2470_vm3 = vcmask 1043458  }
 0x1eb   : > { %v501_v32 = vpop.f32.mrb[0].mxu0 }
 0x1ec   : > { %v503_v34 = vpop.f32.mrb[1].mxu0 }
 0x1ed   : > { %v505_v35 = vpop.f32.mrb[2].mxu0  ;;  %v542_v36 = vpop.f32.mrb[0].mxu1 }
 0x1ee   : > { %v506_v37 = vpop.f32.mrb[3].mxu0  ;;  %v6849_v38 = vpop.f32.mrb[1].mxu1 }
 0x1ef   : > { %v545_v39 = vpop.f32.mrb[2].mxu1 }
 0x1f0   : > { %v6850_v40 = vpop.f32.mrb[3].mxu1 }
 0x1f3   : > { %v594_v41 = vpop.f32.mrb[4].mxu0 }
 0x1f4   : > { %v595_v42 = vadd.f32 %v594_v41, %v501_v32  ;;  %v596_v43 = vpop.f32.mrb[5].mxu0 }
 0x1f5   : > { %v597_v44 = vadd.f32 %v596_v43, %v503_v34  ;;  %v598_v45 = vpop.f32.mrb[6].mxu0  ;;  %v635_v46 = vpop.f32.mrb[4].mxu1 }
 0x1f6   : > { %v636_v47 = vadd.f32 %v635_v46, %v542_v36  ;;  %v599_v49 = vpop.f32.mrb[7].mxu0  ;;  %v6855_v50 = vpop.f32.mrb[5].mxu1 }
 0x1f7   : > { %v638_v51 = vpop.f32.mrb[6].mxu1 }
 0x1f8   : > { %v6856_v52 = vpop.f32.mrb[7].mxu1 }
 0x1fb   : > { %v699_v53 = vpop.f32.mrb[8].mxu0 }
 0x1fc   : > { %v746_v54 = vadd.f32 %v699_v53, %v595_v42  ;;  %v701_v55 = vpop.f32.mrb[9].mxu0 }
 0x1fd   : > { %v747_v56 = vadd.f32 %v701_v55, %v597_v44  ;;  %v703_v57 = vpop.f32.mrb[10].mxu0  ;;  %v740_v58 = vpop.f32.mrb[8].mxu1 }
 0x1fe   : > { %v748_v59 = vadd.f32 %v740_v58, %v636_v47  ;;  %v704_v60 = vpop.f32.mrb[11].mxu0  ;;  %v6861_v61 = vpop.f32.mrb[9].mxu1 }
 0x1ff   : > { %v743_v62 = vpop.f32.mrb[10].mxu1 }
 0x200   : > { %v6862_v63 = vpop.f32.mrb[11].mxu1  ;;  %v1410_v62 = vsub.s32 2, %v7336_v2 }
 0x203   : > { %v807_v0 = vpop.f32.mrb[12].mxu0 }
 0x204   : > { %v854_v7 = vadd.f32 %v807_v0, %v746_v54  ;;  %v809_v8 = vpop.f32.mrb[13].mxu0 }
 0x205   : > { %v855_v9 = vadd.f32 %v809_v8, %v747_v56  ;;  %v811_v10 = vpop.f32.mrb[14].mxu0  ;;  %v848_v11 = vpop.f32.mrb[12].mxu1 }
 0x206   : > { %v856_v12 = vadd.f32 %v848_v11, %v748_v59  ;;  %v812_v13 = vpop.f32.mrb[15].mxu0  ;;  %v6867_v14 = vpop.f32.mrb[13].mxu1  ;;  %v1411_v11 = vrot.slane %v7353_v5, %v1410_v62 }
 0x207   : > { %v851_v15 = vpop.f32.mrb[14].mxu1  ;;  %v7613_v13 = vpop.permute.xlu0 %1399 }
 0x208   : > { %v6868_v16 = vpop.f32.mrb[15].mxu1 }
 0x20b   : > { %v915_v19 = vpop.f32.mrb[16].mxu0 }
 0x20c   : > { %v962_v21 = vadd.f32 %v915_v19, %v854_v7  ;;  %v917_v23 = vpop.f32.mrb[17].mxu0  ;;  %v1419_v19 = vrot.slane %v7356_v6, %v1410_v62 }
 0x20d   : > { %v963_v24 = vadd.f32 %v917_v23, %v855_v9  ;;  %v919_v25 = vpop.f32.mrb[18].mxu0  ;;  %v956_v26 = vpop.f32.mrb[16].mxu1  ;;  %v1414_v9 = vsub.s32 6, %v7336_v2 }
 0x20e   : > { %v964_v27 = vadd.f32 %v956_v26, %v856_v12  ;;  %v920_v28 = vpop.f32.mrb[19].mxu0  ;;  %v6873_v29 = vpop.f32.mrb[17].mxu1  ;;  %v7624_v6 = vrot.slane %v1419_v19, %v1410_v62 }
 0x20f   : > { %v959_v30 = vpop.f32.mrb[18].mxu1  ;;  %v1415_v14 = vrot.slane %v7353_v5, %v1414_v9  ;;  %v7618_v29 = vrot.slane %v1411_v11, %v1410_v62 }
 0x210   : > { %v6874_v31 = vpop.f32.mrb[19].mxu1 }
 0x213   : > { %v1023_v32 = vpop.f32.mrb[20].mxu0 }
 0x214   : > { %v1070_v34 = vadd.f32 %v1023_v32, %v962_v21  ;;  %v1025_v35 = vpop.f32.mrb[21].mxu0  ;;  %v7621_v32 = vrot.slane %v1415_v14, %v1410_v62 }
 0x215   : > { %v1071_v36 = vadd.f32 %v1025_v35, %v963_v24  ;;  %v1027_v37 = vpop.f32.mrb[22].mxu0  ;;  %v1064_v38 = vpop.f32.mrb[20].mxu1 }
 0x216   : > { %v1072_v39 = vadd.f32 %v1064_v38, %v964_v27  ;;  %v1028_v40 = vpop.f32.mrb[23].mxu0  ;;  %v6879_v41 = vpop.f32.mrb[21].mxu1 }
 0x217   : > { %v1067_v42 = vpop.f32.mrb[22].mxu1 }
 0x218   : > { %v6880_v43 = vpop.f32.mrb[23].mxu1 }
 0x21b   : > { %v1131_v44 = vpop.f32.mrb[24].mxu0 }
 0x21c   : > { %v1178_v45 = vadd.f32 %v1131_v44, %v1070_v34  ;;  %v1133_v46 = vpop.f32.mrb[25].mxu0 }
 0x21d   : > { %v1179_v47 = vadd.f32 %v1133_v46, %v1071_v36  ;;  %v1135_v49 = vpop.f32.mrb[26].mxu0  ;;  %v1172_v50 = vpop.f32.mrb[24].mxu1 }
 0x21e   : > { %v1180_v51 = vadd.f32 %v1172_v50, %v1072_v39  ;;  %v1136_v52 = vpop.f32.mrb[27].mxu0  ;;  %v6885_v53 = vpop.f32.mrb[25].mxu1 }
 0x21f   : > { %v1175_v54 = vpop.f32.mrb[26].mxu1 }
 0x220   : > { %v6886_v55 = vpop.f32.mrb[27].mxu1 }
 0x223   : > { %v1239_v56 = vpop.f32.mrb[28].mxu0 }
 0x224   : > { %v1286_v57 = vadd.f32 %v1239_v56, %v1178_v45  ;;  %v1241_v58 = vpop.f32.mrb[29].mxu0 }
 0x225   : > { %v1287_v59 = vadd.f32 %v1241_v58, %v1179_v47  ;;  %v1243_v60 = vpop.f32.mrb[30].mxu0  ;;  %v1280_v61 = vpop.f32.mrb[28].mxu1 }
 0x226   : > { %v1288_v63 = vadd.f32 %v1280_v61, %v1180_v51  ;;  %v1244_v0 = vpop.f32.mrb[31].mxu0  ;;  %v6891_v7 = vpop.f32.mrb[29].mxu1 }
 0x227   : > { %v1283_v8 = vpop.f32.mrb[30].mxu1 }
 0x228   : > { %v6892_v10 = vpop.f32.mrb[31].mxu1 }
 0x22b   : > { %v1347_v12 = vpop.f32.mrb[32].mxu0 }
 0x22c   : > { %v1394_v15 = vadd.f32 %v1347_v12, %v1286_v57  ;;  %v1349_v16 = vpop.f32.mrb[33].mxu0  ;;  %v330_v12 = vld [vmem:[%s8661_s4 + $0x2] sm:$0x3] }
 0x22d   : > { %v1395_v21 = vadd.f32 %v1349_v16, %v1287_v59  ;;  %v1388_v23 = vpop.f32.mrb[32].mxu1  ;;  %v1351_v24 = vpop.f32.mrb[34].mxu0  ;;  %v338_v59 = vld [vmem:[%s8662_s5] sm:$0x7] }
 0x22e   : > { %v1396_v25 = vadd.f32 %v1388_v23, %v1288_v63  ;;  %v1352_v26 = vpop.f32.mrb[35].mxu0  ;;  %v6897_v27 = vpop.f32.mrb[33].mxu1  ;;  %v1402_v28 = vadd.f32 %v7613_v13, %v1394_v15 }
 0x22f   : > { %v1391_v30 = vpop.f32.mrb[34].mxu1  ;;  %v1403_v31 = vadd.f32 %v7613_v13, %v1395_v21  ;;  %v329_v27 = vld [vmem:[%s8661_s4] sm:$0x3] }
 0x230   : > { %v6898_v5 = vpop.f32.mrb[35].mxu1  ;;  %v1405_v34 = vmax.f32 %v1402_v28, 0.0  ;;  %v1404_v35 = vadd.f32 %v7613_v13, %v1396_v25 }
 0x231   : > { %v1406_v36 = vmax.f32 %v1403_v31, 0.0 }
 0x232   : > { %v1435_v37 = vmul.f32 %v7618_v29, %v1405_v34  ;;  %v1407_v38 = vmax.f32 %v1404_v35, 0.0 }
 0x233   : > { %v1436_v39 = vmul.f32 %v7621_v32, %v1406_v36 }
 0x234   : > { %v1437_v41 = vmul.f32 %v7624_v6, %v1407_v38 }
 0x235   : > { %v6731_v40 = vpack.c.bf16 %v1436_v39, %v1435_v37  ;;  %v331_v39 = vld [vmem:[%s8661_s4 + $0x4] sm:$0x3] }
 0x236   : > { %v6732_v42 = vpack.c.bf16 %v1437_v41, %v1437_v41 }
 0x237   : > { %1449 = vrot.lane.b32.xlu1 %v6731_v40, %s7271_s10 }
 0x23b   : > { %1451 = vrot.lane.b32.xlu1 %v6732_v42, %s7271_s10 }
 0x2a9   : > { %v1450_v43 = vpop.permute.xlu1 %1449 }
 0x2aa   : > { %v1453_v45 = vrot.slane %v1450_v43, 4 }
 0x2ac   : > { %v1456_v46 = vsel %vm359_vm4, %v1453_v45, %v1450_v43 }
 0x2ad   : > { %1465 = vst.msk [vmem:[#allocation3] sm:$0xff] %vm7632_vm6, %v1456_v46  ;;  %v1452_v47 = vpop.permute.xlu1 %1451 }
 0x2ae   : > { %v1454_v49 = vrot.slane %v1452_v47, 4 }
 0x2b0   : > { %v1458_v51 = vsel %vm8670_vm10, %v1453_v45, %v1454_v49 }
 0x2b1   : > { %v1459_v52 = vsel %vm359_vm4, %v1458_v51, %v1452_v47 }
 0x2b2   : > { %1469 = vst.msk [vmem:[#allocation3 + $0x8] sm:$0xff] %vm7640_vm8, %v1459_v52  ;;  %v332_v52 = vld [vmem:[%s8661_s4 + $0x6] sm:$0x3] }
 0x2b4   : > { %v1470_v53 = vld [vmem:[#allocation3] sm:$0xff] }
 0x2b5   : > { %v6587_v54 = vcombine.high %v1470_v53, %v1470_v53  ;;  %v6586_v55 = vcombine.low %v1470_v53, %v1470_v53 }
 0x2b7   : > { %1485 = vrot.lane.b32.xlu1 %v6587_v54, %s7274_s11  ;;  %1483 = vrot.lane.b32.xlu0 %v6586_v55, %s7274_s11  ;;  %v1595_v16 = vsel %vm8670_vm10, %v6586_v55, 0 }
 0x2b9   : > { %v1472_v56 = vld [vmem:[#allocation3 + $0x8] sm:$0xff] }
 0x2ba   : > { %v6589_v57 = vcombine.high %v1472_v56, %v1472_v56  ;;  %v6588_v58 = vcombine.low %v1472_v56, %v1472_v56  ;;  %v7197_v11 = vld [vmem:[#allocation3 + $0x8] ss:$0 sps:$4 sm:$0xff]  }
 0x2bb   : > { %v1601_v19 = vsel %vm8670_vm10, %v7197_v11, 0 }
 0x2bc   : > { %1489 = vrot.lane.b32.xlu1 %v6589_v57, %s7274_s11  ;;  %1487 = vrot.lane.b32.xlu0 %v6588_v58, %s7274_s11 }
 0x2c0   : > { %1686 = vrot.lane.b32.xlu1 %v6587_v54, %s7275_s12  ;;  %1684 = vrot.lane.b32.xlu0 %v6586_v55, %s7275_s12 }
 0x2c4   : > { %1690 = vrot.lane.b32.xlu1 %v6589_v57, %s7275_s12  ;;  %1688 = vrot.lane.b32.xlu0 %v6588_v58, %s7275_s12 }
 0x2c8   : > { %1793 = vrot.lane.b32.xlu1 %v6587_v54, %s7276_s13  ;;  %1791 = vrot.lane.b32.xlu0 %v6586_v55, %s7276_s13 }
 0x2cc   : > { %1797 = vrot.lane.b32.xlu1 %v6589_v57, %s7276_s13  ;;  %1795 = vrot.lane.b32.xlu0 %v6588_v58, %s7276_s13 }
 0x2d0   : > { %1900 = vrot.lane.b32.xlu1 %v6587_v54, %s7277_s14  ;;  %1898 = vrot.lane.b32.xlu0 %v6586_v55, %s7277_s14 }
 0x2d4   : > { %1904 = vrot.lane.b32.xlu1 %v6589_v57, %s7277_s14  ;;  %1902 = vrot.lane.b32.xlu0 %v6588_v58, %s7277_s14 }
 0x2d8   : > { %2007 = vrot.lane.b32.xlu1 %v6587_v54, %s7278_s15  ;;  %2005 = vrot.lane.b32.xlu0 %v6586_v55, %s7278_s15 }
 0x2dc   : > { %2011 = vrot.lane.b32.xlu1 %v6589_v57, %s7278_s15  ;;  %2009 = vrot.lane.b32.xlu0 %v6588_v58, %s7278_s15 }
 0x2e0   : > { %2114 = vrot.lane.b32.xlu1 %v6587_v54, %s7279_s16  ;;  %2112 = vrot.lane.b32.xlu0 %v6586_v55, %s7279_s16 }
 0x2e4   : > { %2118 = vrot.lane.b32.xlu1 %v6589_v57, %s7279_s16  ;;  %2116 = vrot.lane.b32.xlu0 %v6588_v58, %s7279_s16 }
 0x2e8   : > { %2221 = vrot.lane.b32.xlu1 %v6587_v54, %s7280_s17  ;;  %2219 = vrot.lane.b32.xlu0 %v6586_v55, %s7280_s17 }
 0x2ec   : > { %2225 = vrot.lane.b32.xlu1 %v6589_v57, %s7280_s17  ;;  %2223 = vrot.lane.b32.xlu0 %v6588_v58, %s7280_s17 }
 0x2f0   : > { %2328 = vrot.lane.b32.xlu1 %v6587_v54, %s7281_s18  ;;  %2326 = vrot.lane.b32.xlu0 %v6586_v55, %s7281_s18 }
 0x2f4   : > { %2332 = vrot.lane.b32.xlu1 %v6589_v57, %s7281_s18  ;;  %2330 = vrot.lane.b32.xlu0 %v6588_v58, %s7281_s18 }
 0x2f8   : > { %2435 = vperm.xlu0 %7193, %v338_v59  }
 0x329   : > { %v1484_v60 = vpop.permute.xlu0 %1483  ;;  %v1486_v61 = vpop.permute.xlu1 %1485 }
 0x32a   : > { %v1491_v62 = vsel %vm446_vm9, %v1484_v60, %v1486_v61 }
 0x32b   : > { %v1499_v10 = vsel %vm8670_vm10, %v1491_v62, 0  ;;  %v333_v62 = vld [vmem:[%s8661_s4 + $0x8] sm:$0x3] }
 0x32e   : > { %v1488_v63 = vpop.permute.xlu0 %1487  ;;  %v1490_v0 = vpop.permute.xlu1 %1489 }
 0x32f   : > { %v1493_v7 = vsel %vm446_vm9, %v1488_v63, %v1490_v0  ;;  %v1492_v8 = vsel %vm446_vm9, %v1486_v61, %v1488_v63 }
 0x330   : > { %v1505_v9 = vsel %vm8670_vm10, %v1493_v7, 0  ;;  %6590 = vmatprep.subr.msk.bf16.mxu0 %vm8670_vm10, %v1492_v8 }
 0x331   : > { %1508 = vmatpush1.bf16.msra.mxu0 %v1499_v10  ;;  %6900 = vmatpush3.bf16.msra.mxu1 %v1505_v9 }
 0x332   : > { %v1685_v14 = vpop.permute.xlu0 %1684  ;;  %6594 = vmatprep.subr.msk.bf16.mxu0 %vm8670_vm10, %v6587_v54  ;;  %v1687_v15 = vpop.permute.xlu1 %1686  ;;  %6905 = vmatprep.subr.bf16.mxu1 %v7270_v1 }
 0x333   : > { %v1692_v25 = vsel %vm649_vm11, %v1685_v14, %v1687_v15 }
 0x334   : > { %6591 = vmatmul.mubr.msk.bf16.vlgmr.msra.gmra.mrb[36].mxu0 %vm8669_vm5, %v330_v12  ;;  %6902 = vmatmul.mubr.msk.bf16.vlgmr.msra.gmra.mrb[36].mxu1 %vm8669_vm5, %v330_v12  ;;  %v1699_v5 = vsel %vm8670_vm10, %v1692_v25, 0 }
 0x335   : > { %1604 = vmatpush1.bf16.msra.mxu0 %v1595_v16  ;;  %6906 = vmatpush3.bf16.msra.mxu1 %v1601_v19 }
 0x336   : > { %v1689_v21 = vpop.permute.xlu0 %1688  ;;  %v1691_v23 = vpop.permute.xlu1 %1690  ;;  %1635 = vmatprep.mubr.bf16.mxu0 %v7272_v33  ;;  %6907 = vmatprep.mubr.msk.bf16.mxu1 %vm7273_vm7, %v7270_v1 }
 0x337   : > { %v1693_v24 = vsel %vm649_vm11, %v1687_v15, %v1689_v21  ;;  %6911 = vmatprep.subr.bf16.mxu1 %v7270_v1  ;;  %v1694_v26 = vsel %vm649_vm11, %v1689_v21, %v1691_v23  ;;  %v334_v15 = vld [vmem:[%s8661_s4 + $0xa] sm:$0x3] }
 0x338   : > { %6597 = vmatprep.subr.msk.bf16.mxu0 %vm8670_vm10, %v1693_v24  ;;  %v1705_v31 = vsel %vm8670_vm10, %v1694_v26, 0 }
 0x33a   : > { %v1792_v28 = vpop.permute.xlu0 %1791  ;;  %v1794_v30 = vpop.permute.xlu1 %1793 }
 0x33b   : > { %v1799_v37 = vsel %vm757_vm13, %v1792_v28, %v1794_v30 }
 0x33c   : > { %6595 = vmatmul.mubr.msk.bf16.vlgmr.msra.gmra.mrb[40].mxu0 %vm8669_vm5, %v329_v27  ;;  %6908 = vmatmul.mubr.msk.bf16.vlgmr.msra.gmra.mrb[40].mxu1 %vm8669_vm5, %v329_v27  ;;  %v1806_v43 = vsel %vm8670_vm10, %v1799_v37, 0 }
 0x33d   : > { %1708 = vmatpush1.bf16.msra.mxu0 %v1699_v5  ;;  %6912 = vmatpush3.bf16.msra.mxu1 %v1705_v31 }
 0x33e   : > { %v1796_v34 = vpop.permute.xlu0 %1795  ;;  %v1798_v35 = vpop.permute.xlu1 %1797  ;;  %1739 = vmatprep.mubr.bf16.mxu0 %v7272_v33  ;;  %6913 = vmatprep.mubr.msk.bf16.mxu1 %vm7273_vm7, %v7270_v1 }
 0x33f   : > { %v1800_v36 = vsel %vm757_vm13, %v1794_v30, %v1796_v34  ;;  %6917 = vmatprep.subr.bf16.mxu1 %v7270_v1  ;;  %v1801_v38 = vsel %vm757_vm13, %v1796_v34, %v1798_v35  ;;  %v335_v30 = vld [vmem:[%s8661_s4 + $0xc] sm:$0x3] }
 0x340   : > { %6600 = vmatprep.subr.msk.bf16.mxu0 %vm8670_vm10, %v1800_v36  ;;  %v1812_v42 = vsel %vm8670_vm10, %v1801_v38, 0 }
 0x342   : > { %v1899_v40 = vpop.permute.xlu0 %1898  ;;  %v1901_v41 = vpop.permute.xlu1 %1900 }
 0x343   : > { %v1906_v49 = vsel %vm8675_vm14, %v1899_v40, %v1901_v41 }
 0x344   : > { %6598 = vmatmul.mubr.msk.bf16.vlgmr.msra.gmra.mrb[44].mxu0 %vm8669_vm5, %v331_v39  ;;  %6914 = vmatmul.mubr.msk.bf16.vlgmr.msra.gmra.mrb[44].mxu1 %vm8669_vm5, %v331_v39  ;;  %v1913_v56 = vsel %vm8670_vm10, %v1906_v49, 0 }
 0x345   : > { %1815 = vmatpush1.bf16.msra.mxu0 %v1806_v43  ;;  %6918 = vmatpush3.bf16.msra.mxu1 %v1812_v42 }
 0x346   : > { %v1903_v45 = vpop.permute.xlu0 %1902  ;;  %v1905_v46 = vpop.permute.xlu1 %1904  ;;  %1846 = vmatprep.mubr.bf16.mxu0 %v7272_v33  ;;  %6919 = vmatprep.mubr.msk.bf16.mxu1 %vm7273_vm7, %v7270_v1 }
 0x347   : > { %v1907_v47 = vsel %vm8675_vm14, %v1901_v41, %v1903_v45  ;;  %6923 = vmatprep.subr.bf16.mxu1 %v7270_v1  ;;  %v1908_v51 = vsel %vm8675_vm14, %v1903_v45, %v1905_v46  ;;  %v336_v41 = vld [vmem:[%s8661_s4 + $0xe] sm:$0x3]  ;;  %v337_v45 = vld [vmem:[%s8661_s4 + $0x10] sm:$0x3] }
 0x348   : > { %6603 = vmatprep.subr.msk.bf16.mxu0 %vm8670_vm10, %v1907_v47  ;;  %v1919_v55 = vsel %vm8670_vm10, %v1908_v51, 0 }
 0x34a   : > { %v2006_v53 = vpop.permute.xlu0 %2005  ;;  %v2008_v54 = vpop.permute.xlu1 %2007 }
 0x34b   : > { %v2013_v60 = vsel %vm8674_vm15, %v2006_v53, %v2008_v54 }
 0x34c   : > { %6601 = vmatmul.mubr.msk.bf16.vlgmr.msra.gmra.mrb[48].mxu0 %vm8669_vm5, %v332_v52  ;;  %6920 = vmatmul.mubr.msk.bf16.vlgmr.msra.gmra.mrb[48].mxu1 %vm8669_vm5, %v332_v52  ;;  %v2020_v8 = vsel %vm8670_vm10, %v2013_v60, 0 }
 0x34d   : > { %1922 = vmatpush1.bf16.msra.mxu0 %v1913_v56  ;;  %6924 = vmatpush3.bf16.msra.mxu1 %v1919_v55 }
 0x34e   : > { %v2010_v57 = vpop.permute.xlu0 %2009  ;;  %v2012_v58 = vpop.permute.xlu1 %2011  ;;  %1953 = vmatprep.mubr.bf16.mxu0 %v7272_v33  ;;  %6925 = vmatprep.mubr.msk.bf16.mxu1 %vm7273_vm7, %v7270_v1 }
 0x34f   : > { %v2014_v59 = vsel %vm8674_vm15, %v2008_v54, %v2010_v57  ;;  %6929 = vmatprep.subr.bf16.mxu1 %v7270_v1  ;;  %v2015_v61 = vsel %vm8674_vm15, %v2010_v57, %v2012_v58 }
 0x350   : > { %6606 = vmatprep.subr.msk.bf16.mxu0 %vm8670_vm10, %v2014_v59  ;;  %v2026_v7 = vsel %vm8670_vm10, %v2015_v61, 0 }
 0x352   : > { %v2113_v63 = vpop.permute.xlu0 %2112  ;;  %v2115_v0 = vpop.permute.xlu1 %2114 }
 0x353   : > { %v2120_v12 = vsel %vm8673_vm0, %v2113_v63, %v2115_v0 }
 0x354   : > { %6604 = vmatmul.mubr.msk.bf16.vlgmr.msra.gmra.mrb[52].mxu0 %vm8669_vm5, %v333_v62  ;;  %6926 = vmatmul.mubr.msk.bf16.vlgmr.msra.gmra.mrb[52].mxu1 %vm8669_vm5, %v333_v62  ;;  %v2127_v23 = vsel %vm8670_vm10, %v2120_v12, 0 }
 0x355   : > { %2029 = vmatpush1.bf16.msra.mxu0 %v2020_v8  ;;  %6930 = vmatpush3.bf16.msra.mxu1 %v2026_v7 }
 0x356   : > { %v2117_v9 = vpop.permute.xlu0 %2116  ;;  %v2119_v10 = vpop.permute.xlu1 %2118  ;;  %2060 = vmatprep.mubr.bf16.mxu0 %v7272_v33  ;;  %6931 = vmatprep.mubr.msk.bf16.mxu1 %vm7273_vm7, %v7270_v1 }
 0x357   : > { %v2121_v11 = vsel %vm8673_vm0, %v2115_v0, %v2117_v9  ;;  %6935 = vmatprep.subr.bf16.mxu1 %v7270_v1  ;;  %v2122_v14 = vsel %vm8673_vm0, %v2117_v9, %v2119_v10 }
 0x358   : > { %6609 = vmatprep.subr.msk.bf16.mxu0 %vm8670_vm10, %v2121_v11  ;;  %v2133_v21 = vsel %vm8670_vm10, %v2122_v14, 0 }
 0x35a   : > { %v2220_v16 = vpop.permute.xlu0 %2219  ;;  %v2222_v19 = vpop.permute.xlu1 %2221 }
 0x35b   : > { %v2227_v27 = vsel %vm8672_vm1, %v2220_v16, %v2222_v19 }
 0x35c   : > { %6607 = vmatmul.mubr.msk.bf16.vlgmr.msra.gmra.mrb[56].mxu0 %vm8669_vm5, %v334_v15  ;;  %6932 = vmatmul.mubr.msk.bf16.vlgmr.msra.gmra.mrb[56].mxu1 %vm8669_vm5, %v334_v15  ;;  %v2234_v35 = vsel %vm8670_vm10, %v2227_v27, 0 }
 0x35d   : > { %2136 = vmatpush1.bf16.msra.mxu0 %v2127_v23  ;;  %6936 = vmatpush3.bf16.msra.mxu1 %v2133_v21 }
 0x35e   : > { %v2224_v24 = vpop.permute.xlu0 %2223  ;;  %v2226_v25 = vpop.permute.xlu1 %2225  ;;  %2167 = vmatprep.mubr.bf16.mxu0 %v7272_v33  ;;  %6937 = vmatprep.mubr.msk.bf16.mxu1 %vm7273_vm7, %v7270_v1 }
 0x35f   : > { %v2228_v26 = vsel %vm8672_vm1, %v2222_v19, %v2224_v24  ;;  %6941 = vmatprep.subr.bf16.mxu1 %v7270_v1  ;;  %v2229_v28 = vsel %vm8672_vm1, %v2224_v24, %v2226_v25 }
 0x360   : > { %6612 = vmatprep.subr.msk.bf16.mxu0 %vm8670_vm10, %v2228_v26  ;;  %v2240_v34 = vsel %vm8670_vm10, %v2229_v28, 0 }
 0x362   : > { %v2327_v31 = vpop.permute.xlu0 %2326  ;;  %v2329_v5 = vpop.permute.xlu1 %2328 }
 0x363   : > { %v2334_v39 = vsel %vm8671_vm2, %v2327_v31, %v2329_v5 }
 0x364   : > { %6610 = vmatmul.mubr.msk.bf16.vlgmr.msra.gmra.mrb[60].mxu0 %vm8669_vm5, %v335_v30  ;;  %6938 = vmatmul.mubr.msk.bf16.vlgmr.msra.gmra.mrb[60].mxu1 %vm8669_vm5, %v335_v30  ;;  %v2341_v43 = vsel %vm8670_vm10, %v2334_v39, 0 }
 0x365   : > { %2243 = vmatpush1.bf16.msra.mxu0 %v2234_v35  ;;  %6942 = vmatpush3.bf16.msra.mxu1 %v2240_v34 }
 0x366   : > { %v2331_v36 = vpop.permute.xlu0 %2330  ;;  %v2333_v37 = vpop.permute.xlu1 %2332  ;;  %2274 = vmatprep.mubr.bf16.mxu0 %v7272_v33  ;;  %6943 = vmatprep.mubr.msk.bf16.mxu1 %vm7273_vm7, %v7270_v1 }
 0x367   : > { %v2335_v38 = vsel %vm8671_vm2, %v2329_v5, %v2331_v36  ;;  %6947 = vmatprep.subr.bf16.mxu1 %v7270_v1  ;;  %v2336_v40 = vsel %vm8671_vm2, %v2331_v36, %v2333_v37 }
 0x368   : > { %6615 = vmatprep.subr.msk.bf16.mxu0 %vm8670_vm10, %v2335_v38  ;;  %v2347_v42 = vsel %vm8670_vm10, %v2336_v40, 0  ;;  %vm8680_vm10 = vcmask 1041408  }
 0x369   : > { %vm7830_vm2 = vmand %vm8680_vm10, %vm2468_vm12  ;;  %vm2474_vm10 = vcmask 1045508   ;;  %vm2475_vm12 = vsmask.f32 5376 }
 0x36c   : > { %6613 = vmatmul.mubr.msk.bf16.vlgmr.msra.gmra.mrb[64].mxu0 %vm8669_vm5, %v336_v41  ;;  %6944 = vmatmul.mubr.msk.bf16.vlgmr.msra.gmra.mrb[64].mxu1 %vm8669_vm5, %v336_v41 }
 0x36d   : > { %2350 = vmatpush1.bf16.msra.mxu0 %v2341_v43  ;;  %6948 = vmatpush3.bf16.msra.mxu1 %v2347_v42 }
 0x36e   : > { %2381 = vmatprep.mubr.bf16.mxu0 %v7272_v33  ;;  %6949 = vmatprep.mubr.msk.bf16.mxu1 %vm7273_vm7, %v7270_v1 }
 0x36f   : > { %6953 = vmatprep.subr.bf16.mxu1 %v7270_v1 }
 0x374   : > { %6616 = vmatmul.mubr.msk.bf16.vlgmr.msra.gmra.mrb[68].mxu0 %vm8669_vm5, %v337_v45  ;;  %6950 = vmatmul.mubr.msk.bf16.vlgmr.msra.gmra.mrb[68].mxu1 %vm8669_vm5, %v337_v45  ;;  %vm2471_vm5 = vsmask.f32 3328 }
 0x375   : > { %2610 = vmatprep.mubr.bf16.mxu0 %v7272_v33  ;;  %6955 = vmatprep.mubr.msk.bf16.mxu1 %vm7273_vm7, %v7270_v1  ;;  %vm7838_vm1 = vmand %vm2470_vm3, %vm2471_vm5 }
 0x376   : > { %vm2473_vm5 = vmor %vm7838_vm1, %vm7830_vm2  ;;  %vm8687_vm2 = vcmask 1042584  }
 0x377   : > { %vm2476_vm3 = vmand %vm2474_vm10, %vm2475_vm12  ;;  %vm8688_vm10 = vcmask 149504   ;;  %vm8689_vm12 = vcmask 39936  }
 0x378   : > { %vm7870_vm1 = vmor %vm2476_vm3, %vm2473_vm5 }
 0x379   : > { %vm8690_vm5 = vmmov %vm8689_vm12 }
 0x37a   : > { %vm8691_vm3 = vmmov %vm8690_vm5 }
 0x407   : > { %v1541_v46 = vpop.f32.mrb[36].mxu0  ;;  %v1582_v47 = vpop.f32.mrb[36].mxu1 }
 0x408   : > { %v1543_v49 = vpop.f32.mrb[37].mxu0  ;;  %v6903_v51 = vpop.f32.mrb[37].mxu1 }
 0x409   : > { %v1545_v52 = vpop.f32.mrb[38].mxu0  ;;  %v1585_v53 = vpop.f32.mrb[38].mxu1 }
 0x40a   : > { %v1546_v54 = vpop.f32.mrb[39].mxu0  ;;  %v6904_v55 = vpop.f32.mrb[39].mxu1 }
 0x40f   : > { %v1637_v56 = vpop.f32.mrb[40].mxu0  ;;  %v1678_v57 = vpop.f32.mrb[40].mxu1 }
 0x410   : > { %v1638_v58 = vadd.f32 %v1637_v56, %v1541_v46  ;;  %v1679_v59 = vadd.f32 %v1678_v57, %v1582_v47  ;;  %v1639_v60 = vpop.f32.mrb[41].mxu0  ;;  %v6909_v61 = vpop.f32.mrb[41].mxu1 }
 0x411   : > { %v1640_v62 = vadd.f32 %v1639_v60, %v1543_v49  ;;  %v1641_v63 = vpop.f32.mrb[42].mxu0  ;;  %v1681_v0 = vpop.f32.mrb[42].mxu1 }
 0x412   : > { %v1642_v7 = vpop.f32.mrb[43].mxu0  ;;  %v6910_v8 = vpop.f32.mrb[43].mxu1 }
 0x417   : > { %v1741_v9 = vpop.f32.mrb[44].mxu0  ;;  %v1782_v10 = vpop.f32.mrb[44].mxu1 }
 0x418   : > { %v1788_v11 = vadd.f32 %v1741_v9, %v1638_v58  ;;  %v1790_v12 = vadd.f32 %v1782_v10, %v1679_v59  ;;  %v1743_v14 = vpop.f32.mrb[45].mxu0  ;;  %v6915_v15 = vpop.f32.mrb[45].mxu1 }
 0x419   : > { %v1789_v16 = vadd.f32 %v1743_v14, %v1640_v62  ;;  %v1745_v19 = vpop.f32.mrb[46].mxu0  ;;  %v1785_v21 = vpop.f32.mrb[46].mxu1 }
 0x41a   : > { %v1746_v23 = vpop.f32.mrb[47].mxu0  ;;  %v6916_v24 = vpop.f32.mrb[47].mxu1 }
 0x41f   : > { %v1848_v25 = vpop.f32.mrb[48].mxu0  ;;  %v1889_v26 = vpop.f32.mrb[48].mxu1 }
 0x420   : > { %v1895_v27 = vadd.f32 %v1848_v25, %v1788_v11  ;;  %v1897_v28 = vadd.f32 %v1889_v26, %v1790_v12  ;;  %v1850_v30 = vpop.f32.mrb[49].mxu0  ;;  %v6921_v31 = vpop.f32.mrb[49].mxu1 }
 0x421   : > { %v1896_v5 = vadd.f32 %v1850_v30, %v1789_v16  ;;  %v1852_v34 = vpop.f32.mrb[50].mxu0  ;;  %v1892_v35 = vpop.f32.mrb[50].mxu1 }
 0x422   : > { %v1853_v36 = vpop.f32.mrb[51].mxu0  ;;  %v6922_v37 = vpop.f32.mrb[51].mxu1 }
 0x423   : > { %v7815_v34 = vpop.permute.xlu0 %2435 }
 0x427   : > { %v1955_v38 = vpop.f32.mrb[52].mxu0  ;;  %v1996_v39 = vpop.f32.mrb[52].mxu1 }
 0x428   : > { %v2002_v40 = vadd.f32 %v1955_v38, %v1895_v27  ;;  %v2004_v41 = vadd.f32 %v1996_v39, %v1897_v28  ;;  %v1957_v42 = vpop.f32.mrb[53].mxu0  ;;  %v6927_v43 = vpop.f32.mrb[53].mxu1 }
 0x429   : > { %v2003_v45 = vadd.f32 %v1957_v42, %v1896_v5  ;;  %v1959_v46 = vpop.f32.mrb[54].mxu0  ;;  %v1999_v47 = vpop.f32.mrb[54].mxu1 }
 0x42a   : > { %v1960_v49 = vpop.f32.mrb[55].mxu0  ;;  %v6928_v51 = vpop.f32.mrb[55].mxu1 }
 0x42f   : > { %v2062_v52 = vpop.f32.mrb[56].mxu0  ;;  %v2103_v53 = vpop.f32.mrb[56].mxu1 }
 0x430   : > { %v2109_v54 = vadd.f32 %v2062_v52, %v2002_v40  ;;  %v2111_v55 = vadd.f32 %v2103_v53, %v2004_v41  ;;  %v2064_v56 = vpop.f32.mrb[57].mxu0  ;;  %v6933_v57 = vpop.f32.mrb[57].mxu1  ;;  %v7224_v52 = vld [vmem:[%s7350_s29] sm:$0x77] }
 0x431   : > { %v2110_v58 = vadd.f32 %v2064_v56, %v2003_v45  ;;  %v2066_v59 = vpop.f32.mrb[58].mxu0  ;;  %v2106_v60 = vpop.f32.mrb[58].mxu1  ;;  %v317_v53 = vsub.f32 1.0, %v7224_v52  ;;  %v7283_v56 = vmov 1983009808  }
 0x432   : > { %v2067_v61 = vpop.f32.mrb[59].mxu0  ;;  %v6934_v62 = vpop.f32.mrb[59].mxu1  ;;  %v2452_v57 = vunpack.c.l.s4 %v7283_v56 }
 0x433   : > { %v2492_v60 = vrot.slane %v317_v53, %v378_v4 }
 0x434   : > { %v2453_v61 = vunpack.c.0.s8 %v2452_v57 }
 0x435   : > { %v7843_v4 = vrot.slane %v2492_v60, %v7343_v3 }
 0x437   : > { %v2169_v63 = vpop.f32.mrb[60].mxu0  ;;  %v2210_v0 = vpop.f32.mrb[60].mxu1 }
 0x438   : > { %v2216_v7 = vadd.f32 %v2169_v63, %v2109_v54  ;;  %v2218_v8 = vadd.f32 %v2210_v0, %v2111_v55  ;;  %v2171_v9 = vpop.f32.mrb[61].mxu0  ;;  %v6939_v10 = vpop.f32.mrb[61].mxu1  ;;  %v7225_v54 = vld [vmem:[%s7350_s29 + $0x8] sm:$0x7]  ;;  %s7170_s29 = smul.u32 18, %s8846_s25 }
 0x439   : > { %v2217_v11 = vadd.f32 %v2171_v9, %v2110_v58  ;;  %v2173_v12 = vpop.f32.mrb[62].mxu0  ;;  %v2213_v14 = vpop.f32.mrb[62].mxu1  ;;  %v318_v55 = vsub.f32 1.0, %v7225_v54  ;;  %v2488_v58 = vrot.slane %v317_v53, %v7343_v3  ;;  %v2482_v9 = vmul.f32 %v7391_v22, %v7378_v17 }
 0x43a   : > { %v2174_v15 = vpop.f32.mrb[63].mxu0  ;;  %v6940_v16 = vpop.f32.mrb[63].mxu1  ;;  %v7848_v10 = vsub.s32 %v2453_v61, %v7336_v2  ;;  %s7859_s20 = scalar_lea.vmem %s8664_s7, %s7170_s29  ;;  %v2481_v22 = vmul.f32 %v7384_v20, %v7380_v18 }
 0x43b   : > { %v2496_v59 = vrot.slane %v318_v55, %v7343_v3  ;;  %v7827_v62 = vrot.slane %v2488_v58, %v7343_v3 }
 0x43d   : > { %v7835_v0 = vrot.slane %v2496_v59, %v7343_v3 }
 0x43f   : > { %v2276_v19 = vpop.f32.mrb[64].mxu0  ;;  %v2317_v21 = vpop.f32.mrb[64].mxu1 }
 0x440   : > { %v2323_v23 = vadd.f32 %v2276_v19, %v2216_v7  ;;  %v2325_v24 = vadd.f32 %v2317_v21, %v2218_v8  ;;  %v2278_v25 = vpop.f32.mrb[65].mxu0  ;;  %v6945_v26 = vpop.f32.mrb[65].mxu1 }
 0x441   : > { %v2324_v27 = vadd.f32 %v2278_v25, %v2217_v11  ;;  %v2280_v28 = vpop.f32.mrb[66].mxu0  ;;  %v2320_v30 = vpop.f32.mrb[66].mxu1  ;;  %v7868_v25 = vcombine.low %v7618_v29, %v7621_v32 }
 0x442   : > { %v2281_v31 = vpop.f32.mrb[67].mxu0  ;;  %v6946_v5 = vpop.f32.mrb[67].mxu1 }
 0x447   : > { %v2383_v35 = vpop.f32.mrb[68].mxu0  ;;  %v2424_v36 = vpop.f32.mrb[68].mxu1 }
 0x448   : > { %v2430_v37 = vadd.f32 %v2383_v35, %v2323_v23  ;;  %v2432_v38 = vadd.f32 %v2424_v36, %v2325_v24  ;;  %v2385_v39 = vpop.f32.mrb[69].mxu0  ;;  %v6951_v40 = vpop.f32.mrb[69].mxu1 }
 0x449   : > { %v2431_v41 = vadd.f32 %v2385_v39, %v2324_v27  ;;  %v2387_v42 = vpop.f32.mrb[70].mxu0  ;;  %v2427_v43 = vpop.f32.mrb[70].mxu1  ;;  %v2478_v27 = vld [vmem:[%s7859_s20] sm:$0x3f] }
 0x44a   : > { %v2438_v45 = vadd.f32 %v7815_v34, %v2430_v37  ;;  %v2440_v46 = vadd.f32 %v7815_v34, %v2432_v38  ;;  %v2388_v47 = vpop.f32.mrb[71].mxu0  ;;  %v6952_v49 = vpop.f32.mrb[71].mxu1 }
 0x44b   : > { %v2439_v51 = vadd.f32 %v7815_v34, %v2431_v41 }
 0x44c   : > { %7206 = vtanh.f32 %v2438_v45 }
 0x44d   : > { %7208 = vtanh.f32 %v2440_v46 }
 0x44e   : > { %7210 = vtanh.f32 %v2439_v51 }
 0x456   : > { %v7207_v8 = vpop.eup %7206 }
 0x457   : > { %v7209_v11 = vpop.eup %7208  ;;  %v2512_v12 = vmul.f32 %v7207_v8, %v7827_v62 }
 0x458   : > { %v7211_v14 = vpop.eup %7210  ;;  %v2446_v15 = vpack.c.bf16 %v7209_v11, %v7209_v11  ;;  %v2514_v3 = vmul.f32 %v7209_v11, %v7835_v0 }
 0x459   : > { %v6618_v2 = vpack.c.bf16 %v7211_v14, %v7207_v8  ;;  %v2513_v16 = vmul.f32 %v7211_v14, %v7843_v4 }
 0x45a   : > { %v2464_v19 = vrot.slane %v2446_v15, %v7848_v10  ;;  %v2520_v21 = vadd.f32 %v2514_v3, %v2482_v9 }
 0x45b   : > { %v2457_v23 = vrot.slane %v6618_v2, %v7848_v10  ;;  %v2517_v24 = vcombine.low %v2512_v12, %v2513_v16  ;;  %v7226_v12 = vld [vmem:[%s8659_s2 + $0x4] sm:$0xf] }
 0x45c   : > { %v7887_v35 = vmul.f32 %v2520_v21, %v7624_v6 }
 0x45d   : > { %v2465_v28 = vcombine.low %v2457_v23, %v2464_v19  ;;  %v2519_v30 = vadd.f32 %v2517_v24, %v2481_v22 }
 0x45f   : > { %v2479_v20 = vsel %vm7870_vm1, %v2465_v28, %v2478_v27  ;;  %v7878_v31 = vmul.f32 %v7868_v25, %v2519_v30  ;;  %v7227_v27 = vld [vmem:[%s8659_s2] sm:$0xf] }
 0x460   : > { %2480 = vst [vmem:[%s7859_s20] sm:$0x3f] %v2479_v20 }
 0x461   : > { %2530 = vrot.lane.b32.xlu1 %v7878_v31, %s7271_s10  ;;  %v2529_v5 = vcombine.high %v7878_v31, %v7878_v31 }
 0x463   : > { %2532 = vrot.lane.b32.xlu0 %v2529_v5, %s7271_s10 }
 0x465   : > { %2534 = vrot.lane.b32.xlu1 %v7887_v35, %s7271_s10 }
 0x4d3   : > { %v2531_v36 = vpop.permute.xlu1 %2530 }
 0x4d4   : > { %2542 = vst.msk [vmem:[#allocation2] sm:$0x7] %vm8687_vm2, %v2531_v36  ;;  %vm8692_vm2 = vmmov %vm8691_vm3 }
 0x4d5   : > { %v2533_v37 = vpop.permute.xlu0 %2532 }
 0x4d6   : > { %v2536_v38 = vsel %vm359_vm4, %v2531_v36, %v2533_v37 }
 0x4d7   : > { %2543 = vst [vmem:[#allocation2 + $0x8] sm:$0x7] %v2536_v38  ;;  %v2535_v39 = vpop.permute.xlu1 %2534 }
 0x4d8   : > { %v2537_v40 = vsel %vm359_vm4, %v2533_v37, %v2535_v39  ;;  %2545 = vst.msk [vmem:[#allocation2 + $0x18] sm:$0x7] %vm8688_vm10, %v2535_v39  ;;  %vm8693_vm10 = vmmov %vm8692_vm2 }
 0x4d9   : > { %2544 = vst [vmem:[#allocation2 + $0x10] sm:$0x7] %v2537_v40 }
 0x4db   : > { %v2546_v43 = vld [vmem:[#allocation2] sm:$0x1f] }
 0x4dc   : > { %v2549_v49 = vpack.c.bf16 %v2546_v43, %v2546_v43 }
 0x4de   : > { %v2547_v41 = vld [vmem:[#allocation2 + $0x8] sm:$0x1f]  ;;  %v2660_v9 = vand.u32 %v2549_v49, %v7473_v48 }
 0x4df   : > { %v2550_v42 = vpack.c.bf16 %v2547_v41, %v2547_v41  ;;  %v2552_v47 = vld [vmem:[#allocation2 + $0x18] sm:$0x1f] }
 0x4e0   : > { %v2548_v45 = vld [vmem:[#allocation2 + $0x10] sm:$0x1f]  ;;  %v2553_v51 = vpack.c.bf16 %v2552_v47, %v2552_v47 }
 0x4e1   : > { %v7895_v46 = vpack.c.bf16 %v2548_v45, %v2548_v45  ;;  %2560 = vrot.lane.b32.xlu0 %v2550_v42, %s7274_s11  ;;  %v2663_v61 = vand.u32 %v2550_v42, %v7473_v48 }
 0x4e3   : > { %2562 = vrot.lane.b32.xlu1 %v7895_v46, %s7274_s11  ;;  %v2666_v3 = vand.u32 %v7895_v46, %v7473_v48 }
 0x4e5   : > { %2558 = vrot.lane.b32.xlu0 %v2549_v49, %s7274_s11 }
 0x4e7   : > { %2564 = vrot.lane.b32.xlu1 %v2553_v51, %s7274_s11 }
 0x4e9   : > { %2751 = vrot.lane.b32.xlu0 %v2550_v42, %s7275_s12 }
 0x4eb   : > { %2753 = vrot.lane.b32.xlu1 %v7895_v46, %s7275_s12 }
 0x4ed   : > { %2749 = vrot.lane.b32.xlu0 %v2549_v49, %s7275_s12 }
 0x4ef   : > { %2755 = vrot.lane.b32.xlu1 %v2553_v51, %s7275_s12 }
 0x4f1   : > { %2855 = vrot.lane.b32.xlu0 %v2550_v42, %s7276_s13 }
 0x4f3   : > { %2857 = vrot.lane.b32.xlu1 %v7895_v46, %s7276_s13 }
 0x4f5   : > { %2853 = vrot.lane.b32.xlu0 %v2549_v49, %s7276_s13 }
 0x4f7   : > { %2859 = vrot.lane.b32.xlu1 %v2553_v51, %s7276_s13 }
 0x4f9   : > { %2959 = vrot.lane.b32.xlu0 %v2550_v42, %s7277_s14 }
 0x4fb   : > { %2961 = vrot.lane.b32.xlu1 %v7895_v46, %s7277_s14 }
 0x4fd   : > { %2957 = vrot.lane.b32.xlu0 %v2549_v49, %s7277_s14 }
 0x4ff   : > { %2963 = vrot.lane.b32.xlu1 %v2553_v51, %s7277_s14 }
 0x501   : > { %3063 = vrot.lane.b32.xlu0 %v2550_v42, %s7278_s15 }
 0x503   : > { %3065 = vrot.lane.b32.xlu1 %v7895_v46, %s7278_s15 }
 0x505   : > { %3061 = vrot.lane.b32.xlu0 %v2549_v49, %s7278_s15 }
 0x507   : > { %3067 = vrot.lane.b32.xlu1 %v2553_v51, %s7278_s15 }
 0x509   : > { %3167 = vrot.lane.b32.xlu0 %v2550_v42, %s7279_s16 }
 0x50b   : > { %3169 = vrot.lane.b32.xlu1 %v7895_v46, %s7279_s16 }
 0x50d   : > { %3165 = vrot.lane.b32.xlu0 %v2549_v49, %s7279_s16 }
 0x50f   : > { %3171 = vrot.lane.b32.xlu1 %v2553_v51, %s7279_s16 }
 0x511   : > { %3271 = vrot.lane.b32.xlu0 %v2550_v42, %s7280_s17 }
 0x513   : > { %3273 = vrot.lane.b32.xlu1 %v7895_v46, %s7280_s17 }
 0x515   : > { %3269 = vrot.lane.b32.xlu0 %v2549_v49, %s7280_s17 }
 0x517   : > { %3275 = vrot.lane.b32.xlu1 %v2553_v51, %s7280_s17 }
 0x519   : > { %3375 = vrot.lane.b32.xlu0 %v2550_v42, %s7281_s18  ;;  %v7228_v42 = vld [vmem:[%s8659_s2 + $0x8] sm:$0xf] }
 0x51b   : > { %3377 = vrot.lane.b32.xlu1 %v7895_v46, %s7281_s18 }
 0x51d   : > { %3373 = vrot.lane.b32.xlu0 %v2549_v49, %s7281_s18 }
 0x51f   : > { %3379 = vrot.lane.b32.xlu1 %v2553_v51, %s7281_s18 }
 0x553   : > { %v2561_v52 = vpop.permute.xlu0 %2560 }
 0x555   : > { %v2563_v53 = vpop.permute.xlu1 %2562 }
 0x556   : > { %v2567_v54 = vsel %vm446_vm9, %v2561_v52, %v2563_v53 }
 0x557   : > { %v2559_v55 = vpop.permute.xlu0 %2558  ;;  %v2573_v56 = vand.u32 %v2567_v54, %v7473_v48 }
 0x558   : > { %v2566_v57 = vsel %vm446_vm9, %v2559_v55, %v2561_v52 }
 0x559   : > { %v2570_v58 = vand.u32 %v2566_v57, %v7473_v48  ;;  %2578 = vmatprep.subr.bf16.mxu0 %v2573_v56  ;;  %v2565_v59 = vpop.permute.xlu1 %2564  ;;  %v7229_v56 = vld [vmem:[%s8659_s2 + $0xc] sm:$0xf] }
 0x55a   : > { %v2568_v60 = vsel %vm446_vm9, %v2563_v53, %v2565_v59 }
 0x55b   : > { %v2576_v63 = vand.u32 %v2568_v60, %v7473_v48  ;;  %v2752_v7 = vpop.permute.xlu0 %2751  ;;  %2579 = vmatpush1.bf16.msra.mxu0 %v2570_v58 }
 0x55c   : > { %2668 = vmatprep.subr.bf16.mxu0 %v2663_v61 }
 0x55d   : > { %6954 = vmatpush3.bf16.msra.mxu1 %v2576_v63  ;;  %v2754_v8 = vpop.permute.xlu1 %2753 }
 0x55e   : > { %v2758_v11 = vsel %vm649_vm11, %v2752_v7, %v2754_v8  ;;  %6619 = vmatmul.mubr.msk.bf16.vlgmr.msra.gmra.mrb[72].mxu0 %vm8689_vm12, %v7226_v12  ;;  %6959 = vmatprep.subr.bf16.mxu1 %v7270_v1  ;;  %vm8694_vm12 = vmmov %vm8692_vm2 }
 0x55f   : > { %v2750_v14 = vpop.permute.xlu0 %2749  ;;  %2669 = vmatpush1.bf16.msra.mxu0 %v2660_v9  ;;  %v2764_v15 = vand.u32 %v2758_v11, %v7473_v48  ;;  %2700 = vmatprep.mubr.bf16.mxu0 %v7272_v33 }
 0x560   : > { %6956 = vmatmul.mubr.msk.bf16.vlgmr.msra.gmra.mrb[72].mxu1 %vm8690_vm5, %v7226_v12  ;;  %v2757_v22 = vsel %vm649_vm11, %v2750_v14, %v2752_v7  ;;  %vm8695_vm5 = vmmov %vm8692_vm2  ;;  %v7230_v12 = vld [vmem:[%s8659_s2 + $0x10] sm:$0xf] }
 0x561   : > { %2769 = vmatprep.subr.bf16.mxu0 %v2764_v15  ;;  %v2756_v2 = vpop.permute.xlu1 %2755  ;;  %6960 = vmatpush3.bf16.msra.mxu1 %v2666_v3  ;;  %v2761_v21 = vand.u32 %v2757_v22, %v7473_v48 }
 0x562   : > { %6961 = vmatprep.mubr.msk.bf16.mxu1 %vm7273_vm7, %v7270_v1  ;;  %6965 = vmatprep.subr.bf16.mxu1 %v7270_v1  ;;  %v2759_v19 = vsel %vm649_vm11, %v2754_v8, %v2756_v2 }
 0x563   : > { %v2856_v16 = vpop.permute.xlu0 %2855  ;;  %v2767_v28 = vand.u32 %v2759_v19, %v7473_v48 }
 0x565   : > { %v2858_v23 = vpop.permute.xlu1 %2857 }
 0x566   : > { %v2862_v24 = vsel %vm757_vm13, %v2856_v16, %v2858_v23  ;;  %6621 = vmatmul.mubr.msk.bf16.vlgmr.msra.gmra.mrb[76].mxu0 %vm8691_vm3, %v7227_v27  ;;  %vm8696_vm3 = vmmov %vm8692_vm2 }
 0x567   : > { %2770 = vmatpush1.bf16.msra.mxu0 %v2761_v21  ;;  %v2854_v30 = vpop.permute.xlu0 %2853  ;;  %v2868_v20 = vand.u32 %v2862_v24, %v7473_v48  ;;  %2801 = vmatprep.mubr.bf16.mxu0 %v7272_v33 }
 0x568   : > { %6962 = vmatmul.mubr.msk.bf16.vlgmr.msra.gmra.mrb[76].mxu1 %vm8692_vm2, %v7227_v27  ;;  %v2861_v36 = vsel %vm757_vm13, %v2854_v30, %v2856_v16  ;;  %v7231_v27 = vld [vmem:[%s8659_s2 + $0x14] sm:$0xf] }
 0x569   : > { %6966 = vmatpush3.bf16.msra.mxu1 %v2767_v28  ;;  %2873 = vmatprep.subr.bf16.mxu0 %v2868_v20  ;;  %v2860_v5 = vpop.permute.xlu1 %2859  ;;  %v2865_v39 = vand.u32 %v2861_v36, %v7473_v48 }
 0x56a   : > { %6967 = vmatprep.mubr.msk.bf16.mxu1 %vm7273_vm7, %v7270_v1  ;;  %6971 = vmatprep.subr.bf16.mxu1 %v7270_v1  ;;  %v2863_v38 = vsel %vm757_vm13, %v2858_v23, %v2860_v5 }
 0x56b   : > { %v2960_v37 = vpop.permute.xlu0 %2959  ;;  %v2871_v43 = vand.u32 %v2863_v38, %v7473_v48 }
 0x56d   : > { %v2962_v40 = vpop.permute.xlu1 %2961 }
 0x56e   : > { %v2966_v41 = vsel %vm8675_vm14, %v2960_v37, %v2962_v40  ;;  %6623 = vmatmul.mubr.msk.bf16.vlgmr.msra.gmra.mrb[80].mxu0 %vm8693_vm10, %v7228_v42  ;;  %vm8697_vm10 = vmmov %vm8692_vm2 }
 0x56f   : > { %2874 = vmatpush1.bf16.msra.mxu0 %v2865_v39  ;;  %v2958_v45 = vpop.permute.xlu0 %2957  ;;  %v2972_v46 = vand.u32 %v2966_v41, %v7473_v48  ;;  %2905 = vmatprep.mubr.bf16.mxu0 %v7272_v33 }
 0x570   : > { %6968 = vmatmul.mubr.msk.bf16.vlgmr.msra.gmra.mrb[80].mxu1 %vm8694_vm12, %v7228_v42  ;;  %v2965_v49 = vsel %vm8675_vm14, %v2958_v45, %v2960_v37  ;;  %vm8698_vm12 = vcmask 744448   ;;  %v7232_v42 = vld [vmem:[%s8659_s2 + $0x18] sm:$0xf] }
 0x571   : > { %6972 = vmatpush3.bf16.msra.mxu1 %v2871_v43  ;;  %2977 = vmatprep.subr.bf16.mxu0 %v2972_v46  ;;  %v2964_v47 = vpop.permute.xlu1 %2963  ;;  %v2969_v53 = vand.u32 %v2965_v49, %v7473_v48 }
 0x572   : > { %6973 = vmatprep.mubr.msk.bf16.mxu1 %vm7273_vm7, %v7270_v1  ;;  %6977 = vmatprep.subr.bf16.mxu1 %v7270_v1  ;;  %v2967_v52 = vsel %vm8675_vm14, %v2962_v40, %v2964_v47 }
 0x573   : > { %v3064_v51 = vpop.permute.xlu0 %3063  ;;  %v2975_v57 = vand.u32 %v2967_v52, %v7473_v48 }
 0x575   : > { %v3066_v54 = vpop.permute.xlu1 %3065 }
 0x576   : > { %v3070_v55 = vsel %vm8674_vm15, %v3064_v51, %v3066_v54  ;;  %6625 = vmatmul.mubr.msk.bf16.vlgmr.msra.gmra.mrb[84].mxu0 %vm8695_vm5, %v7229_v56  ;;  %vm8699_vm5 = vmmov %vm8692_vm2 }
 0x577   : > { %2978 = vmatpush1.bf16.msra.mxu0 %v2969_v53  ;;  %v3062_v58 = vpop.permute.xlu0 %3061  ;;  %v3076_v59 = vand.u32 %v3070_v55, %v7473_v48  ;;  %3009 = vmatprep.mubr.bf16.mxu0 %v7272_v33  ;;  %v7233_v53 = vld [vmem:[%s8659_s2 + $0x1c] sm:$0xf]  ;;  %v7234_v55 = vld [vmem:[%s8659_s2 + $0x20] sm:$0xf] }
 0x578   : > { %6974 = vmatmul.mubr.msk.bf16.vlgmr.msra.gmra.mrb[84].mxu1 %vm8696_vm3, %v7229_v56  ;;  %v3069_v61 = vsel %vm8674_vm15, %v3062_v58, %v3064_v51  ;;  %vm8700_vm3 = vmmov %vm8692_vm2 }
 0x579   : > { %6978 = vmatpush3.bf16.msra.mxu1 %v2975_v57  ;;  %3081 = vmatprep.subr.bf16.mxu0 %v3076_v59  ;;  %v3068_v60 = vpop.permute.xlu1 %3067  ;;  %v3073_v8 = vand.u32 %v3069_v61, %v7473_v48 }
 0x57a   : > { %6979 = vmatprep.mubr.msk.bf16.mxu1 %vm7273_vm7, %v7270_v1  ;;  %6983 = vmatprep.subr.bf16.mxu1 %v7270_v1  ;;  %v3071_v7 = vsel %vm8674_vm15, %v3066_v54, %v3068_v60 }
 0x57b   : > { %v3168_v63 = vpop.permute.xlu0 %3167  ;;  %v3079_v14 = vand.u32 %v3071_v7, %v7473_v48 }
 0x57d   : > { %v3170_v9 = vpop.permute.xlu1 %3169 }
 0x57e   : > { %v3174_v11 = vsel %vm8673_vm0, %v3168_v63, %v3170_v9  ;;  %6627 = vmatmul.mubr.msk.bf16.vlgmr.msra.gmra.mrb[88].mxu0 %vm8692_vm2, %v7230_v12  ;;  %vm8701_vm2 = vmmov %vm8698_vm12 }
 0x57f   : > { %3082 = vmatpush1.bf16.msra.mxu0 %v3073_v8  ;;  %v3166_v15 = vpop.permute.xlu0 %3165  ;;  %v3180_v3 = vand.u32 %v3174_v11, %v7473_v48  ;;  %3113 = vmatprep.mubr.bf16.mxu0 %v7272_v33 }
 0x580   : > { %6980 = vmatmul.mubr.msk.bf16.vlgmr.msra.gmra.mrb[88].mxu1 %vm8697_vm10, %v7230_v12  ;;  %v3173_v22 = vsel %vm8673_vm0, %v3166_v15, %v3168_v63  ;;  %vm8702_vm10 = vmmov %vm8701_vm2 }
 0x581   : > { %6984 = vmatpush3.bf16.msra.mxu1 %v3079_v14  ;;  %3185 = vmatprep.subr.bf16.mxu0 %v3180_v3  ;;  %v3172_v2 = vpop.permute.xlu1 %3171  ;;  %v3177_v21 = vand.u32 %v3173_v22, %v7473_v48 }
 0x582   : > { %6985 = vmatprep.mubr.msk.bf16.mxu1 %vm7273_vm7, %v7270_v1  ;;  %6989 = vmatprep.subr.bf16.mxu1 %v7270_v1  ;;  %v3175_v19 = vsel %vm8673_vm0, %v3170_v9, %v3172_v2 }
 0x583   : > { %v3272_v16 = vpop.permute.xlu0 %3271  ;;  %v3183_v28 = vand.u32 %v3175_v19, %v7473_v48 }
 0x585   : > { %v3274_v23 = vpop.permute.xlu1 %3273 }
 0x586   : > { %v3278_v24 = vsel %vm8698_vm12, %v3272_v16, %v3274_v23  ;;  %6629 = vmatmul.mubr.msk.bf16.vlgmr.msra.gmra.mrb[92].mxu0 %vm8699_vm5, %v7231_v27  ;;  %vm8703_vm12 = vcmask 736256   ;;  %vm8704_vm5 = vmmov %vm8700_vm3 }
 0x587   : > { %3186 = vmatpush1.bf16.msra.mxu0 %v3177_v21  ;;  %v3270_v30 = vpop.permute.xlu0 %3269  ;;  %v3284_v20 = vand.u32 %v3278_v24, %v7473_v48  ;;  %3217 = vmatprep.mubr.bf16.mxu0 %v7272_v33 }
 0x588   : > { %6986 = vmatmul.mubr.msk.bf16.vlgmr.msra.gmra.mrb[92].mxu1 %vm8700_vm3, %v7231_v27  ;;  %v3277_v36 = vsel %vm8701_vm2, %v3270_v30, %v3272_v16  ;;  %vm8705_vm2 = vmmov %vm8703_vm12 }
 0x589   : > { %6990 = vmatpush3.bf16.msra.mxu1 %v3183_v28  ;;  %3289 = vmatprep.subr.bf16.mxu0 %v3284_v20  ;;  %v3276_v5 = vpop.permute.xlu1 %3275  ;;  %v3281_v39 = vand.u32 %v3277_v36, %v7473_v48 }
 0x58a   : > { %6991 = vmatprep.mubr.msk.bf16.mxu1 %vm7273_vm7, %v7270_v1  ;;  %6995 = vmatprep.subr.bf16.mxu1 %v7270_v1  ;;  %v3279_v38 = vsel %vm8702_vm10, %v3274_v23, %v3276_v5  ;;  %vm8706_vm10 = vmmov %vm8705_vm2 }
 0x58b   : > { %v3376_v37 = vpop.permute.xlu0 %3375  ;;  %v3287_v43 = vand.u32 %v3279_v38, %v7473_v48 }
 0x58d   : > { %v3378_v40 = vpop.permute.xlu1 %3377 }
 0x58e   : > { %v3382_v41 = vsel %vm8703_vm12, %v3376_v37, %v3378_v40  ;;  %6631 = vmatmul.mubr.msk.bf16.vlgmr.msra.gmra.mrb[96].mxu0 %vm8704_vm5, %v7232_v42  ;;  %vm8707_vm12 = vmmov %vm8700_vm3 }
 0x58f   : > { %3290 = vmatpush1.bf16.msra.mxu0 %v3281_v39  ;;  %v3374_v45 = vpop.permute.xlu0 %3373  ;;  %v3388_v46 = vand.u32 %v3382_v41, %v7473_v48  ;;  %3321 = vmatprep.mubr.bf16.mxu0 %v7272_v33  ;;  %vm8708_vm5 = vmmov %vm8700_vm3 }
 0x590   : > { %6992 = vmatmul.mubr.msk.bf16.vlgmr.msra.gmra.mrb[96].mxu1 %vm8700_vm3, %v7232_v42  ;;  %v3381_v49 = vsel %vm8705_vm2, %v3374_v45, %v3376_v37  ;;  %vm8709_vm2 = vmmov %vm8700_vm3 }
 0x591   : > { %6996 = vmatpush3.bf16.msra.mxu1 %v3287_v43  ;;  %3393 = vmatprep.subr.bf16.mxu0 %v3388_v46  ;;  %v3380_v47 = vpop.permute.xlu1 %3379  ;;  %v3385_v52 = vand.u32 %v3381_v49, %v7473_v48 }
 0x592   : > { %6997 = vmatprep.mubr.msk.bf16.mxu1 %vm7273_vm7, %v7270_v1  ;;  %7001 = vmatprep.subr.bf16.mxu1 %v7270_v1  ;;  %v3383_v51 = vsel %vm8706_vm10, %v3378_v40, %v3380_v47  ;;  %vm8710_vm10 = vcmask 1043456  }
 0x593   : > { %v3391_v54 = vand.u32 %v3383_v51, %v7473_v48 }
 0x596   : > { %6633 = vmatmul.mubr.msk.bf16.vlgmr.msra.gmra.mrb[100].mxu0 %vm8707_vm12, %v7233_v53  ;;  %vm8711_vm12 = vmmov %vm8710_vm10 }
 0x597   : > { %3394 = vmatpush1.bf16.msra.mxu0 %v3385_v52  ;;  %3425 = vmatprep.mubr.bf16.mxu0 %v7272_v33 }
 0x598   : > { %6998 = vmatmul.mubr.msk.bf16.vlgmr.msra.gmra.mrb[100].mxu1 %vm8708_vm5, %v7233_v53  ;;  %vm8712_vm5 = vmmov %vm8710_vm10 }
 0x599   : > { %7002 = vmatpush3.bf16.msra.mxu1 %v3391_v54  ;;  %7003 = vmatprep.mubr.msk.bf16.mxu1 %vm7273_vm7, %v7270_v1 }
 0x59a   : > { %7007 = vmatprep.subr.bf16.mxu1 %v7270_v1 }
 0x59e   : > { %6635 = vmatmul.mubr.msk.bf16.vlgmr.msra.gmra.mrb[104].mxu0 %vm8700_vm3, %v7234_v55  ;;  %vm8713_vm3 = vmmov %vm8712_vm5 }
 0x59f   : > { %3575 = vmatprep.mubr.bf16.mxu0 %v7272_v33 }
 0x5a0   : > { %7004 = vmatmul.mubr.msk.bf16.vlgmr.msra.gmra.mrb[104].mxu1 %vm8709_vm2, %v7234_v55  ;;  %vm8714_vm2 = vmmov %vm8713_vm3 }
 0x5a1   : > { %7009 = vmatprep.mubr.msk.bf16.mxu1 %vm7273_vm7, %v7270_v1 }
 0x631   : > { %v2612_v56 = vpop.f32.mrb[72].mxu0 }
 0x632   : > { %v2614_v57 = vpop.f32.mrb[73].mxu0 }
 0x633   : > { %v2616_v58 = vpop.f32.mrb[74].mxu0  ;;  %v2653_v59 = vpop.f32.mrb[72].mxu1 }
 0x634   : > { %v2617_v60 = vpop.f32.mrb[75].mxu0  ;;  %v6957_v61 = vpop.f32.mrb[73].mxu1 }
 0x635   : > { %v2656_v63 = vpop.f32.mrb[74].mxu1 }
 0x636   : > { %v6958_v7 = vpop.f32.mrb[75].mxu1 }
 0x639   : > { %v2702_v8 = vpop.f32.mrb[76].mxu0 }
 0x63a   : > { %v2703_v9 = vadd.f32 %v2702_v8, %v2612_v56  ;;  %v2704_v11 = vpop.f32.mrb[77].mxu0 }
 0x63b   : > { %v2705_v12 = vadd.f32 %v2704_v11, %v2614_v57  ;;  %v2706_v14 = vpop.f32.mrb[78].mxu0  ;;  %v2743_v15 = vpop.f32.mrb[76].mxu1 }
 0x63c   : > { %v2744_v3 = vadd.f32 %v2743_v15, %v2653_v59  ;;  %v2707_v2 = vpop.f32.mrb[79].mxu0  ;;  %v6963_v22 = vpop.f32.mrb[77].mxu1 }
 0x63d   : > { %v2746_v16 = vpop.f32.mrb[78].mxu1 }
 0x63e   : > { %v6964_v19 = vpop.f32.mrb[79].mxu1 }
 0x641   : > { %v2803_v21 = vpop.f32.mrb[80].mxu0 }
 0x642   : > { %v2850_v23 = vadd.f32 %v2803_v21, %v2703_v9  ;;  %v2805_v24 = vpop.f32.mrb[81].mxu0 }
 0x643   : > { %v2851_v27 = vadd.f32 %v2805_v24, %v2705_v12  ;;  %v2807_v28 = vpop.f32.mrb[82].mxu0  ;;  %v2844_v30 = vpop.f32.mrb[80].mxu1 }
 0x644   : > { %v2852_v20 = vadd.f32 %v2844_v30, %v2744_v3  ;;  %v2808_v5 = vpop.f32.mrb[83].mxu0  ;;  %v6969_v36 = vpop.f32.mrb[81].mxu1 }
 0x645   : > { %v2847_v37 = vpop.f32.mrb[82].mxu1 }
 0x646   : > { %v6970_v38 = vpop.f32.mrb[83].mxu1 }
 0x649   : > { %v2907_v39 = vpop.f32.mrb[84].mxu0 }
 0x64a   : > { %v2954_v40 = vadd.f32 %v2907_v39, %v2850_v23  ;;  %v2909_v41 = vpop.f32.mrb[85].mxu0 }
 0x64b   : > { %v2955_v42 = vadd.f32 %v2909_v41, %v2851_v27  ;;  %v2911_v43 = vpop.f32.mrb[86].mxu0  ;;  %v2948_v45 = vpop.f32.mrb[84].mxu1 }
 0x64c   : > { %v2956_v46 = vadd.f32 %v2948_v45, %v2852_v20  ;;  %v2912_v47 = vpop.f32.mrb[87].mxu0  ;;  %v6975_v49 = vpop.f32.mrb[85].mxu1 }
 0x64d   : > { %v2951_v51 = vpop.f32.mrb[86].mxu1 }
 0x64e   : > { %v6976_v52 = vpop.f32.mrb[87].mxu1 }
 0x651   : > { %v3011_v53 = vpop.f32.mrb[88].mxu0 }
 0x652   : > { %v3058_v54 = vadd.f32 %v3011_v53, %v2954_v40  ;;  %v3013_v55 = vpop.f32.mrb[89].mxu0 }
 0x653   : > { %v3059_v56 = vadd.f32 %v3013_v55, %v2955_v42  ;;  %v3015_v57 = vpop.f32.mrb[90].mxu0  ;;  %v3052_v58 = vpop.f32.mrb[88].mxu1 }
 0x654   : > { %v3060_v59 = vadd.f32 %v3052_v58, %v2956_v46  ;;  %v3016_v60 = vpop.f32.mrb[91].mxu0  ;;  %v6981_v61 = vpop.f32.mrb[89].mxu1 }
 0x655   : > { %v3055_v63 = vpop.f32.mrb[90].mxu1 }
 0x656   : > { %v6982_v7 = vpop.f32.mrb[91].mxu1 }
 0x659   : > { %v3115_v8 = vpop.f32.mrb[92].mxu0 }
 0x65a   : > { %v3162_v9 = vadd.f32 %v3115_v8, %v3058_v54  ;;  %v3117_v11 = vpop.f32.mrb[93].mxu0 }
 0x65b   : > { %v3163_v12 = vadd.f32 %v3117_v11, %v3059_v56  ;;  %v3119_v14 = vpop.f32.mrb[94].mxu0  ;;  %v3156_v15 = vpop.f32.mrb[92].mxu1 }
 0x65c   : > { %v3164_v3 = vadd.f32 %v3156_v15, %v3060_v59  ;;  %v3120_v2 = vpop.f32.mrb[95].mxu0  ;;  %v6987_v22 = vpop.f32.mrb[93].mxu1 }
 0x65d   : > { %v3159_v16 = vpop.f32.mrb[94].mxu1 }
 0x65e   : > { %v6988_v19 = vpop.f32.mrb[95].mxu1 }
 0x661   : > { %v3219_v21 = vpop.f32.mrb[96].mxu0 }
 0x662   : > { %v3266_v23 = vadd.f32 %v3219_v21, %v3162_v9  ;;  %v3221_v24 = vpop.f32.mrb[97].mxu0 }
 0x663   : > { %v3267_v27 = vadd.f32 %v3221_v24, %v3163_v12  ;;  %v3223_v28 = vpop.f32.mrb[98].mxu0  ;;  %v3260_v30 = vpop.f32.mrb[96].mxu1 }
 0x664   : > { %v3268_v20 = vadd.f32 %v3260_v30, %v3164_v3  ;;  %v3224_v5 = vpop.f32.mrb[99].mxu0  ;;  %v6993_v36 = vpop.f32.mrb[97].mxu1 }
 0x665   : > { %v3263_v37 = vpop.f32.mrb[98].mxu1 }
 0x666   : > { %v6994_v38 = vpop.f32.mrb[99].mxu1 }
 0x669   : > { %v3323_v39 = vpop.f32.mrb[100].mxu0 }
 0x66a   : > { %v3370_v40 = vadd.f32 %v3323_v39, %v3266_v23  ;;  %v3325_v41 = vpop.f32.mrb[101].mxu0 }
 0x66b   : > { %v3371_v42 = vadd.f32 %v3325_v41, %v3267_v27  ;;  %v3327_v43 = vpop.f32.mrb[102].mxu0  ;;  %v3364_v45 = vpop.f32.mrb[100].mxu1 }
 0x66c   : > { %v3372_v46 = vadd.f32 %v3364_v45, %v3268_v20  ;;  %v3328_v47 = vpop.f32.mrb[103].mxu0  ;;  %v6999_v49 = vpop.f32.mrb[101].mxu1 }
 0x66d   : > { %v3367_v51 = vpop.f32.mrb[102].mxu1 }
 0x66e   : > { %v7000_v52 = vpop.f32.mrb[103].mxu1 }
 0x671   : > { %v3427_v53 = vpop.f32.mrb[104].mxu0 }
 0x672   : > { %v3474_v54 = vadd.f32 %v3427_v53, %v3370_v40  ;;  %v3429_v55 = vpop.f32.mrb[105].mxu0 }
 0x673   : > { %v3475_v56 = vadd.f32 %v3429_v55, %v3371_v42  ;;  %v3431_v57 = vpop.f32.mrb[106].mxu0  ;;  %v3468_v58 = vpop.f32.mrb[104].mxu1 }
 0x674   : > { %v3477_v59 = vadd.f32 %v3474_v54, %v7613_v13  ;;  %v3476_v60 = vadd.f32 %v3468_v58, %v3372_v46  ;;  %v3432_v61 = vpop.f32.mrb[107].mxu0  ;;  %v7005_v63 = vpop.f32.mrb[105].mxu1 }
 0x675   : > { %v3478_v7 = vadd.f32 %v3475_v56, %v7613_v13  ;;  %v3471_v8 = vpop.f32.mrb[106].mxu1  ;;  %v7235_v56 = vld [vmem:[%s8661_s4 + $0x2] sm:$0x3] }
 0x676   : > { %v3480_v9 = vmax.f32 %v3477_v59, 0.0  ;;  %v3479_v11 = vadd.f32 %v3476_v60, %v7613_v13  ;;  %v7006_v12 = vpop.f32.mrb[107].mxu1 }
 0x677   : > { %v3481_v14 = vmax.f32 %v3478_v7, 0.0 }
 0x678   : > { %v3483_v15 = vmul.f32 %v3480_v9, %v7618_v29  ;;  %v3482_v3 = vmax.f32 %v3479_v11, 0.0 }
 0x679   : > { %v3484_v2 = vmul.f32 %v3481_v14, %v7621_v32  ;;  %v7236_v14 = vld [vmem:[%s8661_s4] sm:$0x3] }
 0x67a   : > { %v3485_v22 = vmul.f32 %v3482_v3, %v7624_v6 }
 0x67b   : > { %v6733_v16 = vpack.c.bf16 %v3484_v2, %v3483_v15 }
 0x67c   : > { %v6734_v19 = vpack.c.bf16 %v3485_v22, %v3485_v22 }
 0x67d   : > { %3497 = vrot.lane.b32.xlu0 %v6733_v16, %s7271_s10 }
 0x67e   : > { %3499 = vrot.lane.b32.xlu1 %v6734_v19, %s7271_s10 }
 0x6ef   : > { %v3498_v21 = vpop.permute.xlu0 %3497 }
 0x6f0   : > { %v3501_v23 = vrot.slane %v3498_v21, 4  ;;  %v3500_v24 = vpop.permute.xlu1 %3499 }
 0x6f1   : > { %v3502_v27 = vrot.slane %v3500_v24, 4 }
 0x6f2   : > { %v3503_v28 = vsel %vm359_vm4, %v3501_v23, %v3498_v21 }
 0x6f3   : > { %3508 = vst.msk [vmem:[#allocation3] sm:$0xff] %vm7632_vm6, %v3503_v28  ;;  %v3504_v30 = vsel %vm8710_vm10, %v3501_v23, %v3502_v27  ;;  %vm8715_vm10 = vcmask 64512   ;;  %v7237_v27 = vld [vmem:[%s8661_s4 + $0x4] sm:$0x3] }
 0x6f4   : > { %v3505_v20 = vsel %vm359_vm4, %v3504_v30, %v3500_v24 }
 0x6f5   : > { %3509 = vst.msk [vmem:[#allocation3 + $0x8] sm:$0xff] %vm7640_vm8, %v3505_v20 }
 0x6fa   : > { %v3510_v5 = vld [vmem:[#allocation3] sm:$0xff] }
 0x6fb   : > { %v6639_v36 = vcombine.low %v3510_v5, %v3510_v5  ;;  %v6640_v37 = vcombine.high %v3510_v5, %v3510_v5 }
 0x6fc   : > { %v3512_v38 = vld [vmem:[#allocation3 + $0x8] sm:$0xff] }
 0x6fd   : > { %3523 = vrot.lane.b32.xlu0 %v6639_v36, %s7274_s11  ;;  %3525 = vrot.lane.b32.xlu1 %v6640_v37, %s7274_s11  ;;  %v6642_v39 = vcombine.high %v3512_v38, %v3512_v38  ;;  %v6641_v40 = vcombine.low %v3512_v38, %v3512_v38  ;;  %v7200_v53 = vld [vmem:[#allocation3 + $0x8] ss:$0 sps:$4 sm:$0xff]  }
 0x701   : > { %3529 = vrot.lane.b32.xlu1 %v6642_v39, %s7274_s11  ;;  %3527 = vrot.lane.b32.xlu0 %v6641_v40, %s7274_s11 }
 0x705   : > { %3719 = vrot.lane.b32.xlu1 %v6640_v37, %s7275_s12  ;;  %3717 = vrot.lane.b32.xlu0 %v6639_v36, %s7275_s12 }
 0x709   : > { %3723 = vrot.lane.b32.xlu1 %v6642_v39, %s7275_s12  ;;  %3721 = vrot.lane.b32.xlu0 %v6641_v40, %s7275_s12 }
 0x70d   : > { %3823 = vrot.lane.b32.xlu1 %v6640_v37, %s7276_s13  ;;  %3821 = vrot.lane.b32.xlu0 %v6639_v36, %s7276_s13 }
 0x711   : > { %3827 = vrot.lane.b32.xlu1 %v6642_v39, %s7276_s13  ;;  %3825 = vrot.lane.b32.xlu0 %v6641_v40, %s7276_s13 }
 0x715   : > { %3927 = vrot.lane.b32.xlu1 %v6640_v37, %s7277_s14  ;;  %3925 = vrot.lane.b32.xlu0 %v6639_v36, %s7277_s14 }
 0x719   : > { %3931 = vrot.lane.b32.xlu1 %v6642_v39, %s7277_s14  ;;  %3929 = vrot.lane.b32.xlu0 %v6641_v40, %s7277_s14 }
 0x71d   : > { %4031 = vrot.lane.b32.xlu1 %v6640_v37, %s7278_s15  ;;  %4029 = vrot.lane.b32.xlu0 %v6639_v36, %s7278_s15 }
 0x721   : > { %4035 = vrot.lane.b32.xlu1 %v6642_v39, %s7278_s15  ;;  %4033 = vrot.lane.b32.xlu0 %v6641_v40, %s7278_s15 }
 0x725   : > { %4135 = vrot.lane.b32.xlu1 %v6640_v37, %s7279_s16  ;;  %4133 = vrot.lane.b32.xlu0 %v6639_v36, %s7279_s16 }
 0x729   : > { %4139 = vrot.lane.b32.xlu1 %v6642_v39, %s7279_s16  ;;  %4137 = vrot.lane.b32.xlu0 %v6641_v40, %s7279_s16 }
 0x72d   : > { %4239 = vrot.lane.b32.xlu1 %v6640_v37, %s7280_s17  ;;  %4237 = vrot.lane.b32.xlu0 %v6639_v36, %s7280_s17 }
 0x731   : > { %4243 = vrot.lane.b32.xlu1 %v6642_v39, %s7280_s17  ;;  %4241 = vrot.lane.b32.xlu0 %v6641_v40, %s7280_s17 }
 0x735   : > { %4343 = vrot.lane.b32.xlu1 %v6640_v37, %s7281_s18  ;;  %4341 = vrot.lane.b32.xlu0 %v6639_v36, %s7281_s18 }
 0x739   : > { %4347 = vrot.lane.b32.xlu1 %v6642_v39, %s7281_s18  ;;  %4345 = vrot.lane.b32.xlu0 %v6641_v40, %s7281_s18 }
 0x76f   : > { %v3524_v41 = vpop.permute.xlu0 %3523  ;;  %v3526_v42 = vpop.permute.xlu1 %3525 }
 0x770   : > { %v3531_v43 = vsel %vm446_vm9, %v3524_v41, %v3526_v42  ;;  %v7238_v41 = vld [vmem:[%s8661_s4 + $0x6] sm:$0x3] }
 0x771   : > { %v3535_v52 = vsel %vm8713_vm3, %v3531_v43, 0  ;;  %vm8718_vm3 = vmmov %vm8714_vm2 }
 0x772   : > { %v3634_v58 = vsel %vm8718_vm3, %v7200_v53, 0 }
 0x773   : > { %v3528_v45 = vpop.permute.xlu0 %3527  ;;  %v3530_v46 = vpop.permute.xlu1 %3529 }
 0x774   : > { %v3533_v47 = vsel %vm446_vm9, %v3528_v45, %v3530_v46  ;;  %v3532_v49 = vsel %vm446_vm9, %v3526_v42, %v3528_v45 }
 0x775   : > { %v3541_v51 = vsel %vm8711_vm12, %v3533_v47, 0  ;;  %6643 = vmatprep.subr.msk.bf16.mxu0 %vm8712_vm5, %v3532_v49  ;;  %vm8716_vm12 = vmmov %vm8715_vm10 }
 0x776   : > { %3544 = vmatpush1.bf16.msra.mxu0 %v3535_v52  ;;  %7008 = vmatpush3.bf16.msra.mxu1 %v3541_v51  ;;  %vm8717_vm5 = vmmov %vm8714_vm2 }
 0x777   : > { %v3718_v54 = vpop.permute.xlu0 %3717  ;;  %6647 = vmatprep.subr.msk.bf16.mxu0 %vm8714_vm2, %v6640_v37  ;;  %v3720_v55 = vpop.permute.xlu1 %3719  ;;  %7013 = vmatprep.subr.bf16.mxu1 %v7270_v1  ;;  %v3628_v57 = vsel %vm8717_vm5, %v6639_v36, 0  ;;  %vm8721_vm5 = vcmask 64512  }
 0x778   : > { %v3725_v63 = vsel %vm649_vm11, %v3718_v54, %v3720_v55  ;;  %vm8722_vm3 = vmmov %vm8721_vm5  ;;  %v7239_v54 = vld [vmem:[%s8661_s4 + $0x8] sm:$0x3] }
 0x779   : > { %6644 = vmatmul.mubr.msk.bf16.vlgmr.msra.gmra.mrb[108].mxu0 %vm8715_vm10, %v7235_v56  ;;  %7010 = vmatmul.mubr.msk.bf16.vlgmr.msra.gmra.mrb[108].mxu1 %vm8716_vm12, %v7235_v56  ;;  %vm8719_vm10 = vmmov %vm8714_vm2 }
 0x77a   : > { %3637 = vmatpush1.bf16.msra.mxu0 %v3628_v57  ;;  %7014 = vmatpush3.bf16.msra.mxu1 %v3634_v58  ;;  %v3729_v11 = vsel %vm8719_vm10, %v3725_v63, 0  ;;  %vm8720_vm12 = vmmov %vm8714_vm2 }
 0x77b   : > { %v3722_v59 = vpop.permute.xlu0 %3721  ;;  %v3724_v60 = vpop.permute.xlu1 %3723  ;;  %3668 = vmatprep.mubr.bf16.mxu0 %v7272_v33  ;;  %7015 = vmatprep.mubr.msk.bf16.mxu1 %vm7273_vm7, %v7270_v1  ;;  %vm8723_vm10 = vmmov %vm8714_vm2 }
 0x77c   : > { %v3726_v61 = vsel %vm649_vm11, %v3720_v55, %v3722_v59  ;;  %7019 = vmatprep.subr.bf16.mxu1 %v7270_v1  ;;  %v3727_v7 = vsel %vm649_vm11, %v3722_v59, %v3724_v60 }
 0x77d   : > { %6650 = vmatprep.subr.msk.bf16.mxu0 %vm8714_vm2, %v3726_v61  ;;  %v3735_v12 = vsel %vm8720_vm12, %v3727_v7, 0  ;;  %vm8724_vm12 = vmmov %vm8714_vm2 }
 0x77f   : > { %v3822_v8 = vpop.permute.xlu0 %3821  ;;  %v3824_v9 = vpop.permute.xlu1 %3823 }
 0x780   : > { %v3829_v22 = vsel %vm757_vm13, %v3822_v8, %v3824_v9  ;;  %v7240_v8 = vld [vmem:[%s8661_s4 + $0xa] sm:$0x3] }
 0x781   : > { %6648 = vmatmul.mubr.msk.bf16.vlgmr.msra.gmra.mrb[112].mxu0 %vm8721_vm5, %v7236_v14  ;;  %7016 = vmatmul.mubr.msk.bf16.vlgmr.msra.gmra.mrb[112].mxu1 %vm8722_vm3, %v7236_v14  ;;  %v3833_v23 = vsel %vm8723_vm10, %v3829_v22, 0  ;;  %vm8725_vm5 = vmmov %vm8722_vm3 }
 0x782   : > { %3738 = vmatpush1.bf16.msra.mxu0 %v3729_v11  ;;  %7020 = vmatpush3.bf16.msra.mxu1 %v3735_v12  ;;  %vm8726_vm10 = vmmov %vm8714_vm2 }
 0x783   : > { %v3826_v15 = vpop.permute.xlu0 %3825  ;;  %v3828_v3 = vpop.permute.xlu1 %3827  ;;  %3769 = vmatprep.mubr.bf16.mxu0 %v7272_v33  ;;  %7021 = vmatprep.mubr.msk.bf16.mxu1 %vm7273_vm7, %v7270_v1 }
 0x784   : > { %v3830_v2 = vsel %vm757_vm13, %v3824_v9, %v3826_v15  ;;  %7025 = vmatprep.subr.bf16.mxu1 %v7270_v1  ;;  %v3831_v16 = vsel %vm757_vm13, %v3826_v15, %v3828_v3 }
 0x785   : > { %6653 = vmatprep.subr.msk.bf16.mxu0 %vm8714_vm2, %v3830_v2  ;;  %v3839_v24 = vsel %vm8724_vm12, %v3831_v16, 0  ;;  %vm8727_vm12 = vmmov %vm8714_vm2 }
 0x787   : > { %v3926_v19 = vpop.permute.xlu0 %3925  ;;  %v3928_v21 = vpop.permute.xlu1 %3927 }
 0x788   : > { %v3933_v5 = vsel %vm8675_vm14, %v3926_v19, %v3928_v21  ;;  %v7241_v19 = vld [vmem:[%s8661_s4 + $0xc] sm:$0x3] }
 0x789   : > { %6651 = vmatmul.mubr.msk.bf16.vlgmr.msra.gmra.mrb[116].mxu0 %vm8725_vm5, %v7237_v27  ;;  %7022 = vmatmul.mubr.msk.bf16.vlgmr.msra.gmra.mrb[116].mxu1 %vm8722_vm3, %v7237_v27  ;;  %v3937_v39 = vsel %vm8726_vm10, %v3933_v5, 0  ;;  %vm8728_vm5 = vmmov %vm8722_vm3  ;;  %v7242_v5 = vld [vmem:[%s8661_s4 + $0xe] sm:$0x3] }
 0x78a   : > { %3842 = vmatpush1.bf16.msra.mxu0 %v3833_v23  ;;  %7026 = vmatpush3.bf16.msra.mxu1 %v3839_v24  ;;  %vm8729_vm10 = vmmov %vm8714_vm2 }
 0x78b   : > { %v3930_v28 = vpop.permute.xlu0 %3929  ;;  %v3932_v30 = vpop.permute.xlu1 %3931  ;;  %3873 = vmatprep.mubr.bf16.mxu0 %v7272_v33  ;;  %7027 = vmatprep.mubr.msk.bf16.mxu1 %vm7273_vm7, %v7270_v1 }
 0x78c   : > { %v3934_v20 = vsel %vm8675_vm14, %v3928_v21, %v3930_v28  ;;  %7031 = vmatprep.subr.bf16.mxu1 %v7270_v1  ;;  %v3935_v36 = vsel %vm8675_vm14, %v3930_v28, %v3932_v30 }
 0x78d   : > { %6656 = vmatprep.subr.msk.bf16.mxu0 %vm8714_vm2, %v3934_v20  ;;  %v3943_v40 = vsel %vm8727_vm12, %v3935_v36, 0  ;;  %vm8730_vm12 = vmmov %vm8714_vm2  ;;  %v7243_v36 = vld [vmem:[%s8661_s4 + $0x10] sm:$0x3] }
 0x78f   : > { %v4030_v37 = vpop.permute.xlu0 %4029  ;;  %v4032_v38 = vpop.permute.xlu1 %4031 }
 0x790   : > { %v4037_v46 = vsel %vm8674_vm15, %v4030_v37, %v4032_v38 }
 0x791   : > { %6654 = vmatmul.mubr.msk.bf16.vlgmr.msra.gmra.mrb[120].mxu0 %vm8728_vm5, %v7238_v41  ;;  %7028 = vmatmul.mubr.msk.bf16.vlgmr.msra.gmra.mrb[120].mxu1 %vm8722_vm3, %v7238_v41  ;;  %v4041_v52 = vsel %vm8729_vm10, %v4037_v46, 0  ;;  %vm8731_vm5 = vmmov %vm8722_vm3 }
 0x792   : > { %3946 = vmatpush1.bf16.msra.mxu0 %v3937_v39  ;;  %7032 = vmatpush3.bf16.msra.mxu1 %v3943_v40  ;;  %vm8732_vm10 = vmmov %vm8714_vm2 }
 0x793   : > { %v4034_v42 = vpop.permute.xlu0 %4033  ;;  %v4036_v43 = vpop.permute.xlu1 %4035  ;;  %3977 = vmatprep.mubr.bf16.mxu0 %v7272_v33  ;;  %7033 = vmatprep.mubr.msk.bf16.mxu1 %vm7273_vm7, %v7270_v1 }
 0x794   : > { %v4038_v45 = vsel %vm8674_vm15, %v4032_v38, %v4034_v42  ;;  %7037 = vmatprep.subr.bf16.mxu1 %v7270_v1  ;;  %v4039_v47 = vsel %vm8674_vm15, %v4034_v42, %v4036_v43  ;;  %vm8740_vm15 = vcmask 64512  }
 0x795   : > { %6659 = vmatprep.subr.msk.bf16.mxu0 %vm8714_vm2, %v4038_v45  ;;  %v4047_v53 = vsel %vm8730_vm12, %v4039_v47, 0  ;;  %vm8733_vm12 = vmmov %vm8714_vm2 }
 0x797   : > { %v4134_v49 = vpop.permute.xlu0 %4133  ;;  %v4136_v51 = vpop.permute.xlu1 %4135 }
 0x798   : > { %v4141_v58 = vsel %vm8673_vm0, %v4134_v49, %v4136_v51 }
 0x799   : > { %6657 = vmatmul.mubr.msk.bf16.vlgmr.msra.gmra.mrb[124].mxu0 %vm8731_vm5, %v7239_v54  ;;  %7034 = vmatmul.mubr.msk.bf16.vlgmr.msra.gmra.mrb[124].mxu1 %vm8722_vm3, %v7239_v54  ;;  %v4145_v63 = vsel %vm8732_vm10, %v4141_v58, 0  ;;  %vm8734_vm5 = vmmov %vm8722_vm3 }
 0x79a   : > { %4050 = vmatpush1.bf16.msra.mxu0 %v4041_v52  ;;  %7038 = vmatpush3.bf16.msra.mxu1 %v4047_v53 }
 0x79b   : > { %v4138_v55 = vpop.permute.xlu0 %4137  ;;  %v4140_v56 = vpop.permute.xlu1 %4139  ;;  %4081 = vmatprep.mubr.bf16.mxu0 %v7272_v33  ;;  %7039 = vmatprep.mubr.msk.bf16.mxu1 %vm7273_vm7, %v7270_v1 }
 0x79c   : > { %v4142_v57 = vsel %vm8673_vm0, %v4136_v51, %v4138_v55  ;;  %7043 = vmatprep.subr.bf16.mxu1 %v7270_v1  ;;  %v4143_v59 = vsel %vm8673_vm0, %v4138_v55, %v4140_v56 }
 0x79d   : > { %6662 = vmatprep.subr.msk.bf16.mxu0 %vm8714_vm2, %v4142_v57  ;;  %v4151_v7 = vsel %vm8733_vm12, %v4143_v59, 0  ;;  %vm8735_vm2 = vcmask 744448  }
 0x79e   : > { %vm8736_vm12 = vmmov %vm8735_vm2 }
 0x79f   : > { %v4238_v60 = vpop.permute.xlu0 %4237  ;;  %v4240_v61 = vpop.permute.xlu1 %4239 }
 0x7a0   : > { %v4245_v14 = vsel %vm8736_vm12, %v4238_v60, %v4240_v61 }
 0x7a1   : > { %6660 = vmatmul.mubr.msk.bf16.vlgmr.msra.gmra.mrb[128].mxu0 %vm8734_vm5, %v7240_v8  ;;  %7040 = vmatmul.mubr.msk.bf16.vlgmr.msra.gmra.mrb[128].mxu1 %vm8722_vm3, %v7240_v8  ;;  %vm8737_vm5 = vmmov %vm8735_vm2 }
 0x7a2   : > { %4154 = vmatpush1.bf16.msra.mxu0 %v4145_v63  ;;  %7044 = vmatpush3.bf16.msra.mxu1 %v4151_v7  ;;  %vm8738_vm3 = vmmov %vm8732_vm10 }
 0x7a3   : > { %v4242_v9 = vpop.permute.xlu0 %4241  ;;  %v4244_v11 = vpop.permute.xlu1 %4243  ;;  %4185 = vmatprep.mubr.bf16.mxu0 %v7272_v33  ;;  %7045 = vmatprep.mubr.msk.bf16.mxu1 %vm7273_vm7, %v7270_v1  ;;  %v4249_v22 = vsel %vm8738_vm3, %v4245_v14, 0  ;;  %vm8739_vm0 = vmmov %vm8738_vm3 }
 0x7a4   : > { %v4246_v12 = vsel %vm8735_vm2, %v4240_v61, %v4242_v9  ;;  %7049 = vmatprep.subr.bf16.mxu1 %v7270_v1  ;;  %v4247_v15 = vsel %vm8737_vm5, %v4242_v9, %v4244_v11  ;;  %vm8741_vm2 = vmmov %vm8740_vm15 }
 0x7a5   : > { %6665 = vmatprep.subr.msk.bf16.mxu0 %vm8732_vm10, %v4246_v12  ;;  %v4255_v16 = vsel %vm8739_vm0, %v4247_v15, 0  ;;  %vm8742_vm10 = vcmask 736256   ;;  %vm8745_vm5 = vmmov %vm8739_vm0 }
 0x7a6   : > { %vm8743_vm12 = vmmov %vm8742_vm10 }
 0x7a7   : > { %v4342_v3 = vpop.permute.xlu0 %4341  ;;  %v4344_v2 = vpop.permute.xlu1 %4343  ;;  %vm8746_vm3 = vmmov %vm8739_vm0 }
 0x7a8   : > { %v4349_v27 = vsel %vm8743_vm12, %v4342_v3, %v4344_v2  ;;  %vm8747_vm14 = vmmov %vm8741_vm2  ;;  %vm8751_vm12 = vcmask 149504  }
 0x7a9   : > { %6663 = vmatmul.mubr.msk.bf16.vlgmr.msra.gmra.mrb[132].mxu0 %vm8740_vm15, %v7241_v19  ;;  %7046 = vmatmul.mubr.msk.bf16.vlgmr.msra.gmra.mrb[132].mxu1 %vm8741_vm2, %v7241_v19  ;;  %vm8744_vm15 = vmmov %vm8742_vm10  ;;  %v4353_v30 = vsel %vm8745_vm5, %v4349_v27, 0 }
 0x7aa   : > { %4258 = vmatpush1.bf16.msra.mxu0 %v4249_v22  ;;  %7050 = vmatpush3.bf16.msra.mxu1 %v4255_v16 }
 0x7ab   : > { %v4346_v21 = vpop.permute.xlu0 %4345  ;;  %v4348_v23 = vpop.permute.xlu1 %4347  ;;  %4289 = vmatprep.mubr.bf16.mxu0 %v7272_v33  ;;  %7051 = vmatprep.mubr.msk.bf16.mxu1 %vm7273_vm7, %v7270_v1 }
 0x7ac   : > { %v4350_v24 = vsel %vm8742_vm10, %v4344_v2, %v4346_v21  ;;  %7055 = vmatprep.subr.bf16.mxu1 %v7270_v1  ;;  %v4351_v28 = vsel %vm8744_vm15, %v4346_v21, %v4348_v23  ;;  %vm8748_vm10 = vmmov %vm8741_vm2  ;;  %vm8752_vm15 = vcmask 39936  }
 0x7ad   : > { %6668 = vmatprep.subr.msk.bf16.mxu0 %vm8739_vm0, %v4350_v24  ;;  %v4359_v20 = vsel %vm8746_vm3, %v4351_v28, 0  ;;  %vm8749_vm0 = vmmov %vm8741_vm2 }
 0x7ae   : > { %vm8753_vm5 = vmmov %vm8752_vm15 }
 0x7af   : > { %vm8754_vm3 = vmmov %vm8753_vm5 }
 0x7b1   : > { %6666 = vmatmul.mubr.msk.bf16.vlgmr.msra.gmra.mrb[136].mxu0 %vm8741_vm2, %v7242_v5  ;;  %7052 = vmatmul.mubr.msk.bf16.vlgmr.msra.gmra.mrb[136].mxu1 %vm8747_vm14, %v7242_v5  ;;  %vm8750_vm14 = vcmask 1042584   ;;  %vm8755_vm2 = vmmov %vm8754_vm3 }
 0x7b2   : > { %4362 = vmatpush1.bf16.msra.mxu0 %v4353_v30  ;;  %7056 = vmatpush3.bf16.msra.mxu1 %v4359_v20 }
 0x7b3   : > { %4393 = vmatprep.mubr.bf16.mxu0 %v7272_v33  ;;  %7057 = vmatprep.mubr.msk.bf16.mxu1 %vm7273_vm7, %v7270_v1 }
 0x7b4   : > { %7061 = vmatprep.subr.bf16.mxu1 %v7270_v1 }
 0x7b9   : > { %6669 = vmatmul.mubr.msk.bf16.vlgmr.msra.gmra.mrb[140].mxu0 %vm8748_vm10, %v7243_v36  ;;  %7058 = vmatmul.mubr.msk.bf16.vlgmr.msra.gmra.mrb[140].mxu1 %vm8749_vm0, %v7243_v36  ;;  %vm8756_vm10 = vcmask 891904   ;;  %vm8757_vm0 = vmmov %vm8755_vm2 }
 0x7ba   : > { %4574 = vmatprep.mubr.bf16.mxu0 %v7272_v33  ;;  %7063 = vmatprep.mubr.msk.bf16.mxu1 %vm7273_vm7, %v7270_v1 }
 0x84c   : > { %v3577_v37 = vpop.f32.mrb[108].mxu0  ;;  %v3618_v38 = vpop.f32.mrb[108].mxu1 }
 0x84d   : > { %v3579_v39 = vpop.f32.mrb[109].mxu0  ;;  %v7011_v40 = vpop.f32.mrb[109].mxu1 }
 0x84e   : > { %v3581_v41 = vpop.f32.mrb[110].mxu0  ;;  %v3621_v42 = vpop.f32.mrb[110].mxu1 }
 0x84f   : > { %v3582_v43 = vpop.f32.mrb[111].mxu0  ;;  %v7012_v45 = vpop.f32.mrb[111].mxu1 }
 0x854   : > { %v3670_v46 = vpop.f32.mrb[112].mxu0  ;;  %v3711_v47 = vpop.f32.mrb[112].mxu1 }
 0x855   : > { %v3671_v49 = vadd.f32 %v3670_v46, %v3577_v37  ;;  %v3712_v51 = vadd.f32 %v3711_v47, %v3618_v38  ;;  %v3672_v52 = vpop.f32.mrb[113].mxu0  ;;  %v7017_v53 = vpop.f32.mrb[113].mxu1 }
 0x856   : > { %v3673_v54 = vadd.f32 %v3672_v52, %v3579_v39  ;;  %v3674_v55 = vpop.f32.mrb[114].mxu0  ;;  %v3714_v56 = vpop.f32.mrb[114].mxu1 }
 0x857   : > { %v3675_v57 = vpop.f32.mrb[115].mxu0  ;;  %v7018_v58 = vpop.f32.mrb[115].mxu1 }
 0x85c   : > { %v3771_v59 = vpop.f32.mrb[116].mxu0  ;;  %v3812_v60 = vpop.f32.mrb[116].mxu1 }
 0x85d   : > { %v3818_v61 = vadd.f32 %v3771_v59, %v3671_v49  ;;  %v3820_v63 = vadd.f32 %v3812_v60, %v3712_v51  ;;  %v3773_v7 = vpop.f32.mrb[117].mxu0  ;;  %v7023_v8 = vpop.f32.mrb[117].mxu1 }
 0x85e   : > { %v3819_v9 = vadd.f32 %v3773_v7, %v3673_v54  ;;  %v3775_v11 = vpop.f32.mrb[118].mxu0  ;;  %v3815_v12 = vpop.f32.mrb[118].mxu1 }
 0x85f   : > { %v3776_v14 = vpop.f32.mrb[119].mxu0  ;;  %v7024_v15 = vpop.f32.mrb[119].mxu1 }
 0x864   : > { %v3875_v3 = vpop.f32.mrb[120].mxu0  ;;  %v3916_v2 = vpop.f32.mrb[120].mxu1 }
 0x865   : > { %v3922_v22 = vadd.f32 %v3875_v3, %v3818_v61  ;;  %v3924_v16 = vadd.f32 %v3916_v2, %v3820_v63  ;;  %v3877_v19 = vpop.f32.mrb[121].mxu0  ;;  %v7029_v21 = vpop.f32.mrb[121].mxu1 }
 0x866   : > { %v3923_v23 = vadd.f32 %v3877_v19, %v3819_v9  ;;  %v3879_v24 = vpop.f32.mrb[122].mxu0  ;;  %v3919_v27 = vpop.f32.mrb[122].mxu1 }
 0x867   : > { %v3880_v28 = vpop.f32.mrb[123].mxu0  ;;  %v7030_v30 = vpop.f32.mrb[123].mxu1 }
 0x86c   : > { %v3979_v20 = vpop.f32.mrb[124].mxu0  ;;  %v4020_v5 = vpop.f32.mrb[124].mxu1 }
 0x86d   : > { %v4026_v36 = vadd.f32 %v3979_v20, %v3922_v22  ;;  %v4028_v37 = vadd.f32 %v4020_v5, %v3924_v16  ;;  %v3981_v38 = vpop.f32.mrb[125].mxu0  ;;  %v7035_v39 = vpop.f32.mrb[125].mxu1 }
 0x86e   : > { %v4027_v40 = vadd.f32 %v3981_v38, %v3923_v23  ;;  %v3983_v41 = vpop.f32.mrb[126].mxu0  ;;  %v4023_v42 = vpop.f32.mrb[126].mxu1 }
 0x86f   : > { %v3984_v43 = vpop.f32.mrb[127].mxu0  ;;  %v7036_v45 = vpop.f32.mrb[127].mxu1 }
 0x874   : > { %v4083_v46 = vpop.f32.mrb[128].mxu0  ;;  %v4124_v47 = vpop.f32.mrb[128].mxu1 }
 0x875   : > { %v4130_v49 = vadd.f32 %v4083_v46, %v4026_v36  ;;  %v4132_v51 = vadd.f32 %v4124_v47, %v4028_v37  ;;  %v4085_v52 = vpop.f32.mrb[129].mxu0  ;;  %v7041_v53 = vpop.f32.mrb[129].mxu1 }
 0x876   : > { %v4131_v54 = vadd.f32 %v4085_v52, %v4027_v40  ;;  %v4087_v55 = vpop.f32.mrb[130].mxu0  ;;  %v4127_v56 = vpop.f32.mrb[130].mxu1 }
 0x877   : > { %v4088_v57 = vpop.f32.mrb[131].mxu0  ;;  %v7042_v58 = vpop.f32.mrb[131].mxu1  ;;  %v4479_v55 = vmul.f32 %v7887_v35, %v7378_v17 }
 0x87c   : > { %v4187_v59 = vpop.f32.mrb[132].mxu0  ;;  %v4228_v60 = vpop.f32.mrb[132].mxu1 }
 0x87d   : > { %v4234_v61 = vadd.f32 %v4187_v59, %v4130_v49  ;;  %v4236_v63 = vadd.f32 %v4228_v60, %v4132_v51  ;;  %v4189_v7 = vpop.f32.mrb[133].mxu0  ;;  %v7047_v8 = vpop.f32.mrb[133].mxu1 }
 0x87e   : > { %v4235_v9 = vadd.f32 %v4189_v7, %v4131_v54  ;;  %v4191_v11 = vpop.f32.mrb[134].mxu0  ;;  %v4231_v12 = vpop.f32.mrb[134].mxu1 }
 0x87f   : > { %v4192_v14 = vpop.f32.mrb[135].mxu0  ;;  %v7048_v15 = vpop.f32.mrb[135].mxu1 }
 0x884   : > { %v4291_v3 = vpop.f32.mrb[136].mxu0  ;;  %v4332_v2 = vpop.f32.mrb[136].mxu1 }
 0x885   : > { %v4338_v22 = vadd.f32 %v4291_v3, %v4234_v61  ;;  %v4340_v16 = vadd.f32 %v4332_v2, %v4236_v63  ;;  %v4293_v19 = vpop.f32.mrb[137].mxu0  ;;  %v7053_v21 = vpop.f32.mrb[137].mxu1  ;;  %v4478_v63 = vmul.f32 %v7878_v31, %v7380_v18 }
 0x886   : > { %v4339_v23 = vadd.f32 %v4293_v19, %v4235_v9  ;;  %v4295_v24 = vpop.f32.mrb[138].mxu0  ;;  %v4335_v27 = vpop.f32.mrb[138].mxu1  ;;  %v6672_v9 = vld [vmem:[%s7859_s20 + $0x6] sm:$0x3f] }
 0x887   : > { %v4296_v28 = vpop.f32.mrb[139].mxu0  ;;  %v7054_v30 = vpop.f32.mrb[139].mxu1 }
 0x88c   : > { %v4395_v20 = vpop.f32.mrb[140].mxu0  ;;  %v4436_v5 = vpop.f32.mrb[140].mxu1 }
 0x88d   : > { %v4442_v36 = vadd.f32 %v4395_v20, %v4338_v22  ;;  %v4444_v37 = vadd.f32 %v4436_v5, %v4340_v16  ;;  %v4397_v38 = vpop.f32.mrb[141].mxu0  ;;  %v7059_v39 = vpop.f32.mrb[141].mxu1 }
 0x88e   : > { %v4443_v40 = vadd.f32 %v4397_v38, %v4339_v23  ;;  %v4399_v41 = vpop.f32.mrb[142].mxu0  ;;  %v4439_v42 = vpop.f32.mrb[142].mxu1 }
 0x88f   : > { %v4445_v43 = vadd.f32 %v4442_v36, %v7815_v34  ;;  %v4447_v45 = vadd.f32 %v4444_v37, %v7815_v34  ;;  %v4400_v46 = vpop.f32.mrb[143].mxu0  ;;  %v7060_v47 = vpop.f32.mrb[143].mxu1 }
 0x890   : > { %v4446_v49 = vadd.f32 %v4443_v40, %v7815_v34 }
 0x891   : > { %7212 = vtanh.f32 %v4445_v43 }
 0x892   : > { %7214 = vtanh.f32 %v4447_v45 }
 0x893   : > { %7216 = vtanh.f32 %v4446_v49 }
 0x89b   : > { %v7213_v51 = vpop.eup %7212 }
 0x89c   : > { %v7215_v52 = vpop.eup %7214  ;;  %v4480_v53 = vmul.f32 %v7213_v51, %v7827_v62 }
 0x89d   : > { %v7217_v54 = vpop.eup %7216  ;;  %v4453_v56 = vpack.c.bf16 %v7215_v52, %v7215_v52  ;;  %v4482_v57 = vmul.f32 %v7215_v52, %v7835_v0 }
 0x89e   : > { %v6671_v58 = vpack.c.bf16 %v7217_v54, %v7213_v51  ;;  %v4481_v59 = vmul.f32 %v7217_v54, %v7843_v4  ;;  %v7244_v54 = vld [vmem:[%s8659_s2 + $0x4] sm:$0xf] }
 0x89f   : > { %v4471_v60 = vrot.slane %v4453_v56, %v7848_v10  ;;  %v4488_v61 = vadd.f32 %v4482_v57, %v4479_v55 }
 0x8a0   : > { %v4464_v7 = vrot.slane %v6671_v58, %v7848_v10  ;;  %v4485_v8 = vcombine.low %v4480_v53, %v4481_v59 }
 0x8a1   : > { %v8274_v31 = vmul.f32 %v4488_v61, %v7624_v6 }
 0x8a2   : > { %v4472_v11 = vcombine.low %v4464_v7, %v4471_v60  ;;  %v4487_v12 = vadd.f32 %v4485_v8, %v4478_v63 }
 0x8a4   : > { %v4476_v35 = vsel %vm7870_vm1, %v4472_v11, %v6672_v9  ;;  %v8265_v14 = vmul.f32 %v4487_v12, %v7868_v25  ;;  %v7245_v9 = vld [vmem:[%s8659_s2] sm:$0xf] }
 0x8a5   : > { %6673 = vst [vmem:[%s7859_s20 + $0x6] sm:$0x3f] %v4476_v35 }
 0x8a6   : > { %4494 = vrot.lane.b32.xlu0 %v8265_v14, %s7271_s10  ;;  %v4493_v15 = vcombine.high %v8265_v14, %v8265_v14 }
 0x8a8   : > { %4496 = vrot.lane.b32.xlu1 %v4493_v15, %s7271_s10 }
 0x8aa   : > { %4498 = vrot.lane.b32.xlu0 %v8274_v31, %s7271_s10 }
 0x918   : > { %v4495_v3 = vpop.permute.xlu0 %4494 }
 0x919   : > { %4506 = vst.msk [vmem:[#allocation2] sm:$0x7] %vm8750_vm14, %v4495_v3  ;;  %vm8758_vm14 = vmmov %vm8757_vm0 }
 0x91a   : > { %v4497_v2 = vpop.permute.xlu1 %4496 }
 0x91b   : > { %v4500_v22 = vsel %vm359_vm4, %v4495_v3, %v4497_v2 }
 0x91c   : > { %4507 = vst [vmem:[#allocation2 + $0x8] sm:$0x7] %v4500_v22  ;;  %v4499_v16 = vpop.permute.xlu0 %4498 }
 0x91d   : > { %v4501_v19 = vsel %vm359_vm4, %v4497_v2, %v4499_v16  ;;  %4509 = vst.msk [vmem:[#allocation2 + $0x18] sm:$0x7] %vm8751_vm12, %v4499_v16  ;;  %vm8759_vm12 = vmmov %vm8756_vm10 }
 0x91e   : > { %4508 = vst [vmem:[#allocation2 + $0x10] sm:$0x7] %v4501_v19 }
 0x920   : > { %v4510_v24 = vld [vmem:[#allocation2] sm:$0x1f] }
 0x921   : > { %v4513_v20 = vpack.c.bf16 %v4510_v24, %v4510_v24 }
 0x923   : > { %v4511_v21 = vld [vmem:[#allocation2 + $0x8] sm:$0x1f]  ;;  %v4624_v52 = vand.u32 %v4513_v20, %v7473_v48 }
 0x924   : > { %v4514_v23 = vpack.c.bf16 %v4511_v21, %v4511_v21  ;;  %v4516_v30 = vld [vmem:[#allocation2 + $0x18] sm:$0x1f] }
 0x925   : > { %v4512_v27 = vld [vmem:[#allocation2 + $0x10] sm:$0x1f]  ;;  %v4517_v5 = vpack.c.bf16 %v4516_v30, %v4516_v30 }
 0x926   : > { %v8282_v28 = vpack.c.bf16 %v4512_v27, %v4512_v27  ;;  %4524 = vrot.lane.b32.xlu1 %v4514_v23, %s7274_s11  ;;  %v4627_v46 = vand.u32 %v4514_v23, %v7473_v48 }
 0x928   : > { %4526 = vrot.lane.b32.xlu0 %v8282_v28, %s7274_s11  ;;  %v4630_v57 = vand.u32 %v8282_v28, %v7473_v48 }
 0x92a   : > { %4522 = vrot.lane.b32.xlu1 %v4513_v20, %s7274_s11 }
 0x92c   : > { %4528 = vrot.lane.b32.xlu0 %v4517_v5, %s7274_s11 }
 0x92e   : > { %4715 = vrot.lane.b32.xlu1 %v4514_v23, %s7275_s12 }
 0x930   : > { %4717 = vrot.lane.b32.xlu0 %v8282_v28, %s7275_s12 }
 0x932   : > { %4713 = vrot.lane.b32.xlu1 %v4513_v20, %s7275_s12 }
 0x934   : > { %4719 = vrot.lane.b32.xlu0 %v4517_v5, %s7275_s12 }
 0x936   : > { %4819 = vrot.lane.b32.xlu1 %v4514_v23, %s7276_s13 }
 0x938   : > { %4821 = vrot.lane.b32.xlu0 %v8282_v28, %s7276_s13 }
 0x93a   : > { %4817 = vrot.lane.b32.xlu1 %v4513_v20, %s7276_s13 }
 0x93c   : > { %4823 = vrot.lane.b32.xlu0 %v4517_v5, %s7276_s13 }
 0x93e   : > { %4923 = vrot.lane.b32.xlu1 %v4514_v23, %s7277_s14 }
 0x940   : > { %4925 = vrot.lane.b32.xlu0 %v8282_v28, %s7277_s14 }
 0x942   : > { %4921 = vrot.lane.b32.xlu1 %v4513_v20, %s7277_s14 }
 0x944   : > { %4927 = vrot.lane.b32.xlu0 %v4517_v5, %s7277_s14 }
 0x946   : > { %5027 = vrot.lane.b32.xlu1 %v4514_v23, %s7278_s15 }
 0x948   : > { %5029 = vrot.lane.b32.xlu0 %v8282_v28, %s7278_s15 }
 0x94a   : > { %5025 = vrot.lane.b32.xlu1 %v4513_v20, %s7278_s15 }
 0x94c   : > { %5031 = vrot.lane.b32.xlu0 %v4517_v5, %s7278_s15 }
 0x94e   : > { %5131 = vrot.lane.b32.xlu1 %v4514_v23, %s7279_s16 }
 0x950   : > { %5133 = vrot.lane.b32.xlu0 %v8282_v28, %s7279_s16 }
 0x952   : > { %5129 = vrot.lane.b32.xlu1 %v4513_v20, %s7279_s16 }
 0x954   : > { %5135 = vrot.lane.b32.xlu0 %v4517_v5, %s7279_s16 }
 0x956   : > { %5235 = vrot.lane.b32.xlu1 %v4514_v23, %s7280_s17 }
 0x958   : > { %5237 = vrot.lane.b32.xlu0 %v8282_v28, %s7280_s17 }
 0x95a   : > { %5233 = vrot.lane.b32.xlu1 %v4513_v20, %s7280_s17 }
 0x95c   : > { %5239 = vrot.lane.b32.xlu0 %v4517_v5, %s7280_s17 }
 0x95e   : > { %5339 = vrot.lane.b32.xlu1 %v4514_v23, %s7281_s18  ;;  %v7246_v23 = vld [vmem:[%s8659_s2 + $0x8] sm:$0xf] }
 0x960   : > { %5341 = vrot.lane.b32.xlu0 %v8282_v28, %s7281_s18 }
 0x962   : > { %5337 = vrot.lane.b32.xlu1 %v4513_v20, %s7281_s18 }
 0x964   : > { %5343 = vrot.lane.b32.xlu0 %v4517_v5, %s7281_s18 }
 0x998   : > { %v4525_v36 = vpop.permute.xlu1 %4524 }
 0x99a   : > { %v4527_v37 = vpop.permute.xlu0 %4526 }
 0x99b   : > { %v4531_v38 = vsel %vm446_vm9, %v4525_v36, %v4527_v37 }
 0x99c   : > { %v4537_v39 = vand.u32 %v4531_v38, %v7473_v48  ;;  %v4523_v40 = vpop.permute.xlu1 %4522 }
 0x99d   : > { %v4530_v41 = vsel %vm446_vm9, %v4523_v40, %v4525_v36  ;;  %v7247_v40 = vld [vmem:[%s8659_s2 + $0xc] sm:$0xf] }
 0x99e   : > { %v4534_v42 = vand.u32 %v4530_v41, %v7473_v48  ;;  %4542 = vmatprep.subr.bf16.mxu0 %v4537_v39  ;;  %v4529_v43 = vpop.permute.xlu0 %4528 }
 0x99f   : > { %v4532_v45 = vsel %vm446_vm9, %v4527_v37, %v4529_v43 }
 0x9a0   : > { %v4540_v47 = vand.u32 %v4532_v45, %v7473_v48  ;;  %v4716_v49 = vpop.permute.xlu1 %4715  ;;  %4543 = vmatpush1.bf16.msra.mxu0 %v4534_v42 }
 0x9a1   : > { %4632 = vmatprep.subr.bf16.mxu0 %v4627_v46 }
 0x9a2   : > { %7062 = vmatpush3.bf16.msra.mxu1 %v4540_v47  ;;  %v4718_v51 = vpop.permute.xlu0 %4717 }
 0x9a3   : > { %v4722_v53 = vsel %vm649_vm11, %v4716_v49, %v4718_v51  ;;  %6674 = vmatmul.mubr.msk.bf16.vlgmr.msra.gmra.mrb[144].mxu0 %vm8752_vm15, %v7244_v54  ;;  %7067 = vmatprep.subr.bf16.mxu1 %v7270_v1  ;;  %vm8760_vm15 = vmmov %vm8756_vm10 }
 0x9a4   : > { %v4728_v55 = vand.u32 %v4722_v53, %v7473_v48  ;;  %v4714_v56 = vpop.permute.xlu1 %4713  ;;  %4633 = vmatpush1.bf16.msra.mxu0 %v4624_v52  ;;  %4664 = vmatprep.mubr.bf16.mxu0 %v7272_v33 }
 0x9a5   : > { %7064 = vmatmul.mubr.msk.bf16.vlgmr.msra.gmra.mrb[144].mxu1 %vm8753_vm5, %v7244_v54  ;;  %v4721_v59 = vsel %vm649_vm11, %v4714_v56, %v4716_v49  ;;  %vm8761_vm5 = vcmask 883712   ;;  %v7248_v54 = vld [vmem:[%s8659_s2 + $0x10] sm:$0xf] }
 0x9a6   : > { %4733 = vmatprep.subr.bf16.mxu0 %v4728_v55  ;;  %v4720_v58 = vpop.permute.xlu0 %4719  ;;  %7068 = vmatpush3.bf16.msra.mxu1 %v4630_v57  ;;  %v4725_v63 = vand.u32 %v4721_v59, %v7473_v48 }
 0x9a7   : > { %7069 = vmatprep.mubr.msk.bf16.mxu1 %vm7273_vm7, %v7270_v1  ;;  %7073 = vmatprep.subr.bf16.mxu1 %v7270_v1  ;;  %v4723_v61 = vsel %vm649_vm11, %v4718_v51, %v4720_v58 }
 0x9a8   : > { %v4820_v60 = vpop.permute.xlu1 %4819  ;;  %v4731_v11 = vand.u32 %v4723_v61, %v7473_v48 }
 0x9aa   : > { %v4822_v7 = vpop.permute.xlu0 %4821 }
 0x9ab   : > { %v4826_v8 = vsel %vm757_vm13, %v4820_v60, %v4822_v7  ;;  %6676 = vmatmul.mubr.msk.bf16.vlgmr.msra.gmra.mrb[148].mxu0 %vm8754_vm3, %v7245_v9  ;;  %vm8762_vm3 = vmmov %vm8757_vm0 }
 0x9ac   : > { %v4832_v12 = vand.u32 %v4826_v8, %v7473_v48  ;;  %4734 = vmatpush1.bf16.msra.mxu0 %v4725_v63  ;;  %v4818_v35 = vpop.permute.xlu1 %4817  ;;  %4765 = vmatprep.mubr.bf16.mxu0 %v7272_v33 }
 0x9ad   : > { %7070 = vmatmul.mubr.msk.bf16.vlgmr.msra.gmra.mrb[148].mxu1 %vm8755_vm2, %v7245_v9  ;;  %v4825_v3 = vsel %vm757_vm13, %v4818_v35, %v4820_v60  ;;  %vm8763_vm2 = vmmov %vm8757_vm0  ;;  %v7249_v9 = vld [vmem:[%s8659_s2 + $0x14] sm:$0xf] }
 0x9ae   : > { %7074 = vmatpush3.bf16.msra.mxu1 %v4731_v11  ;;  %4837 = vmatprep.subr.bf16.mxu0 %v4832_v12  ;;  %v4824_v15 = vpop.permute.xlu0 %4823  ;;  %v4829_v16 = vand.u32 %v4825_v3, %v7473_v48 }
 0x9af   : > { %7075 = vmatprep.mubr.msk.bf16.mxu1 %vm7273_vm7, %v7270_v1  ;;  %7079 = vmatprep.subr.bf16.mxu1 %v7270_v1  ;;  %v4827_v22 = vsel %vm757_vm13, %v4822_v7, %v4824_v15 }
 0x9b0   : > { %v4924_v2 = vpop.permute.xlu1 %4923  ;;  %v4835_v24 = vand.u32 %v4827_v22, %v7473_v48 }
 0x9b2   : > { %v4926_v19 = vpop.permute.xlu0 %4925 }
 0x9b3   : > { %v4930_v21 = vsel %vm8756_vm10, %v4924_v2, %v4926_v19  ;;  %6678 = vmatmul.mubr.msk.bf16.vlgmr.msra.gmra.mrb[152].mxu0 %vm8757_vm0, %v7246_v23  ;;  %vm8764_vm10 = vmmov %vm8761_vm5 }
 0x9b4   : > { %v4936_v27 = vand.u32 %v4930_v21, %v7473_v48  ;;  %4838 = vmatpush1.bf16.msra.mxu0 %v4829_v16  ;;  %v4922_v28 = vpop.permute.xlu1 %4921  ;;  %4869 = vmatprep.mubr.bf16.mxu0 %v7272_v33  ;;  %vm8765_vm0 = vmmov %vm8761_vm5 }
 0x9b5   : > { %7076 = vmatmul.mubr.msk.bf16.vlgmr.msra.gmra.mrb[152].mxu1 %vm8758_vm14, %v7246_v23  ;;  %v4929_v20 = vsel %vm8759_vm12, %v4922_v28, %v4924_v2  ;;  %vm8766_vm14 = vcmask 752640   ;;  %vm8767_vm12 = vmmov %vm8763_vm2  ;;  %v7250_v23 = vld [vmem:[%s8659_s2 + $0x18] sm:$0xf] }
 0x9b6   : > { %7080 = vmatpush3.bf16.msra.mxu1 %v4835_v24  ;;  %4941 = vmatprep.subr.bf16.mxu0 %v4936_v27  ;;  %v4928_v30 = vpop.permute.xlu0 %4927  ;;  %v4933_v37 = vand.u32 %v4929_v20, %v7473_v48 }
 0x9b7   : > { %7081 = vmatprep.mubr.msk.bf16.mxu1 %vm7273_vm7, %v7270_v1  ;;  %7085 = vmatprep.subr.bf16.mxu1 %v7270_v1  ;;  %v4931_v36 = vsel %vm8760_vm15, %v4926_v19, %v4928_v30  ;;  %vm8768_vm15 = vmmov %vm8763_vm2 }
 0x9b8   : > { %v5028_v5 = vpop.permute.xlu1 %5027  ;;  %v4939_v41 = vand.u32 %v4931_v36, %v7473_v48 }
 0x9ba   : > { %v5030_v38 = vpop.permute.xlu0 %5029 }
 0x9bb   : > { %v5034_v39 = vsel %vm8761_vm5, %v5028_v5, %v5030_v38  ;;  %6680 = vmatmul.mubr.msk.bf16.vlgmr.msra.gmra.mrb[156].mxu0 %vm8762_vm3, %v7247_v40  ;;  %vm8769_vm5 = vmmov %vm8766_vm14 }
 0x9bc   : > { %v5040_v42 = vand.u32 %v5034_v39, %v7473_v48  ;;  %4942 = vmatpush1.bf16.msra.mxu0 %v4933_v37  ;;  %v5026_v43 = vpop.permute.xlu1 %5025  ;;  %4973 = vmatprep.mubr.bf16.mxu0 %v7272_v33  ;;  %vm8770_vm3 = vmmov %vm8769_vm5  ;;  %v7251_v37 = vld [vmem:[%s8659_s2 + $0x1c] sm:$0xf]  ;;  %v7252_v39 = vld [vmem:[%s8659_s2 + $0x20] sm:$0xf] }
 0x9bd   : > { %7082 = vmatmul.mubr.msk.bf16.vlgmr.msra.gmra.mrb[156].mxu1 %vm8763_vm2, %v7247_v40  ;;  %v5033_v46 = vsel %vm8764_vm10, %v5026_v43, %v5028_v5  ;;  %vm8771_vm2 = vcmask 744448   ;;  %vm8772_vm10 = vmmov %vm8767_vm12 }
 0x9be   : > { %7086 = vmatpush3.bf16.msra.mxu1 %v4939_v41  ;;  %5045 = vmatprep.subr.bf16.mxu0 %v5040_v42  ;;  %v5032_v45 = vpop.permute.xlu0 %5031  ;;  %v5037_v51 = vand.u32 %v5033_v46, %v7473_v48 }
 0x9bf   : > { %7087 = vmatprep.mubr.msk.bf16.mxu1 %vm7273_vm7, %v7270_v1  ;;  %7091 = vmatprep.subr.bf16.mxu1 %v7270_v1  ;;  %v5035_v49 = vsel %vm8765_vm0, %v5030_v38, %v5032_v45  ;;  %vm8773_vm0 = vmmov %vm8772_vm10 }
 0x9c0   : > { %v5132_v47 = vpop.permute.xlu1 %5131  ;;  %v5043_v55 = vand.u32 %v5035_v49, %v7473_v48 }
 0x9c2   : > { %v5134_v52 = vpop.permute.xlu0 %5133 }
 0x9c3   : > { %v5138_v53 = vsel %vm8766_vm14, %v5132_v47, %v5134_v52  ;;  %6682 = vmatmul.mubr.msk.bf16.vlgmr.msra.gmra.mrb[160].mxu0 %vm8767_vm12, %v7248_v54  ;;  %vm8774_vm14 = vmmov %vm8771_vm2 }
 0x9c4   : > { %v5144_v56 = vand.u32 %v5138_v53, %v7473_v48  ;;  %5046 = vmatpush1.bf16.msra.mxu0 %v5037_v51  ;;  %v5130_v57 = vpop.permute.xlu1 %5129  ;;  %5077 = vmatprep.mubr.bf16.mxu0 %v7272_v33  ;;  %vm8775_vm12 = vmmov %vm8771_vm2 }
 0x9c5   : > { %7088 = vmatmul.mubr.msk.bf16.vlgmr.msra.gmra.mrb[160].mxu1 %vm8768_vm15, %v7248_v54  ;;  %v5137_v59 = vsel %vm8769_vm5, %v5130_v57, %v5132_v47  ;;  %vm8776_vm15 = vcmask 736256   ;;  %vm8777_vm5 = vmmov %vm8773_vm0 }
 0x9c6   : > { %7092 = vmatpush3.bf16.msra.mxu1 %v5043_v55  ;;  %5149 = vmatprep.subr.bf16.mxu0 %v5144_v56  ;;  %v5136_v58 = vpop.permute.xlu0 %5135  ;;  %v5141_v63 = vand.u32 %v5137_v59, %v7473_v48 }
 0x9c7   : > { %7093 = vmatprep.mubr.msk.bf16.mxu1 %vm7273_vm7, %v7270_v1  ;;  %7097 = vmatprep.subr.bf16.mxu1 %v7270_v1  ;;  %v5139_v61 = vsel %vm8770_vm3, %v5134_v52, %v5136_v58  ;;  %vm8778_vm3 = vmmov %vm8773_vm0 }
 0x9c8   : > { %v5236_v60 = vpop.permute.xlu1 %5235  ;;  %v5147_v11 = vand.u32 %v5139_v61, %v7473_v48 }
 0x9ca   : > { %v5238_v7 = vpop.permute.xlu0 %5237 }
 0x9cb   : > { %v5242_v8 = vsel %vm8771_vm2, %v5236_v60, %v5238_v7  ;;  %6684 = vmatmul.mubr.msk.bf16.vlgmr.msra.gmra.mrb[164].mxu0 %vm8772_vm10, %v7249_v9  ;;  %vm8779_vm2 = vmmov %vm8776_vm15 }
 0x9cc   : > { %v5248_v12 = vand.u32 %v5242_v8, %v7473_v48  ;;  %5150 = vmatpush1.bf16.msra.mxu0 %v5141_v63  ;;  %v5234_v35 = vpop.permute.xlu1 %5233  ;;  %5181 = vmatprep.mubr.bf16.mxu0 %v7272_v33  ;;  %vm8780_vm10 = vmmov %vm8779_vm2 }
 0x9cd   : > { %7094 = vmatmul.mubr.msk.bf16.vlgmr.msra.gmra.mrb[164].mxu1 %vm8773_vm0, %v7249_v9  ;;  %v5241_v3 = vsel %vm8774_vm14, %v5234_v35, %v5236_v60  ;;  %vm8781_vm14 = vmmov %vm8773_vm0 }
 0x9ce   : > { %7098 = vmatpush3.bf16.msra.mxu1 %v5147_v11  ;;  %5253 = vmatprep.subr.bf16.mxu0 %v5248_v12  ;;  %v5240_v15 = vpop.permute.xlu0 %5239  ;;  %v5245_v16 = vand.u32 %v5241_v3, %v7473_v48 }
 0x9cf   : > { %7099 = vmatprep.mubr.msk.bf16.mxu1 %vm7273_vm7, %v7270_v1  ;;  %7103 = vmatprep.subr.bf16.mxu1 %v7270_v1  ;;  %v5243_v22 = vsel %vm8775_vm12, %v5238_v7, %v5240_v15  ;;  %vm8782_vm12 = vmmov %vm8773_vm0 }
 0x9d0   : > { %v5340_v2 = vpop.permute.xlu1 %5339  ;;  %v5251_v24 = vand.u32 %v5243_v22, %v7473_v48 }
 0x9d2   : > { %v5342_v19 = vpop.permute.xlu0 %5341 }
 0x9d3   : > { %v5346_v21 = vsel %vm8776_vm15, %v5340_v2, %v5342_v19  ;;  %6686 = vmatmul.mubr.msk.bf16.vlgmr.msra.gmra.mrb[168].mxu0 %vm8777_vm5, %v7250_v23  ;;  %vm8783_vm15 = vmmov %vm8773_vm0  ;;  %vm8784_vm5 = vcmask 1043456  }
 0x9d4   : > { %v5352_v27 = vand.u32 %v5346_v21, %v7473_v48  ;;  %5254 = vmatpush1.bf16.msra.mxu0 %v5245_v16  ;;  %v5338_v28 = vpop.permute.xlu1 %5337  ;;  %5285 = vmatprep.mubr.bf16.mxu0 %v7272_v33 }
 0x9d5   : > { %7100 = vmatmul.mubr.msk.bf16.vlgmr.msra.gmra.mrb[168].mxu1 %vm8778_vm3, %v7250_v23  ;;  %v5345_v20 = vsel %vm8779_vm2, %v5338_v28, %v5340_v2 }
 0x9d6   : > { %7104 = vmatpush3.bf16.msra.mxu1 %v5251_v24  ;;  %5357 = vmatprep.subr.bf16.mxu0 %v5352_v27  ;;  %v5344_v30 = vpop.permute.xlu0 %5343  ;;  %v5349_v36 = vand.u32 %v5345_v20, %v7473_v48 }
 0x9d7   : > { %7105 = vmatprep.mubr.msk.bf16.mxu1 %vm7273_vm7, %v7270_v1  ;;  %7109 = vmatprep.subr.bf16.mxu1 %v7270_v1  ;;  %v5347_v5 = vsel %vm8780_vm10, %v5342_v19, %v5344_v30 }
 0x9d8   : > { %v5355_v38 = vand.u32 %v5347_v5, %v7473_v48 }
 0x9db   : > { %6688 = vmatmul.mubr.msk.bf16.vlgmr.msra.gmra.mrb[172].mxu0 %vm8773_vm0, %v7251_v37 }
 0x9dc   : > { %5358 = vmatpush1.bf16.msra.mxu0 %v5349_v36  ;;  %5389 = vmatprep.mubr.bf16.mxu0 %v7272_v33 }
 0x9dd   : > { %7106 = vmatmul.mubr.msk.bf16.vlgmr.msra.gmra.mrb[172].mxu1 %vm8781_vm14, %v7251_v37 }
 0x9de   : > { %7110 = vmatpush3.bf16.msra.mxu1 %v5355_v38  ;;  %7111 = vmatprep.mubr.msk.bf16.mxu1 %vm7273_vm7, %v7270_v1 }
 0x9df   : > { %7115 = vmatprep.subr.bf16.mxu1 %v7270_v1 }
 0x9e3   : > { %6690 = vmatmul.mubr.msk.bf16.vlgmr.msra.gmra.mrb[176].mxu0 %vm8782_vm12, %v7252_v39 }
 0x9e4   : > { %5539 = vmatprep.mubr.bf16.mxu0 %v7272_v33 }
 0x9e5   : > { %7112 = vmatmul.mubr.msk.bf16.vlgmr.msra.gmra.mrb[176].mxu1 %vm8783_vm15, %v7252_v39 }
 0x9e6   : > { %7117 = vmatprep.mubr.msk.bf16.mxu1 %vm7273_vm7, %v7270_v1 }
 0xa76   : > { %v4576_v48 = vpop.f32.mrb[144].mxu0 }
 0xa77   : > { %v4578_v40 = vpop.f32.mrb[145].mxu0 }
 0xa78   : > { %v4580_v41 = vpop.f32.mrb[146].mxu0  ;;  %v4617_v42 = vpop.f32.mrb[144].mxu1 }
 0xa79   : > { %v4581_v43 = vpop.f32.mrb[147].mxu0  ;;  %v7065_v45 = vpop.f32.mrb[145].mxu1 }
 0xa7a   : > { %v4620_v46 = vpop.f32.mrb[146].mxu1 }
 0xa7b   : > { %v7066_v47 = vpop.f32.mrb[147].mxu1 }
 0xa7e   : > { %v4666_v49 = vpop.f32.mrb[148].mxu0 }
 0xa7f   : > { %v4667_v51 = vadd.f32 %v4666_v49, %v4576_v48  ;;  %v4668_v52 = vpop.f32.mrb[149].mxu0 }
 0xa80   : > { %v4669_v53 = vadd.f32 %v4668_v52, %v4578_v40  ;;  %v4670_v54 = vpop.f32.mrb[150].mxu0  ;;  %v4707_v55 = vpop.f32.mrb[148].mxu1 }
 0xa81   : > { %v4708_v56 = vadd.f32 %v4707_v55, %v4617_v42  ;;  %v4671_v57 = vpop.f32.mrb[151].mxu0  ;;  %v7071_v58 = vpop.f32.mrb[149].mxu1 }
 0xa82   : > { %v4710_v59 = vpop.f32.mrb[150].mxu1 }
 0xa83   : > { %v7072_v60 = vpop.f32.mrb[151].mxu1 }
 0xa86   : > { %v4767_v61 = vpop.f32.mrb[152].mxu0 }
 0xa87   : > { %v4814_v63 = vadd.f32 %v4767_v61, %v4667_v51  ;;  %v4769_v7 = vpop.f32.mrb[153].mxu0 }
 0xa88   : > { %v4815_v8 = vadd.f32 %v4769_v7, %v4669_v53  ;;  %v4771_v9 = vpop.f32.mrb[154].mxu0  ;;  %v4808_v11 = vpop.f32.mrb[152].mxu1 }
 0xa89   : > { %v4816_v12 = vadd.f32 %v4808_v11, %v4708_v56  ;;  %v4772_v35 = vpop.f32.mrb[155].mxu0  ;;  %v7077_v15 = vpop.f32.mrb[153].mxu1 }
 0xa8a   : > { %v4811_v3 = vpop.f32.mrb[154].mxu1 }
 0xa8b   : > { %v7078_v2 = vpop.f32.mrb[155].mxu1 }
 0xa8e   : > { %v4871_v22 = vpop.f32.mrb[156].mxu0 }
 0xa8f   : > { %v4918_v16 = vadd.f32 %v4871_v22, %v4814_v63  ;;  %v4873_v19 = vpop.f32.mrb[157].mxu0 }
 0xa90   : > { %v4919_v21 = vadd.f32 %v4873_v19, %v4815_v8  ;;  %v4875_v23 = vpop.f32.mrb[158].mxu0  ;;  %v4912_v24 = vpop.f32.mrb[156].mxu1 }
 0xa91   : > { %v4920_v27 = vadd.f32 %v4912_v24, %v4816_v12  ;;  %v4876_v28 = vpop.f32.mrb[159].mxu0  ;;  %v7083_v30 = vpop.f32.mrb[157].mxu1 }
 0xa92   : > { %v4915_v20 = vpop.f32.mrb[158].mxu1 }
 0xa93   : > { %v7084_v5 = vpop.f32.mrb[159].mxu1 }
 0xa96   : > { %v4975_v36 = vpop.f32.mrb[160].mxu0 }
 0xa97   : > { %v5022_v37 = vadd.f32 %v4975_v36, %v4918_v16  ;;  %v4977_v38 = vpop.f32.mrb[161].mxu0 }
 0xa98   : > { %v5023_v39 = vadd.f32 %v4977_v38, %v4919_v21  ;;  %v4979_v48 = vpop.f32.mrb[162].mxu0  ;;  %v5016_v40 = vpop.f32.mrb[160].mxu1 }
 0xa99   : > { %v5024_v41 = vadd.f32 %v5016_v40, %v4920_v27  ;;  %v4980_v42 = vpop.f32.mrb[163].mxu0  ;;  %v7089_v43 = vpop.f32.mrb[161].mxu1 }
 0xa9a   : > { %v5019_v45 = vpop.f32.mrb[162].mxu1 }
 0xa9b   : > { %v7090_v46 = vpop.f32.mrb[163].mxu1 }
 0xa9e   : > { %v5079_v47 = vpop.f32.mrb[164].mxu0 }
 0xa9f   : > { %v5126_v49 = vadd.f32 %v5079_v47, %v5022_v37  ;;  %v5081_v51 = vpop.f32.mrb[165].mxu0 }
 0xaa0   : > { %v5127_v52 = vadd.f32 %v5081_v51, %v5023_v39  ;;  %v5083_v53 = vpop.f32.mrb[166].mxu0  ;;  %v5120_v54 = vpop.f32.mrb[164].mxu1 }
 0xaa1   : > { %v5128_v55 = vadd.f32 %v5120_v54, %v5024_v41  ;;  %v5084_v56 = vpop.f32.mrb[167].mxu0  ;;  %v7095_v57 = vpop.f32.mrb[165].mxu1 }
 0xaa2   : > { %v5123_v58 = vpop.f32.mrb[166].mxu1 }
 0xaa3   : > { %v7096_v59 = vpop.f32.mrb[167].mxu1 }
 0xaa6   : > { %v5183_v60 = vpop.f32.mrb[168].mxu0 }
 0xaa7   : > { %v5230_v61 = vadd.f32 %v5183_v60, %v5126_v49  ;;  %v5185_v63 = vpop.f32.mrb[169].mxu0 }
 0xaa8   : > { %v5231_v7 = vadd.f32 %v5185_v63, %v5127_v52  ;;  %v5187_v8 = vpop.f32.mrb[170].mxu0  ;;  %v5224_v9 = vpop.f32.mrb[168].mxu1 }
 0xaa9   : > { %v5232_v11 = vadd.f32 %v5224_v9, %v5128_v55  ;;  %v5188_v12 = vpop.f32.mrb[171].mxu0  ;;  %v7101_v35 = vpop.f32.mrb[169].mxu1 }
 0xaaa   : > { %v5227_v15 = vpop.f32.mrb[170].mxu1 }
 0xaab   : > { %v7102_v3 = vpop.f32.mrb[171].mxu1 }
 0xaae   : > { %v5287_v2 = vpop.f32.mrb[172].mxu0 }
 0xaaf   : > { %v5334_v22 = vadd.f32 %v5287_v2, %v5230_v61  ;;  %v5289_v16 = vpop.f32.mrb[173].mxu0 }
 0xab0   : > { %v5335_v19 = vadd.f32 %v5289_v16, %v5231_v7  ;;  %v5291_v21 = vpop.f32.mrb[174].mxu0  ;;  %v5328_v23 = vpop.f32.mrb[172].mxu1 }
 0xab1   : > { %v5336_v24 = vadd.f32 %v5328_v23, %v5232_v11  ;;  %v5292_v27 = vpop.f32.mrb[175].mxu0  ;;  %v7107_v28 = vpop.f32.mrb[173].mxu1 }
 0xab2   : > { %v5331_v30 = vpop.f32.mrb[174].mxu1  ;;  %v7253_v28 = vld [vmem:[%s8661_s4 + $0x2] sm:$0x3] }
 0xab3   : > { %v7108_v20 = vpop.f32.mrb[175].mxu1 }
 0xab6   : > { %v5391_v5 = vpop.f32.mrb[176].mxu0 }
 0xab7   : > { %v5438_v36 = vadd.f32 %v5391_v5, %v5334_v22  ;;  %v5393_v37 = vpop.f32.mrb[177].mxu0 }
 0xab8   : > { %v5439_v38 = vadd.f32 %v5393_v37, %v5335_v19  ;;  %v5395_v39 = vpop.f32.mrb[178].mxu0  ;;  %v5432_v48 = vpop.f32.mrb[176].mxu1 }
 0xab9   : > { %v5441_v40 = vadd.f32 %v5438_v36, %v7613_v13  ;;  %v5440_v41 = vadd.f32 %v5432_v48, %v5336_v24  ;;  %v5396_v42 = vpop.f32.mrb[179].mxu0  ;;  %v7113_v43 = vpop.f32.mrb[177].mxu1 }
 0xaba   : > { %v5442_v45 = vadd.f32 %v5439_v38, %v7613_v13  ;;  %v5435_v46 = vpop.f32.mrb[178].mxu1  ;;  %v7254_v43 = vld [vmem:[%s8661_s4] sm:$0x3] }
 0xabb   : > { %v5444_v47 = vmax.f32 %v5441_v40, 0.0  ;;  %v5443_v49 = vadd.f32 %v5440_v41, %v7613_v13  ;;  %v7114_v51 = vpop.f32.mrb[179].mxu1 }
 0xabc   : > { %v5445_v52 = vmax.f32 %v5442_v45, 0.0 }
 0xabd   : > { %v5447_v53 = vmul.f32 %v5444_v47, %v7618_v29  ;;  %v5446_v54 = vmax.f32 %v5443_v49, 0.0 }
 0xabe   : > { %v5448_v55 = vmul.f32 %v5445_v52, %v7621_v32 }
 0xabf   : > { %v5449_v56 = vmul.f32 %v5446_v54, %v7624_v6 }
 0xac0   : > { %v6735_v57 = vpack.c.bf16 %v5448_v55, %v5447_v53 }
 0xac1   : > { %v6736_v58 = vpack.c.bf16 %v5449_v56, %v5449_v56  ;;  %v7255_v56 = vld [vmem:[%s8661_s4 + $0x4] sm:$0x3] }
 0xac2   : > { %5461 = vrot.lane.b32.xlu1 %v6735_v57, %s7271_s10 }
 0xac3   : > { %5463 = vrot.lane.b32.xlu0 %v6736_v58, %s7271_s10  ;;  %s306_s10 = scalar_lea.vmem %s8663_s6, %s7340_s26 }
 0xb34   : > { %v5462_v59 = vpop.permute.xlu1 %5461 }
 0xb35   : > { %v5465_v60 = vrot.slane %v5462_v59, 4  ;;  %v5464_v61 = vpop.permute.xlu0 %5463 }
 0xb36   : > { %v5466_v63 = vrot.slane %v5464_v61, 4 }
 0xb37   : > { %v5467_v13 = vsel %vm359_vm4, %v5465_v60, %v5462_v59 }
 0xb38   : > { %5472 = vst.msk [vmem:[#allocation3] sm:$0xff] %vm7632_vm6, %v5467_v13  ;;  %v5468_v29 = vsel %vm8784_vm5, %v5465_v60, %v5466_v63 }
 0xb39   : > { %v5469_v32 = vsel %vm359_vm4, %v5468_v29, %v5464_v61  ;;  %vm8785_vm4 = vmmov %vm8784_vm5 }
 0xb3a   : > { %5473 = vst.msk [vmem:[#allocation3 + $0x8] sm:$0xff] %vm7640_vm8, %v5469_v32  ;;  %vm8786_vm6 = vmmov %vm8785_vm4 }
 0xb3b   : > { %vm8787_vm8 = vmmov %vm8785_vm4 }
 0xb3c   : > { %vm8788_vm3 = vmmov %vm8785_vm4 }
 0xb3d   : > { %vm8791_vm10 = vmmov %vm8788_vm3 }
 0xb3e   : > { %vm8792_vm0 = vmmov %vm8788_vm3 }
 0xb3f   : > { %v5474_v7 = vld [vmem:[#allocation3] sm:$0xff]  ;;  %vm8793_vm14 = vmmov %vm8792_vm0 }
 0xb40   : > { %v6694_v8 = vcombine.low %v5474_v7, %v5474_v7  ;;  %v6695_v9 = vcombine.high %v5474_v7, %v5474_v7  ;;  %vm8794_vm12 = vmmov %vm8792_vm0  ;;  %v7256_v7 = vld [vmem:[%s8661_s4 + $0x6] sm:$0x3] }
 0xb41   : > { %v5476_v11 = vld [vmem:[#allocation3 + $0x8] sm:$0xff]  ;;  %vm8795_vm15 = vmmov %vm8792_vm0 }
 0xb42   : > { %5487 = vrot.lane.b32.xlu1 %v6694_v8, %s7274_s11  ;;  %5489 = vrot.lane.b32.xlu0 %v6695_v9, %s7274_s11  ;;  %v6697_v12 = vcombine.high %v5476_v11, %v5476_v11  ;;  %v6696_v35 = vcombine.low %v5476_v11, %v5476_v11  ;;  %v7205_v23 = vld [vmem:[#allocation3 + $0x8] ss:$0 sps:$4 sm:$0xff]   ;;  %v5592_v30 = vsel %vm8791_vm10, %v6694_v8, 0 }
 0xb43   : > { %v5598_v20 = vsel %vm8792_vm0, %v7205_v23, 0 }
 0xb46   : > { %5493 = vrot.lane.b32.xlu0 %v6697_v12, %s7274_s11  ;;  %5491 = vrot.lane.b32.xlu1 %v6696_v35, %s7274_s11 }
 0xb4a   : > { %5683 = vrot.lane.b32.xlu0 %v6695_v9, %s7275_s12  ;;  %5681 = vrot.lane.b32.xlu1 %v6694_v8, %s7275_s12 }
 0xb4e   : > { %5687 = vrot.lane.b32.xlu0 %v6697_v12, %s7275_s12  ;;  %5685 = vrot.lane.b32.xlu1 %v6696_v35, %s7275_s12 }
 0xb52   : > { %5787 = vrot.lane.b32.xlu0 %v6695_v9, %s7276_s13  ;;  %5785 = vrot.lane.b32.xlu1 %v6694_v8, %s7276_s13 }
 0xb56   : > { %5791 = vrot.lane.b32.xlu0 %v6697_v12, %s7276_s13  ;;  %5789 = vrot.lane.b32.xlu1 %v6696_v35, %s7276_s13 }
 0xb5a   : > { %5891 = vrot.lane.b32.xlu0 %v6695_v9, %s7277_s14  ;;  %5889 = vrot.lane.b32.xlu1 %v6694_v8, %s7277_s14 }
 0xb5e   : > { %5895 = vrot.lane.b32.xlu0 %v6697_v12, %s7277_s14  ;;  %5893 = vrot.lane.b32.xlu1 %v6696_v35, %s7277_s14 }
 0xb62   : > { %5995 = vrot.lane.b32.xlu0 %v6695_v9, %s7278_s15  ;;  %5993 = vrot.lane.b32.xlu1 %v6694_v8, %s7278_s15 }
 0xb66   : > { %5999 = vrot.lane.b32.xlu0 %v6697_v12, %s7278_s15  ;;  %5997 = vrot.lane.b32.xlu1 %v6696_v35, %s7278_s15 }
 0xb6a   : > { %6099 = vrot.lane.b32.xlu0 %v6695_v9, %s7279_s16  ;;  %6097 = vrot.lane.b32.xlu1 %v6694_v8, %s7279_s16 }
 0xb6e   : > { %6103 = vrot.lane.b32.xlu0 %v6697_v12, %s7279_s16  ;;  %6101 = vrot.lane.b32.xlu1 %v6696_v35, %s7279_s16 }
 0xb72   : > { %6203 = vrot.lane.b32.xlu0 %v6695_v9, %s7280_s17  ;;  %6201 = vrot.lane.b32.xlu1 %v6694_v8, %s7280_s17 }
 0xb76   : > { %6207 = vrot.lane.b32.xlu0 %v6697_v12, %s7280_s17  ;;  %6205 = vrot.lane.b32.xlu1 %v6696_v35, %s7280_s17 }
 0xb7a   : > { %6307 = vrot.lane.b32.xlu0 %v6695_v9, %s7281_s18  ;;  %6305 = vrot.lane.b32.xlu1 %v6694_v8, %s7281_s18 }
 0xb7e   : > { %6311 = vrot.lane.b32.xlu0 %v6697_v12, %s7281_s18  ;;  %6309 = vrot.lane.b32.xlu1 %v6696_v35, %s7281_s18 }
 0xbb4   : > { %v5488_v44 = vpop.permute.xlu1 %5487  ;;  %v5490_v50 = vpop.permute.xlu0 %5489 }
 0xbb5   : > { %v5495_v15 = vsel %vm446_vm9, %v5488_v44, %v5490_v50 }
 0xbb6   : > { %v5499_v19 = vsel %vm8785_vm4, %v5495_v15, 0 }
 0xbb8   : > { %v5492_v3 = vpop.permute.xlu1 %5491  ;;  %v5494_v2 = vpop.permute.xlu0 %5493 }
 0xbb9   : > { %v5496_v22 = vsel %vm446_vm9, %v5490_v50, %v5492_v3  ;;  %v5497_v16 = vsel %vm446_vm9, %v5492_v3, %v5494_v2  ;;  %vm8789_vm9 = vcmask 64512   ;;  %v7257_v2 = vld [vmem:[%s8661_s4 + $0x8] sm:$0x3] }
 0xbba   : > { %v5505_v21 = vsel %vm8786_vm6, %v5497_v16, 0  ;;  %6698 = vmatprep.subr.msk.bf16.mxu0 %vm8787_vm8, %v5496_v22  ;;  %vm8790_vm2 = vmmov %vm8789_vm9 }
 0xbbb   : > { %5508 = vmatpush1.bf16.msra.mxu0 %v5499_v19  ;;  %7116 = vmatpush3.bf16.msra.mxu1 %v5505_v21  ;;  %vm8796_vm5 = vmmov %vm8790_vm2 }
 0xbbc   : > { %v5682_v24 = vpop.permute.xlu1 %5681  ;;  %6702 = vmatprep.subr.msk.bf16.mxu0 %vm8788_vm3, %v6695_v9  ;;  %v5684_v27 = vpop.permute.xlu0 %5683  ;;  %7121 = vmatprep.subr.bf16.mxu1 %v7270_v1  ;;  %vm8797_vm4 = vmmov %vm8790_vm2 }
 0xbbd   : > { %v5689_v38 = vsel %vm649_vm11, %v5682_v24, %v5684_v27  ;;  %vm8799_vm6 = vmmov %vm8792_vm0 }
 0xbbe   : > { %6699 = vmatmul.mubr.msk.bf16.vlgmr.msra.gmra.mrb[180].mxu0 %vm8789_vm9, %v7253_v28  ;;  %7118 = vmatmul.mubr.msk.bf16.vlgmr.msra.gmra.mrb[180].mxu1 %vm8790_vm2, %v7253_v28  ;;  %v5693_v41 = vsel %vm8794_vm12, %v5689_v38, 0  ;;  %vm8800_vm8 = vmmov %vm8792_vm0 }
 0xbbf   : > { %5601 = vmatpush1.bf16.msra.mxu0 %v5592_v30  ;;  %7122 = vmatpush3.bf16.msra.mxu1 %v5598_v20  ;;  %vm8801_vm3 = vmmov %vm8790_vm2  ;;  %v7258_v20 = vld [vmem:[%s8661_s4 + $0xa] sm:$0x3] }
 0xbc0   : > { %v5686_v5 = vpop.permute.xlu1 %5685  ;;  %v5688_v36 = vpop.permute.xlu0 %5687  ;;  %5632 = vmatprep.mubr.bf16.mxu0 %v7272_v33  ;;  %7123 = vmatprep.mubr.msk.bf16.mxu1 %vm7273_vm7, %v7270_v1  ;;  %vm8802_vm9 = vmmov %vm8790_vm2 }
 0xbc1   : > { %v5690_v37 = vsel %vm649_vm11, %v5684_v27, %v5686_v5  ;;  %7127 = vmatprep.subr.bf16.mxu1 %v7270_v1  ;;  %v5691_v39 = vsel %vm649_vm11, %v5686_v5, %v5688_v36  ;;  %vm8798_vm11 = vmmov %vm8792_vm0 }
 0xbc2   : > { %6705 = vmatprep.subr.msk.bf16.mxu0 %vm8793_vm14, %v5690_v37  ;;  %v5699_v42 = vsel %vm8795_vm15, %v5691_v39, 0  ;;  %vm8804_vm2 = vmmov %vm8792_vm0 }
 0xbc3   : > { %vm8807_vm14 = vmmov %vm8804_vm2 }
 0xbc4   : > { %v5786_v48 = vpop.permute.xlu1 %5785  ;;  %v5788_v40 = vpop.permute.xlu0 %5787  ;;  %vm8808_vm12 = vmmov %vm8804_vm2 }
 0xbc5   : > { %v5793_v49 = vsel %vm757_vm13, %v5786_v48, %v5788_v40  ;;  %vm8809_vm15 = vmmov %vm8801_vm3 }
 0xbc6   : > { %6703 = vmatmul.mubr.msk.bf16.vlgmr.msra.gmra.mrb[184].mxu0 %vm8796_vm5, %v7254_v43  ;;  %7124 = vmatmul.mubr.msk.bf16.vlgmr.msra.gmra.mrb[184].mxu1 %vm8797_vm4, %v7254_v43  ;;  %v5797_v54 = vsel %vm8799_vm6, %v5793_v49, 0  ;;  %vm8810_vm5 = vmmov %vm8801_vm3  ;;  %vm8811_vm4 = vcmask 883712   ;;  %v7259_v43 = vld [vmem:[%s8661_s4 + $0xc] sm:$0x3] }
 0xbc7   : > { %5702 = vmatpush1.bf16.msra.mxu0 %v5693_v41  ;;  %7128 = vmatpush3.bf16.msra.mxu1 %v5699_v42  ;;  %vm8813_vm6 = vmmov %vm8811_vm4 }
 0xbc8   : > { %v5790_v45 = vpop.permute.xlu1 %5789  ;;  %v5792_v46 = vpop.permute.xlu0 %5791  ;;  %5733 = vmatprep.mubr.bf16.mxu0 %v7272_v33  ;;  %7129 = vmatprep.mubr.msk.bf16.mxu1 %vm7273_vm7, %v7270_v1 }
 0xbc9   : > { %v5794_v47 = vsel %vm757_vm13, %v5788_v40, %v5790_v45  ;;  %7133 = vmatprep.subr.bf16.mxu1 %v7270_v1  ;;  %v5795_v51 = vsel %vm757_vm13, %v5790_v45, %v5792_v46  ;;  %vm8803_vm13 = vcmask 891904  }
 0xbca   : > { %6708 = vmatprep.subr.msk.bf16.mxu0 %vm8798_vm11, %v5794_v47  ;;  %v5803_v55 = vsel %vm8800_vm8, %v5795_v51, 0  ;;  %vm8805_vm10 = vmmov %vm8803_vm13 }
 0xbcb   : > { %vm8806_vm0 = vmmov %vm8805_vm10 }
 0xbcc   : > { %v5890_v52 = vpop.permute.xlu1 %5889  ;;  %v5892_v53 = vpop.permute.xlu0 %5891  ;;  %vm8812_vm11 = vmmov %vm8804_vm2 }
 0xbcd   : > { %v5897_v60 = vsel %vm8805_vm10, %v5890_v52, %v5892_v53  ;;  %vm8814_vm8 = vmmov %vm8811_vm4  ;;  %vm8819_vm10 = vcmask 752640  }
 0xbce   : > { %6706 = vmatmul.mubr.msk.bf16.vlgmr.msra.gmra.mrb[188].mxu0 %vm8801_vm3, %v7255_v56  ;;  %7130 = vmatmul.mubr.msk.bf16.vlgmr.msra.gmra.mrb[188].mxu1 %vm8802_vm9, %v7255_v56  ;;  %v5901_v29 = vsel %vm8807_vm14, %v5897_v60, 0  ;;  %vm8815_vm3 = vmmov %vm8804_vm2 }
 0xbcf   : > { %5806 = vmatpush1.bf16.msra.mxu0 %v5797_v54  ;;  %7134 = vmatpush3.bf16.msra.mxu1 %v5803_v55  ;;  %vm8816_vm9 = vmmov %vm8804_vm2  ;;  %v7260_v54 = vld [vmem:[%s8661_s4 + $0xe] sm:$0x3]  ;;  %v7261_v55 = vld [vmem:[%s8661_s4 + $0x10] sm:$0x3] }
 0xbd0   : > { %v5894_v57 = vpop.permute.xlu1 %5893  ;;  %v5896_v58 = vpop.permute.xlu0 %5895  ;;  %5837 = vmatprep.mubr.bf16.mxu0 %v7272_v33  ;;  %7135 = vmatprep.mubr.msk.bf16.mxu1 %vm7273_vm7, %v7270_v1  ;;  %vm8821_vm14 = vmmov %vm8819_vm10 }
 0xbd1   : > { %v5898_v59 = vsel %vm8803_vm13, %v5892_v53, %v5894_v57  ;;  %7139 = vmatprep.subr.bf16.mxu1 %v7270_v1  ;;  %v5899_v61 = vsel %vm8806_vm0, %v5894_v57, %v5896_v58  ;;  %vm8817_vm13 = vmmov %vm8810_vm5 }
 0xbd2   : > { %6711 = vmatprep.subr.msk.bf16.mxu0 %vm8804_vm2, %v5898_v59  ;;  %v5907_v32 = vsel %vm8808_vm12, %v5899_v61, 0  ;;  %vm8818_vm2 = vmmov %vm8810_vm5 }
 0xbd3   : > { %vm8820_vm0 = vmmov %vm8815_vm3 }
 0xbd4   : > { %v5994_v63 = vpop.permute.xlu1 %5993  ;;  %v5996_v13 = vpop.permute.xlu0 %5995  ;;  %vm8822_vm12 = vmmov %vm8819_vm10 }
 0xbd5   : > { %v6001_v12 = vsel %vm8813_vm6, %v5994_v63, %v5996_v13  ;;  %vm8827_vm6 = vcmask 744448  }
 0xbd6   : > { %6709 = vmatmul.mubr.msk.bf16.vlgmr.msra.gmra.mrb[192].mxu0 %vm8809_vm15, %v7256_v7  ;;  %7136 = vmatmul.mubr.msk.bf16.vlgmr.msra.gmra.mrb[192].mxu1 %vm8810_vm5, %v7256_v7  ;;  %v6005_v15 = vsel %vm8815_vm3, %v6001_v12, 0  ;;  %vm8823_vm15 = vmmov %vm8820_vm0 }
 0xbd7   : > { %5910 = vmatpush1.bf16.msra.mxu0 %v5901_v29  ;;  %7140 = vmatpush3.bf16.msra.mxu1 %v5907_v32  ;;  %vm8824_vm5 = vmmov %vm8820_vm0 }
 0xbd8   : > { %v5998_v8 = vpop.permute.xlu1 %5997  ;;  %v6000_v9 = vpop.permute.xlu0 %5999  ;;  %5941 = vmatprep.mubr.bf16.mxu0 %v7272_v33  ;;  %7141 = vmatprep.mubr.msk.bf16.mxu1 %vm7273_vm7, %v7270_v1  ;;  %vm8829_vm3 = vmmov %vm8827_vm6 }
 0xbd9   : > { %v6002_v11 = vsel %vm8811_vm4, %v5996_v13, %v5998_v8  ;;  %7145 = vmatprep.subr.bf16.mxu1 %v7270_v1  ;;  %v6003_v35 = vsel %vm8814_vm8, %v5998_v8, %v6000_v9  ;;  %vm8825_vm4 = vmmov %vm8818_vm2 }
 0xbda   : > { %6714 = vmatprep.subr.msk.bf16.mxu0 %vm8812_vm11, %v6002_v11  ;;  %v6011_v3 = vsel %vm8816_vm9, %v6003_v35, 0  ;;  %vm8826_vm11 = vmmov %vm8818_vm2 }
 0xbdb   : > { %vm8828_vm8 = vmmov %vm8820_vm0 }
 0xbdc   : > { %v6098_v44 = vpop.permute.xlu1 %6097  ;;  %v6100_v50 = vpop.permute.xlu0 %6099  ;;  %vm8830_vm9 = vmmov %vm8829_vm3 }
 0xbdd   : > { %v6105_v21 = vsel %vm8821_vm14, %v6098_v44, %v6100_v50  ;;  %vm8835_vm14 = vcmask 736256  }
 0xbde   : > { %6712 = vmatmul.mubr.msk.bf16.vlgmr.msra.gmra.mrb[196].mxu0 %vm8817_vm13, %v7257_v2  ;;  %7142 = vmatmul.mubr.msk.bf16.vlgmr.msra.gmra.mrb[196].mxu1 %vm8818_vm2, %v7257_v2  ;;  %v6109_v28 = vsel %vm8823_vm15, %v6105_v21, 0  ;;  %vm8831_vm13 = vmmov %vm8820_vm0 }
 0xbdf   : > { %6014 = vmatpush1.bf16.msra.mxu0 %v6005_v15  ;;  %7146 = vmatpush3.bf16.msra.mxu1 %v6011_v3  ;;  %vm8832_vm2 = vmmov %vm8820_vm0 }
 0xbe0   : > { %v6102_v22 = vpop.permute.xlu1 %6101  ;;  %v6104_v16 = vpop.permute.xlu0 %6103  ;;  %6045 = vmatprep.mubr.bf16.mxu0 %v7272_v33  ;;  %7147 = vmatprep.mubr.msk.bf16.mxu1 %vm7273_vm7, %v7270_v1  ;;  %vm8837_vm15 = vmmov %vm8835_vm14 }
 0xbe1   : > { %v6106_v19 = vsel %vm8819_vm10, %v6100_v50, %v6102_v22  ;;  %7151 = vmatprep.subr.bf16.mxu1 %v7270_v1  ;;  %v6107_v23 = vsel %vm8822_vm12, %v6102_v22, %v6104_v16  ;;  %vm8833_vm10 = vmmov %vm8825_vm4 }
 0xbe2   : > { %6717 = vmatprep.subr.msk.bf16.mxu0 %vm8820_vm0, %v6106_v19  ;;  %v6115_v30 = vsel %vm8824_vm5, %v6107_v23, 0  ;;  %vm8834_vm0 = vmmov %vm8825_vm4 }
 0xbe3   : > { %vm8836_vm12 = vmmov %vm8832_vm2 }
 0xbe4   : > { %v6202_v24 = vpop.permute.xlu1 %6201  ;;  %v6204_v27 = vpop.permute.xlu0 %6203  ;;  %vm8838_vm5 = vmmov %vm8835_vm14 }
 0xbe5   : > { %v6209_v38 = vsel %vm8829_vm3, %v6202_v24, %v6204_v27  ;;  %vm8843_vm3 = vmmov %vm8834_vm0 }
 0xbe6   : > { %6715 = vmatmul.mubr.msk.bf16.vlgmr.msra.gmra.mrb[200].mxu0 %vm8825_vm4, %v7258_v20  ;;  %7148 = vmatmul.mubr.msk.bf16.vlgmr.msra.gmra.mrb[200].mxu1 %vm8826_vm11, %v7258_v20  ;;  %v6213_v41 = vsel %vm8831_vm13, %v6209_v38, 0  ;;  %vm8839_vm4 = vmmov %vm8832_vm2 }
 0xbe7   : > { %6118 = vmatpush1.bf16.msra.mxu0 %v6109_v28  ;;  %7152 = vmatpush3.bf16.msra.mxu1 %v6115_v30  ;;  %vm8840_vm11 = vmmov %vm8832_vm2 }
 0xbe8   : > { %v6206_v5 = vpop.permute.xlu1 %6205  ;;  %v6208_v36 = vpop.permute.xlu0 %6207  ;;  %6149 = vmatprep.mubr.bf16.mxu0 %v7272_v33  ;;  %7153 = vmatprep.mubr.msk.bf16.mxu1 %vm7273_vm7, %v7270_v1 }
 0xbe9   : > { %v6210_v37 = vsel %vm8827_vm6, %v6204_v27, %v6206_v5  ;;  %7157 = vmatprep.subr.bf16.mxu1 %v7270_v1  ;;  %v6211_v39 = vsel %vm8830_vm9, %v6206_v5, %v6208_v36  ;;  %vm8841_vm6 = vmmov %vm8834_vm0 }
 0xbea   : > { %6720 = vmatprep.subr.msk.bf16.mxu0 %vm8828_vm8, %v6210_v37  ;;  %v6219_v42 = vsel %vm8832_vm2, %v6211_v39, 0  ;;  %vm8842_vm8 = vmmov %vm8834_vm0 }
 0xbeb   : > { %vm8844_vm9 = vmmov %vm8834_vm0 }
 0xbec   : > { %v6306_v48 = vpop.permute.xlu1 %6305  ;;  %v6308_v40 = vpop.permute.xlu0 %6307 }
 0xbed   : > { %v6313_v49 = vsel %vm8837_vm15, %v6306_v48, %v6308_v40 }
 0xbee   : > { %6718 = vmatmul.mubr.msk.bf16.vlgmr.msra.gmra.mrb[204].mxu0 %vm8833_vm10, %v7259_v43  ;;  %7154 = vmatmul.mubr.msk.bf16.vlgmr.msra.gmra.mrb[204].mxu1 %vm8834_vm0, %v7259_v43  ;;  %v6317_v52 = vsel %vm8839_vm4, %v6313_v49, 0 }
 0xbef   : > { %6222 = vmatpush1.bf16.msra.mxu0 %v6213_v41  ;;  %7158 = vmatpush3.bf16.msra.mxu1 %v6219_v42 }
 0xbf0   : > { %v6310_v45 = vpop.permute.xlu1 %6309  ;;  %v6312_v46 = vpop.permute.xlu0 %6311  ;;  %6253 = vmatprep.mubr.bf16.mxu0 %v7272_v33  ;;  %7159 = vmatprep.mubr.msk.bf16.mxu1 %vm7273_vm7, %v7270_v1 }
 0xbf1   : > { %v6314_v47 = vsel %vm8835_vm14, %v6308_v40, %v6310_v45  ;;  %7163 = vmatprep.subr.bf16.mxu1 %v7270_v1  ;;  %v6315_v51 = vsel %vm8838_vm5, %v6310_v45, %v6312_v46 }
 0xbf2   : > { %6723 = vmatprep.subr.msk.bf16.mxu0 %vm8836_vm12, %v6314_v47  ;;  %v6323_v53 = vsel %vm8840_vm11, %v6315_v51, 0 }
 0xbf6   : > { %6721 = vmatmul.mubr.msk.bf16.vlgmr.msra.gmra.mrb[208].mxu0 %vm8841_vm6, %v7260_v54  ;;  %7160 = vmatmul.mubr.msk.bf16.vlgmr.msra.gmra.mrb[208].mxu1 %vm8842_vm8, %v7260_v54 }
 0xbf7   : > { %6326 = vmatpush1.bf16.msra.mxu0 %v6317_v52  ;;  %7164 = vmatpush3.bf16.msra.mxu1 %v6323_v53 }
 0xbf8   : > { %6357 = vmatprep.mubr.bf16.mxu0 %v7272_v33  ;;  %7165 = vmatprep.mubr.msk.bf16.mxu1 %vm7273_vm7, %v7270_v1 }
 0xbfe   : > { %6724 = vmatmul.mubr.msk.bf16.vlgmr.msra.gmra.mrb[212].mxu0 %vm8843_vm3, %v7261_v55  ;;  %7166 = vmatmul.mubr.msk.bf16.vlgmr.msra.gmra.mrb[212].mxu1 %vm8844_vm9, %v7261_v55 }
 0xc91   : > { %v5541_v56 = vpop.f32.mrb[180].mxu0  ;;  %v5582_v57 = vpop.f32.mrb[180].mxu1 }
 0xc92   : > { %v5543_v58 = vpop.f32.mrb[181].mxu0  ;;  %v7119_v59 = vpop.f32.mrb[181].mxu1 }
 0xc93   : > { %v5545_v60 = vpop.f32.mrb[182].mxu0  ;;  %v5585_v61 = vpop.f32.mrb[182].mxu1 }
 0xc94   : > { %v5546_v63 = vpop.f32.mrb[183].mxu0  ;;  %v7120_v13 = vpop.f32.mrb[183].mxu1 }
 0xc99   : > { %v5634_v33 = vpop.f32.mrb[184].mxu0  ;;  %v5675_v29 = vpop.f32.mrb[184].mxu1 }
 0xc9a   : > { %v5635_v32 = vadd.f32 %v5634_v33, %v5541_v56  ;;  %v5676_v1 = vadd.f32 %v5675_v29, %v5582_v57  ;;  %v5636_v7 = vpop.f32.mrb[185].mxu0  ;;  %v7125_v8 = vpop.f32.mrb[185].mxu1 }
 0xc9b   : > { %v5637_v9 = vadd.f32 %v5636_v7, %v5543_v58  ;;  %v5638_v11 = vpop.f32.mrb[186].mxu0  ;;  %v5678_v12 = vpop.f32.mrb[186].mxu1 }
 0xc9c   : > { %v5639_v35 = vpop.f32.mrb[187].mxu0  ;;  %v7126_v44 = vpop.f32.mrb[187].mxu1 }
 0xca1   : > { %v5735_v50 = vpop.f32.mrb[188].mxu0  ;;  %v5776_v15 = vpop.f32.mrb[188].mxu1 }
 0xca2   : > { %v5782_v3 = vadd.f32 %v5735_v50, %v5635_v32  ;;  %v5784_v2 = vadd.f32 %v5776_v15, %v5676_v1  ;;  %v5737_v22 = vpop.f32.mrb[189].mxu0  ;;  %v7131_v16 = vpop.f32.mrb[189].mxu1 }
 0xca3   : > { %v5783_v19 = vadd.f32 %v5737_v22, %v5637_v9  ;;  %v5739_v21 = vpop.f32.mrb[190].mxu0  ;;  %v5779_v23 = vpop.f32.mrb[190].mxu1 }
 0xca4   : > { %v5740_v24 = vpop.f32.mrb[191].mxu0  ;;  %v7132_v27 = vpop.f32.mrb[191].mxu1 }
 0xca9   : > { %v5839_v28 = vpop.f32.mrb[192].mxu0  ;;  %v5880_v30 = vpop.f32.mrb[192].mxu1 }
 0xcaa   : > { %v5886_v20 = vadd.f32 %v5839_v28, %v5782_v3  ;;  %v5888_v5 = vadd.f32 %v5880_v30, %v5784_v2  ;;  %v5841_v36 = vpop.f32.mrb[193].mxu0  ;;  %v7137_v37 = vpop.f32.mrb[193].mxu1 }
 0xcab   : > { %v5887_v38 = vadd.f32 %v5841_v36, %v5783_v19  ;;  %v5843_v39 = vpop.f32.mrb[194].mxu0  ;;  %v5883_v48 = vpop.f32.mrb[194].mxu1 }
 0xcac   : > { %v5844_v40 = vpop.f32.mrb[195].mxu0  ;;  %v7138_v41 = vpop.f32.mrb[195].mxu1 }
 0xcb1   : > { %v5943_v42 = vpop.f32.mrb[196].mxu0  ;;  %v5984_v43 = vpop.f32.mrb[196].mxu1 }
 0xcb2   : > { %v5990_v45 = vadd.f32 %v5943_v42, %v5886_v20  ;;  %v5992_v46 = vadd.f32 %v5984_v43, %v5888_v5  ;;  %v5945_v47 = vpop.f32.mrb[197].mxu0  ;;  %v7143_v49 = vpop.f32.mrb[197].mxu1 }
 0xcb3   : > { %v5991_v51 = vadd.f32 %v5945_v47, %v5887_v38  ;;  %v5947_v52 = vpop.f32.mrb[198].mxu0  ;;  %v5987_v53 = vpop.f32.mrb[198].mxu1 }
 0xcb4   : > { %v5948_v54 = vpop.f32.mrb[199].mxu0  ;;  %v7144_v55 = vpop.f32.mrb[199].mxu1 }
 0xcb5   : > { %v6443_v55 = vmul.f32 %v8274_v31, %v7378_v17 }
 0xcb9   : > { %v6047_v56 = vpop.f32.mrb[200].mxu0  ;;  %v6088_v57 = vpop.f32.mrb[200].mxu1 }
 0xcba   : > { %v6094_v58 = vadd.f32 %v6047_v56, %v5990_v45  ;;  %v6096_v59 = vadd.f32 %v6088_v57, %v5992_v46  ;;  %v6049_v60 = vpop.f32.mrb[201].mxu0  ;;  %v7149_v61 = vpop.f32.mrb[201].mxu1 }
 0xcbb   : > { %v6095_v63 = vadd.f32 %v6049_v60, %v5991_v51  ;;  %v6051_v13 = vpop.f32.mrb[202].mxu0  ;;  %v6091_v33 = vpop.f32.mrb[202].mxu1  ;;  %v6442_v61 = vmul.f32 %v8265_v14, %v7380_v18 }
 0xcbc   : > { %v6052_v29 = vpop.f32.mrb[203].mxu0  ;;  %v7150_v32 = vpop.f32.mrb[203].mxu1 }
 0xcc1   : > { %v6151_v1 = vpop.f32.mrb[204].mxu0  ;;  %v6192_v7 = vpop.f32.mrb[204].mxu1 }
 0xcc2   : > { %v6198_v8 = vadd.f32 %v6151_v1, %v6094_v58  ;;  %v6200_v9 = vadd.f32 %v6192_v7, %v6096_v59  ;;  %v6153_v11 = vpop.f32.mrb[205].mxu0  ;;  %v7155_v12 = vpop.f32.mrb[205].mxu1 }
 0xcc3   : > { %v6199_v35 = vadd.f32 %v6153_v11, %v6095_v63  ;;  %v6155_v44 = vpop.f32.mrb[206].mxu0  ;;  %v6195_v50 = vpop.f32.mrb[206].mxu1 }
 0xcc4   : > { %v6156_v15 = vpop.f32.mrb[207].mxu0  ;;  %v7156_v3 = vpop.f32.mrb[207].mxu1 }
 0xcc9   : > { %v6255_v2 = vpop.f32.mrb[208].mxu0  ;;  %v6296_v22 = vpop.f32.mrb[208].mxu1 }
 0xcca   : > { %v6302_v16 = vadd.f32 %v6255_v2, %v6198_v8  ;;  %v6304_v19 = vadd.f32 %v6296_v22, %v6200_v9  ;;  %v6257_v21 = vpop.f32.mrb[209].mxu0  ;;  %v7161_v23 = vpop.f32.mrb[209].mxu1 }
 0xccb   : > { %v6303_v24 = vadd.f32 %v6257_v21, %v6199_v35  ;;  %v6259_v27 = vpop.f32.mrb[210].mxu0  ;;  %v6299_v28 = vpop.f32.mrb[210].mxu1 }
 0xccc   : > { %v6260_v30 = vpop.f32.mrb[211].mxu0  ;;  %v7162_v20 = vpop.f32.mrb[211].mxu1 }
 0xcd1   : > { %v6359_v5 = vpop.f32.mrb[212].mxu0  ;;  %v6400_v36 = vpop.f32.mrb[212].mxu1 }
 0xcd2   : > { %v6406_v37 = vadd.f32 %v6359_v5, %v6302_v16  ;;  %v6408_v38 = vadd.f32 %v6400_v36, %v6304_v19  ;;  %v6361_v39 = vpop.f32.mrb[213].mxu0  ;;  %v7167_v48 = vpop.f32.mrb[213].mxu1 }
 0xcd3   : > { %v6407_v40 = vadd.f32 %v6361_v39, %v6303_v24  ;;  %v6363_v41 = vpop.f32.mrb[214].mxu0  ;;  %v6403_v42 = vpop.f32.mrb[214].mxu1 }
 0xcd4   : > { %v6409_v43 = vadd.f32 %v6406_v37, %v7815_v34  ;;  %v6411_v45 = vadd.f32 %v6408_v38, %v7815_v34  ;;  %v6364_v46 = vpop.f32.mrb[215].mxu0  ;;  %v7168_v47 = vpop.f32.mrb[215].mxu1 }
 0xcd5   : > { %v6410_v49 = vadd.f32 %v6407_v40, %v7815_v34 }
 0xcd6   : > { %7218 = vtanh.f32 %v6409_v43 }
 0xcd7   : > { %7220 = vtanh.f32 %v6411_v45 }
 0xcd8   : > { %7222 = vtanh.f32 %v6410_v49 }
 0xce0   : > { %v7219_v51 = vpop.eup %7218 }
 0xce1   : > { %v7221_v52 = vpop.eup %7220  ;;  %v6444_v53 = vmul.f32 %v7219_v51, %v7827_v62 }
 0xce2   : > { %v7223_v54 = vpop.eup %7222  ;;  %v6417_v56 = vpack.c.bf16 %v7221_v52, %v7221_v52  ;;  %v6446_v57 = vmul.f32 %v7221_v52, %v7835_v0  ;;  %v6727_v0 = vld [vmem:[%s7859_s20 + $0xc] sm:$0x3f] }
 0xce3   : > { %v6726_v58 = vpack.c.bf16 %v7223_v54, %v7219_v51  ;;  %v6445_v34 = vmul.f32 %v7223_v54, %v7843_v4 }
 0xce4   : > { %v6435_v59 = vrot.slane %v6417_v56, %v7848_v10  ;;  %v6452_v60 = vadd.f32 %v6446_v57, %v6443_v55 }
 0xce5   : > { %v6428_v62 = vrot.slane %v6726_v58, %v7848_v10  ;;  %v6449_v17 = vcombine.low %v6444_v53, %v6445_v34 }
 0xce6   : > { %v6454_v31 = vmul.f32 %v6452_v60, %v7624_v6 }
 0xce7   : > { %v6436_v63 = vcombine.low %v6428_v62, %v6435_v59  ;;  %v6451_v13 = vadd.f32 %v6449_v17, %v6442_v61 }
 0xce8   : > { %6456 = vst [vmem:[%s306_s10 + $0x8] sm:$0x7] %v6454_v31 }
 0xce9   : > { %v6440_v4 = vsel %vm7870_vm1, %v6436_v63, %v6727_v0  ;;  %v6453_v33 = vmul.f32 %v6451_v13, %v7868_v25 }
 0xcea   : > { %6728 = vst [vmem:[%s7859_s20 + $0xc] sm:$0x3f] %v6440_v4 }
 0xceb   : > { %6455 = vst [vmem:[%s306_s10] sm:$0x77] %v6453_v33 }
 0xcec PF: > { %s18_s24 = sadd.s32 1, %s7268_s24  }
 0xced   : > { %p15_p4 = scmp.ge.s32.totalorder %s18_s24, 4  }
 0xcef   :  { %17 = sbr.rel (!%p15_p4) target bundleno = 1 (0x1), region = 91 }

</bundles_post_ra>
